<compile_context>
chip_gen: v7x
topology: tpu7x:2x2x1
jax: 0.10.0
libtpu: 0.0.40
codegen_flags: <defaults>
</compile_context>

<pallas_src>
import functools

import numpy as np

import jax
import jax.numpy as jnp
from jax import lax
from jax.experimental import pallas as pl
from jax.experimental.pallas import tpu as pltpu


def _round_up(x, m):
    return (x + m - 1) // m * m


# ----------------------------------------------------------------------------
# Fused Pallas kernel: the entire VAE forward, 6 GEMMs + epilogues
# ----------------------------------------------------------------------------
def _vae_fused_kernel(x_ref, eps_ref, bias_ref,
                      t1_ref, t2_ref, wml_ref, wd_ref, td1_ref, td2_ref,
                      out_ref, ml_ref,
                      e1_lhs, e2_lhs, feat_sc, d0_sc, d1_lhs, d2_lhs,
                      *, B, Cimg, H0, W0, K, C1, C2, Z):
    f32, bf16 = jnp.float32, jnp.bfloat16
    H1, W1 = H0 - K + 1, W0 - K + 1          # after encConv1 / before decConv2
    H2, W2 = H1 - K + 1, W1 - K + 1          # after encConv2 / before decConv1
    PAD = K - 1
    WC0, WC1, WC2 = W0 * Cimg, W1 * C1, W2 * C2
    S0, S1, S2 = _round_up(WC0, 128), _round_up(WC1, 128), _round_up(WC2, 128)
    feat = H2 * WC2

    # Pre-zero the banded-LHS scratch once: pad lanes and the ConvTranspose
    # zero-row padding are all handled by these zeros (cheap, ~100 vreg stores).
    e1_lhs[...] = jnp.zeros_like(e1_lhs)
    e2_lhs[...] = jnp.zeros_like(e2_lhs)
    d1_lhs[...] = jnp.zeros_like(d1_lhs)
    d2_lhs[...] = jnp.zeros_like(d2_lhs)

    # ---------------- encConv1 + ReLU : one GEMM ------------------------------
    for b in range(B):
        for i in range(K):
            e1_lhs[b * H1:(b + 1) * H1, i * S0:i * S0 + WC0] = \
                x_ref[b * H0 + i: b * H0 + i + H1, :]
    a1 = jnp.dot(e1_lhs[...].astype(bf16), t1_ref[...],
                 preferred_element_type=f32)
    a1 = jnp.maximum(a1 + bias_ref[2:3, :WC1], 0.0)          # (B*H1, WC1)

    # ---------------- encConv2 + ReLU : one GEMM ------------------------------
    for b in range(B):
        for i in range(K):
            e2_lhs[b * H2:(b + 1) * H2, i * S1:i * S1 + WC1] = \
                a1[b * H1 + i: b * H1 + i + H2, :]
    a2 = jnp.dot(e2_lhs[...].astype(bf16), t2_ref[...],
                 preferred_element_type=f32)
    a2 = jnp.maximum(a2 + bias_ref[1:2, :WC2], 0.0)          # (B*H2, WC2)

    # ---------- encFC1 || encFC2 : flatten to (B, feat) then one deep GEMM ----
    for b in range(B):
        for h in range(H2):
            feat_sc[b:b + 1, h * WC2:(h + 1) * WC2] = \
                a2[b * H2 + h: b * H2 + h + 1, :]
    ml = jnp.dot(feat_sc[...].astype(bf16), wml_ref[...],
                 preferred_element_type=f32) + bias_ref[4:5, :2 * Z]
    ml_ref[...] = ml                                          # [mu | logVar]

    # ---------------- reparameterize (f32 epilogue) ---------------------------
    # NOTE: eps (torch.randn_like noise) is an explicit input for determinism.
    mu = ml[:, :Z]
    logvar = ml[:, Z:]
    z = mu + jnp.exp(logvar * 0.5) * eps_ref[...]             # (B, Z)

    # ---------------- decFC1 + ReLU : one GEMM, scatter to (B*H2, WC2) --------
    dfc = jnp.dot(z.astype(bf16), wd_ref[...], preferred_element_type=f32)
    dfc = jnp.maximum(dfc + bias_ref[0:1, :feat], 0.0)        # (B, feat)
    for b in range(B):
        for h in range(H2):
            d0_sc[b * H2 + h: b * H2 + h + 1, :] = \
                dfc[b:b + 1, h * WC2:(h + 1) * WC2]

    # ---------------- decConv1 + ReLU : one GEMM ------------------------------
    # Zero-row padding of the transposed conv is already in the pre-zeroed LHS.
    for b in range(B):
        for i in range(K):
            r0 = b * H1 + (PAD - i)
            d1_lhs[r0:r0 + H2, i * S2:i * S2 + WC2] = d0_sc[b * H2:(b + 1) * H2, :]
    g1 = jnp.dot(d1_lhs[...].astype(bf16), td1_ref[...],
                 preferred_element_type=f32)
    g1 = jnp.maximum(g1 + bias_ref[3:4, :WC1], 0.0)           # (B*H1, WC1)

    # ---------------- decConv2 + sigmoid : one GEMM ---------------------------
    for b in range(B):
        for i in range(K):
            r0 = b * H0 + (PAD - i)
            d2_lhs[r0:r0 + H1, i * S1:i * S1 + WC1] = g1[b * H1:(b + 1) * H1, :]
    o = jnp.dot(d2_lhs[...].astype(bf16), td2_ref[...],
                preferred_element_type=f32)
    out_ref[...] = jax.nn.sigmoid(o + bias_ref[5:6, :WC0])    # (B*H0, WC0)


# ----------------------------------------------------------------------------
# One-time weight packing (numpy, outside jit): conv -> ONE fused banded-
# Toeplitz matrix per layer (band slots padded to 128 lanes), FC weights
# permuted so PyTorch's (C,H,W) flatten order is absorbed, biases packed.
# ----------------------------------------------------------------------------
def _band_conv_weight(weq, w_in, slot):
    """Fused band matrix for a valid conv over (H, W*Cin) layout:
    out[ho] = concat_i(pad128(x[ho+i])) @ W, with W row-block i holding T_i."""
    cout, cin, kh, kw = weq.shape
    wo_n = w_in - kw + 1
    t = np.zeros((kh, w_in, cin, wo_n, cout), np.float32)
    for i in range(kh):
        for j in range(kw):
            for wo in range(wo_n):
                t[i, wo + j, :, wo, :] = weq[:, :, i, j].T
    t = t.reshape(kh, w_in * cin, wo_n * cout)
    full = np.zeros((kh * slot, wo_n * cout), np.float32)
    for i in range(kh):
        full[i * slot: i * slot + w_in * cin, :] = t[i]
    return full


def _band_tconv_weight(weq, w_in, slot):
    """Same, for stride-1 ConvTranspose (= valid conv of the (K-1)-zero-padded
    input with the flipped/in-out-swapped kernel). Column padding is folded
    into the band; row padding comes from the pre-zeroed LHS scratch."""
    cout, cin, kh, kw = weq.shape
    pad = kw - 1
    wo_n = w_in + kw - 1
    t = np.zeros((kh, w_in, cin, wo_n, cout), np.float32)
    for i in range(kh):
        for j in range(kw):
            for w in range(w_in):
                t[i, w, :, w + pad - j, :] = weq[:, :, i, j].T
    t = t.reshape(kh, w_in * cin, wo_n * cout)
    full = np.zeros((kh * slot, wo_n * cout), np.float32)
    for i in range(kh):
        full[i * slot: i * slot + w_in * cin, :] = t[i]
    return full


def prepare_params(params, img_channels, H0, W0, z_dim):
    K, C1, C2 = 5, 16, 32
    H1, W1 = H0 - K + 1, W0 - K + 1
    H2, W2 = H1 - K + 1, W1 - K + 1
    WC0, WC1, WC2 = W0 * img_channels, W1 * C1, W2 * C2
    S0, S1, S2 = _round_up(WC0, 128), _round_up(WC1, 128), _round_up(WC2, 128)
    feat = C2 * H2 * W2

    g = lambda k: np.asarray(params[k], np.float32)
    w1, b1 = g("encConv1_w"), g("encConv1_b")          # (16,Cimg,5,5)
    w2, b2 = g("encConv2_w"), g("encConv2_b")          # (32,16,5,5)
    wf1, bf1 = g("encFC1_w"), g("encFC1_b")            # (z, feat)
    wf2, bf2 = g("encFC2_w"), g("encFC2_b")
    wdf, bdf = g("decFC1_w"), g("decFC1_b")            # (feat, z)
    wt1, bt1 = g("decConv1_w"), g("decConv1_b")        # (32,16,5,5) (Cin,Cout,k,k)
    wt2, bt2 = g("decConv2_w"), g("decConv2_b")        # (16,Cimg,5,5)

    # encoder convs -> one fused band matrix each
    t1 = _band_conv_weight(w1, W0, S0)                 # (5*S0, WC1)
    t2 = _band_conv_weight(w2, W1, S1)                 # (5*S1, WC2)

    # encFC1 || encFC2 : rows reordered (c,h,w) -> (h,w,c), cols = [mu|logVar]
    def enc_fc(w):
        return np.transpose(w.reshape(z_dim, C2, H2, W2), (2, 3, 1, 0)).reshape(feat, z_dim)
    wml = np.concatenate([enc_fc(wf1), enc_fc(wf2)], axis=1)       # (feat, 2z)

    # decFC1 : output columns reordered (c,h,w) -> (h,w,c)
    wdk = np.transpose(wdf.reshape(C2, H2, W2, z_dim), (3, 1, 2, 0)).reshape(z_dim, feat)
    bdk = np.transpose(bdf.reshape(C2, H2, W2), (1, 2, 0)).reshape(feat)

    # transposed convs -> flipped / in-out-swapped equivalent conv kernels
    weq1 = np.transpose(wt1[:, :, ::-1, ::-1], (1, 0, 2, 3))       # (16, 32, 5, 5)
    weq2 = np.transpose(wt2[:, :, ::-1, ::-1], (1, 0, 2, 3))       # (Cimg, 16, 5, 5)
    td1 = _band_tconv_weight(weq1, W2, S2)             # (5*S2, WC1)
    td2 = _band_tconv_weight(weq2, W1, S1)             # (5*S1, WC0)

    # all small params packed into one (6, feat) f32 buffer -> single DMA
    bias_pack = np.zeros((6, feat), np.float32)
    bias_pack[0, :feat] = bdk                          # decFC1 bias (h,w,c)
    bias_pack[1, :WC2] = np.tile(b2, W2)               # encConv2
    bias_pack[2, :WC1] = np.tile(b1, W1)               # encConv1
    bias_pack[3, :WC1] = np.tile(bt1, W1)              # decConv1
    bias_pack[4, :2 * z_dim] = np.concatenate([bf1, bf2])  # encFC1 || encFC2
    bias_pack[5, :WC0] = np.tile(bt2, W0)              # decConv2

    bf = lambda a: jnp.asarray(a, jnp.bfloat16)
    return {
        "t1": bf(t1), "t2": bf(t2), "wml": bf(wml), "wd": bf(wdk),
        "td1": bf(td1), "td2": bf(td2),
        "bias": jnp.asarray(bias_pack, jnp.float32),
    }


# ----------------------------------------------------------------------------
# Forward wrapper: one pallas_call, tiny layout glue only at the boundary
# ----------------------------------------------------------------------------
def vae_forward(kparams, x_nchw, eps):
    B, Cimg, H0, W0 = x_nchw.shape
    Z = eps.shape[1]
    K, C1, C2 = 5, 16, 32
    H1, W1 = H0 - K + 1, W0 - K + 1
    H2, W2 = H1 - K + 1, W1 - K + 1
    WC0, WC1, WC2 = W0 * Cimg, W1 * C1, W2 * C2
    S0, S1, S2 = _round_up(WC0, 128), _round_up(WC1, 128), _round_up(WC2, 128)
    feat = C2 * H2 * W2

    # NCHW -> (B*H, W*C) with channels minor (for Cimg=1 this is a pure reshape)
    x2d = jnp.transpose(x_nchw, (0, 2, 3, 1)).reshape(B * H0, WC0)

    kernel = functools.partial(
        _vae_fused_kernel, B=B, Cimg=Cimg, H0=H0, W0=W0, K=K, C1=C1, C2=C2, Z=Z)

    out2d, ml = pl.pallas_call(
        kernel,
        out_shape=(jax.ShapeDtypeStruct((B * H0, WC0), jnp.float32),
                   jax.ShapeDtypeStruct((B, 2 * Z), jnp.float32)),
        scratch_shapes=[
            pltpu.VMEM((B * H1, K * S0), jnp.float32),   # conv1 banded LHS
            pltpu.VMEM((B * H2, K * S1), jnp.float32),   # conv2 banded LHS
            pltpu.VMEM((B, feat), jnp.float32),          # flattened enc features
            pltpu.VMEM((B * H2, WC2), jnp.float32),      # decFC1 in conv layout
            pltpu.VMEM((B * H1, K * S2), jnp.float32),   # deconv1 banded LHS
            pltpu.VMEM((B * H0, K * S1), jnp.float32),   # deconv2 banded LHS
        ],
        compiler_params=pltpu.CompilerParams(vmem_limit_bytes=8 * 1024 * 1024),
    )(x2d, eps, kparams["bias"],
      kparams["t1"], kparams["t2"], kparams["wml"], kparams["wd"],
      kparams["td1"], kparams["td2"])

    out = jnp.transpose(out2d.reshape(B, H0, W0, Cimg), (0, 3, 1, 2))
    return out, ml[:, :Z], ml[:, Z:]


# ----------------------------------------------------------------------------
# Pure-JAX reference (PyTorch semantics) for numerical validation
# ----------------------------------------------------------------------------
def vae_reference(params, x, eps):
    B = x.shape[0]
    dn = ("NCHW", "OIHW", "NCHW")
    hp = lax.Precision.HIGHEST

    def conv(a, w, b, pad):
        y = lax.conv_general_dilated(a, w, (1, 1), [(pad, pad), (pad, pad)],
                                     dimension_numbers=dn, precision=hp)
        return y + b.reshape(1, -1, 1, 1)

    a = jax.nn.relu(conv(x, params["encConv1_w"], params["encConv1_b"], 0))
    a = jax.nn.relu(conv(a, params["encConv2_w"], params["encConv2_b"], 0))
    flat = a.reshape(B, -1)
    mu = jnp.dot(flat, params["encFC1_w"].T, precision=hp) + params["encFC1_b"]
    logvar = jnp.dot(flat, params["encFC2_w"].T, precision=hp) + params["encFC2_b"]
    z = mu + jnp.exp(0.5 * logvar) * eps
    h = jax.nn.relu(jnp.dot(z, params["decFC1_w"].T, precision=hp) + params["decFC1_b"])
    h = h.reshape(B, 32, a.shape[2], a.shape[3])

    def deconv(a, wt, b):
        weq = jnp.transpose(jnp.flip(wt, (2, 3)), (1, 0, 2, 3))
        return conv(a, weq, b, wt.shape[-1] - 1)

    g = jax.nn.relu(deconv(h, params["decConv1_w"], params["decConv1_b"]))
    out = jax.nn.sigmoid(deconv(g, params["decConv2_w"], params["decConv2_b"]))
    return out, mu, logvar


# ----------------------------------------------------------------------------
# Deterministic parameter construction (PyTorch-native layouts)
# ----------------------------------------------------------------------------
def init_params(img_channels, feature_dim, z_dim, key):
    ks = jax.random.split(key, 14)
    s = 0.05
    n = lambda k, shape: jax.random.normal(k, shape, jnp.float32) * s
    return {
        "encConv1_w": n(ks[0], (16, img_channels, 5, 5)),
        "encConv1_b": n(ks[1], (16,)),
        "encConv2_w": n(ks[2], (32, 16, 5, 5)),
        "encConv2_b": n(ks[3], (32,)),
        "encFC1_w": n(ks[4], (z_dim, feature_dim)),
        "encFC1_b": n(ks[5], (z_dim,)),
        "encFC2_w": n(ks[6], (z_dim, feature_dim)),
        "encFC2_b": n(ks[7], (z_dim,)),
        "decFC1_w": n(ks[8], (feature_dim, z_dim)),
        "decFC1_b": n(ks[9], (feature_dim,)),
        "decConv1_w": n(ks[10], (32, 16, 5, 5)),
        "decConv1_b": n(ks[11], (16,)),
        "decConv2_w": n(ks[12], (16, img_channels, 5, 5)),
        "decConv2_b": n(ks[13], (img_channels,)),
    }


if __name__ == "__main__":
    B, C_IMG, H, W = 2, 1, 16, 16
    Z_DIM = 32
    FEATURE_DIM = 32 * (H - 8) * (W - 8)        # 32 * 8 * 8 = 2048

    root = jax.random.PRNGKey(0)
    k_x, k_eps, k_p = jax.random.split(root, 3)

    x = jax.random.normal(k_x, (B, C_IMG, H, W), jnp.float32)
    eps = jax.random.normal(k_eps, (B, Z_DIM), jnp.float32)    # randn_like(std)
    params = init_params(C_IMG, FEATURE_DIM, Z_DIM, k_p)
    kparams = prepare_params(params, C_IMG, H, W, Z_DIM)       # one-time packing

    fwd = jax.jit(vae_forward)
    out, mu, logvar = fwd(kparams, x, eps)
    jax.block_until_ready((out, mu, logvar))

    assert out.shape == (B, C_IMG, H, W)
    assert mu.shape == (B, Z_DIM) and logvar.shape == (B, Z_DIM)
    assert bool(jnp.all(jnp.isfinite(out)))
    assert bool(jnp.all((out >= 0.0) & (out <= 1.0)))          # sigmoid output

    # numerical check against a pure-JAX reference of the PyTorch module
    # (bf16 GEMM weights, f32 accumulation/epilogues -> 2e-2 tolerance)
    r_out, r_mu, r_lv = jax.jit(vae_reference)(params, x, eps)
    np.testing.assert_allclose(np.asarray(out), np.asarray(r_out), rtol=2e-2, atol=2e-2)
    np.testing.assert_allclose(np.asarray(mu), np.asarray(r_mu), rtol=2e-2, atol=2e-2)
    np.testing.assert_allclose(np.asarray(logvar), np.asarray(r_lv), rtol=2e-2, atol=2e-2)

    print("KERNEL_OK")
</pallas_src>

<mosaic_0001>
module attributes {stable_mosaic.version = 11 : i64} {
  func.func @_vae_fused_kernel(%arg0: memref<32x16xf32, #tpu.memory_space<vmem>>, %arg1: memref<2x32xf32, #tpu.memory_space<vmem>>, %arg2: memref<6x2048xf32, #tpu.memory_space<vmem>>, %arg3: memref<640x192xbf16, #tpu.memory_space<vmem>>, %arg4: memref<1280x256xbf16, #tpu.memory_space<vmem>>, %arg5: memref<2048x64xbf16, #tpu.memory_space<vmem>>, %arg6: memref<32x2048xbf16, #tpu.memory_space<vmem>>, %arg7: memref<1280x192xbf16, #tpu.memory_space<vmem>>, %arg8: memref<1280x16xbf16, #tpu.memory_space<vmem>>, %arg9: memref<32x16xf32, #tpu.memory_space<vmem>>, %arg10: memref<2x64xf32, #tpu.memory_space<vmem>>, %arg11: memref<24x640xf32, #tpu.memory_space<vmem>>, %arg12: memref<16x1280xf32, #tpu.memory_space<vmem>>, %arg13: memref<2x2048xf32, #tpu.memory_space<vmem>>, %arg14: memref<16x256xf32, #tpu.memory_space<vmem>>, %arg15: memref<24x1280xf32, #tpu.memory_space<vmem>>, %arg16: memref<32x1280xf32, #tpu.memory_space<vmem>>) attributes {dimension_semantics = [], scalar_prefetch = 0 : i64, scratch_operands = 6 : i64, tpu.core_type = #tpu.core_type<tc>} {
    %cst = arith.constant 0.000000e+00 : f32
    %0 = vector.broadcast %cst : f32 to vector<24x640xf32>
    %c0 = arith.constant 0 : index
    %c0_0 = arith.constant 0 : index
    %1 = vector.load %arg11[%c0, %c0_0] : memref<24x640xf32, #tpu.memory_space<vmem>>, vector<24x640xf32>
    tpu.vector_store %arg11[%c0, %c0_0], %0 {strides = array<i32>} : memref<24x640xf32, #tpu.memory_space<vmem>>, vector<24x640xf32>,
    %cst_1 = arith.constant 0.000000e+00 : f32
    %2 = vector.broadcast %cst_1 : f32 to vector<16x1280xf32>
    %c0_2 = arith.constant 0 : index
    %c0_3 = arith.constant 0 : index
    %3 = vector.load %arg12[%c0_2, %c0_3] : memref<16x1280xf32, #tpu.memory_space<vmem>>, vector<16x1280xf32>
    tpu.vector_store %arg12[%c0_2, %c0_3], %2 {strides = array<i32>} : memref<16x1280xf32, #tpu.memory_space<vmem>>, vector<16x1280xf32>,
    %cst_4 = arith.constant 0.000000e+00 : f32
    %4 = vector.broadcast %cst_4 : f32 to vector<24x1280xf32>
    %c0_5 = arith.constant 0 : index
    %c0_6 = arith.constant 0 : index
    %5 = vector.load %arg15[%c0_5, %c0_6] : memref<24x1280xf32, #tpu.memory_space<vmem>>, vector<24x1280xf32>
    tpu.vector_store %arg15[%c0_5, %c0_6], %4 {strides = array<i32>} : memref<24x1280xf32, #tpu.memory_space<vmem>>, vector<24x1280xf32>,
    %cst_7 = arith.constant 0.000000e+00 : f32
    %6 = vector.broadcast %cst_7 : f32 to vector<32x1280xf32>
    %c0_8 = arith.constant 0 : index
    %c0_9 = arith.constant 0 : index
    %7 = vector.load %arg16[%c0_8, %c0_9] : memref<32x1280xf32, #tpu.memory_space<vmem>>, vector<32x1280xf32>
    tpu.vector_store %arg16[%c0_8, %c0_9], %6 {strides = array<i32>} : memref<32x1280xf32, #tpu.memory_space<vmem>>, vector<32x1280xf32>,
    %c0_10 = arith.constant 0 : index
    %c0_11 = arith.constant 0 : index
    %8 = vector.load %arg0[%c0_10, %c0_11] : memref<32x16xf32, #tpu.memory_space<vmem>>, vector<12x16xf32>
    %c0_12 = arith.constant 0 : index
    %c0_13 = arith.constant 0 : index
    %9 = vector.load %arg11[%c0_12, %c0_13] : memref<24x640xf32, #tpu.memory_space<vmem>>, vector<12x16xf32>
    tpu.vector_store %arg11[%c0_12, %c0_13], %8 {strides = array<i32>} : memref<24x640xf32, #tpu.memory_space<vmem>>, vector<12x16xf32>,
    %c1 = arith.constant 1 : index
    %c0_14 = arith.constant 0 : index
    %10 = vector.load %arg0[%c1, %c0_14] : memref<32x16xf32, #tpu.memory_space<vmem>>, vector<12x16xf32>
    %c0_15 = arith.constant 0 : index
    %c128 = arith.constant 128 : index
    %11 = vector.load %arg11[%c0_15, %c128] : memref<24x640xf32, #tpu.memory_space<vmem>>, vector<12x16xf32>
    tpu.vector_store %arg11[%c0_15, %c128], %10 {strides = array<i32>} : memref<24x640xf32, #tpu.memory_space<vmem>>, vector<12x16xf32>,
    %c2 = arith.constant 2 : index
    %c0_16 = arith.constant 0 : index
    %12 = vector.load %arg0[%c2, %c0_16] : memref<32x16xf32, #tpu.memory_space<vmem>>, vector<12x16xf32>
    %c0_17 = arith.constant 0 : index
    %c256 = arith.constant 256 : index
    %13 = vector.load %arg11[%c0_17, %c256] : memref<24x640xf32, #tpu.memory_space<vmem>>, vector<12x16xf32>
    tpu.vector_store %arg11[%c0_17, %c256], %12 {strides = array<i32>} : memref<24x640xf32, #tpu.memory_space<vmem>>, vector<12x16xf32>,
    %c3 = arith.constant 3 : index
    %c0_18 = arith.constant 0 : index
    %14 = vector.load %arg0[%c3, %c0_18] : memref<32x16xf32, #tpu.memory_space<vmem>>, vector<12x16xf32>
    %c0_19 = arith.constant 0 : index
    %c384 = arith.constant 384 : index
    %15 = vector.load %arg11[%c0_19, %c384] : memref<24x640xf32, #tpu.memory_space<vmem>>, vector<12x16xf32>
    tpu.vector_store %arg11[%c0_19, %c384], %14 {strides = array<i32>} : memref<24x640xf32, #tpu.memory_space<vmem>>, vector<12x16xf32>,
    %c4 = arith.constant 4 : index
    %c0_20 = arith.constant 0 : index
    %16 = vector.load %arg0[%c4, %c0_20] : memref<32x16xf32, #tpu.memory_space<vmem>>, vector<12x16xf32>
    %c0_21 = arith.constant 0 : index
    %c512 = arith.constant 512 : index
    %17 = vector.load %arg11[%c0_21, %c512] : memref<24x640xf32, #tpu.memory_space<vmem>>, vector<12x16xf32>
    tpu.vector_store %arg11[%c0_21, %c512], %16 {strides = array<i32>} : memref<24x640xf32, #tpu.memory_space<vmem>>, vector<12x16xf32>,
    %c16 = arith.constant 16 : index
    %c0_22 = arith.constant 0 : index
    %18 = vector.load %arg0[%c16, %c0_22] : memref<32x16xf32, #tpu.memory_space<vmem>>, vector<12x16xf32>
    %c12 = arith.constant 12 : index
    %c0_23 = arith.constant 0 : index
    %19 = vector.load %arg11[%c12, %c0_23] : memref<24x640xf32, #tpu.memory_space<vmem>>, vector<12x16xf32>
    tpu.vector_store %arg11[%c12, %c0_23], %18 {strides = array<i32>} : memref<24x640xf32, #tpu.memory_space<vmem>>, vector<12x16xf32>,
    %c17 = arith.constant 17 : index
    %c0_24 = arith.constant 0 : index
    %20 = vector.load %arg0[%c17, %c0_24] : memref<32x16xf32, #tpu.memory_space<vmem>>, vector<12x16xf32>
    %c12_25 = arith.constant 12 : index
    %c128_26 = arith.constant 128 : index
    %21 = vector.load %arg11[%c12_25, %c128_26] : memref<24x640xf32, #tpu.memory_space<vmem>>, vector<12x16xf32>
    tpu.vector_store %arg11[%c12_25, %c128_26], %20 {strides = array<i32>} : memref<24x640xf32, #tpu.memory_space<vmem>>, vector<12x16xf32>,
    %c18 = arith.constant 18 : index
    %c0_27 = arith.constant 0 : index
    %22 = vector.load %arg0[%c18, %c0_27] : memref<32x16xf32, #tpu.memory_space<vmem>>, vector<12x16xf32>
    %c12_28 = arith.constant 12 : index
    %c256_29 = arith.constant 256 : index
    %23 = vector.load %arg11[%c12_28, %c256_29] : memref<24x640xf32, #tpu.memory_space<vmem>>, vector<12x16xf32>
    tpu.vector_store %arg11[%c12_28, %c256_29], %22 {strides = array<i32>} : memref<24x640xf32, #tpu.memory_space<vmem>>, vector<12x16xf32>,
    %c19 = arith.constant 19 : index
    %c0_30 = arith.constant 0 : index
    %24 = vector.load %arg0[%c19, %c0_30] : memref<32x16xf32, #tpu.memory_space<vmem>>, vector<12x16xf32>
    %c12_31 = arith.constant 12 : index
    %c384_32 = arith.constant 384 : index
    %25 = vector.load %arg11[%c12_31, %c384_32] : memref<24x640xf32, #tpu.memory_space<vmem>>, vector<12x16xf32>
    tpu.vector_store %arg11[%c12_31, %c384_32], %24 {strides = array<i32>} : memref<24x640xf32, #tpu.memory_space<vmem>>, vector<12x16xf32>,
    %c20 = arith.constant 20 : index
    %c0_33 = arith.constant 0 : index
    %26 = vector.load %arg0[%c20, %c0_33] : memref<32x16xf32, #tpu.memory_space<vmem>>, vector<12x16xf32>
    %c12_34 = arith.constant 12 : index
    %c512_35 = arith.constant 512 : index
    %27 = vector.load %arg11[%c12_34, %c512_35] : memref<24x640xf32, #tpu.memory_space<vmem>>, vector<12x16xf32>
    tpu.vector_store %arg11[%c12_34, %c512_35], %26 {strides = array<i32>} : memref<24x640xf32, #tpu.memory_space<vmem>>, vector<12x16xf32>,
    %c0_36 = arith.constant 0 : index
    %c0_37 = arith.constant 0 : index
    %28 = vector.load %arg11[%c0_36, %c0_37] : memref<24x640xf32, #tpu.memory_space<vmem>>, vector<24x640xf32>
    %29 = arith.truncf %28 : vector<24x640xf32> to vector<24x640xbf16>
    %c0_38 = arith.constant 0 : index
    %c0_39 = arith.constant 0 : index
    %30 = vector.load %arg3[%c0_38, %c0_39] : memref<640x192xbf16, #tpu.memory_space<vmem>>, vector<640x192xbf16>
    %cst_40 = arith.constant dense<0.000000e+00> : vector<24x192xf32>
    %31 = tpu.matmul %29, %30, %cst_40 {dimension_numbers = #tpu.dot_dimension_numbers<[1], [0], [0], [1], [0, 0, 1, 1], [], []>} : vector<24x640xbf16>, vector<640x192xbf16>, vector<24x192xf32> -> vector<24x192xf32>
    %c2_41 = arith.constant 2 : index
    %c0_42 = arith.constant 0 : index
    %32 = vector.load %arg2[%c2_41, %c0_42] : memref<6x2048xf32, #tpu.memory_space<vmem>>, vector<1x192xf32>
    %33 = vector.broadcast %32 : vector<1x192xf32> to vector<24x192xf32>
    %34 = arith.addf %31, %33 : vector<24x192xf32>
    %cst_43 = arith.constant 0.000000e+00 : f32
    %35 = vector.broadcast %cst_43 : f32 to vector<24x192xf32>
    %36 = arith.maximumf %34, %35 : vector<24x192xf32>
    %37 = vector.extract_strided_slice %36 {offsets = [0, 0], sizes = [8, 192], strides = [1, 1]} : vector<24x192xf32> to vector<8x192xf32>
    %c0_44 = arith.constant 0 : index
    %c0_45 = arith.constant 0 : index
    %38 = vector.load %arg12[%c0_44, %c0_45] : memref<16x1280xf32, #tpu.memory_space<vmem>>, vector<8x192xf32>
    tpu.vector_store %arg12[%c0_44, %c0_45], %37 {strides = array<i32>} : memref<16x1280xf32, #tpu.memory_space<vmem>>, vector<8x192xf32>,
    %39 = vector.extract_strided_slice %36 {offsets = [1, 0], sizes = [8, 192], strides = [1, 1]} : vector<24x192xf32> to vector<8x192xf32>
    %c0_46 = arith.constant 0 : index
    %c256_47 = arith.constant 256 : index
    %40 = vector.load %arg12[%c0_46, %c256_47] : memref<16x1280xf32, #tpu.memory_space<vmem>>, vector<8x192xf32>
    tpu.vector_store %arg12[%c0_46, %c256_47], %39 {strides = array<i32>} : memref<16x1280xf32, #tpu.memory_space<vmem>>, vector<8x192xf32>,
    %41 = vector.extract_strided_slice %36 {offsets = [2, 0], sizes = [8, 192], strides = [1, 1]} : vector<24x192xf32> to vector<8x192xf32>
    %c0_48 = arith.constant 0 : index
    %c512_49 = arith.constant 512 : index
    %42 = vector.load %arg12[%c0_48, %c512_49] : memref<16x1280xf32, #tpu.memory_space<vmem>>, vector<8x192xf32>
    tpu.vector_store %arg12[%c0_48, %c512_49], %41 {strides = array<i32>} : memref<16x1280xf32, #tpu.memory_space<vmem>>, vector<8x192xf32>,
    %43 = vector.extract_strided_slice %36 {offsets = [3, 0], sizes = [8, 192], strides = [1, 1]} : vector<24x192xf32> to vector<8x192xf32>
    %c0_50 = arith.constant 0 : index
    %c768 = arith.constant 768 : index
    %44 = vector.load %arg12[%c0_50, %c768] : memref<16x1280xf32, #tpu.memory_space<vmem>>, vector<8x192xf32>
    tpu.vector_store %arg12[%c0_50, %c768], %43 {strides = array<i32>} : memref<16x1280xf32, #tpu.memory_space<vmem>>, vector<8x192xf32>,
    %45 = vector.extract_strided_slice %36 {offsets = [4, 0], sizes = [8, 192], strides = [1, 1]} : vector<24x192xf32> to vector<8x192xf32>
    %c0_51 = arith.constant 0 : index
    %c1024 = arith.constant 1024 : index
    %46 = vector.load %arg12[%c0_51, %c1024] : memref<16x1280xf32, #tpu.memory_space<vmem>>, vector<8x192xf32>
    tpu.vector_store %arg12[%c0_51, %c1024], %45 {strides = array<i32>} : memref<16x1280xf32, #tpu.memory_space<vmem>>, vector<8x192xf32>,
    %47 = vector.extract_strided_slice %36 {offsets = [12, 0], sizes = [8, 192], strides = [1, 1]} : vector<24x192xf32> to vector<8x192xf32>
    %c8 = arith.constant 8 : index
    %c0_52 = arith.constant 0 : index
    %48 = vector.load %arg12[%c8, %c0_52] : memref<16x1280xf32, #tpu.memory_space<vmem>>, vector<8x192xf32>
    tpu.vector_store %arg12[%c8, %c0_52], %47 {strides = array<i32>} : memref<16x1280xf32, #tpu.memory_space<vmem>>, vector<8x192xf32>,
    %49 = vector.extract_strided_slice %36 {offsets = [13, 0], sizes = [8, 192], strides = [1, 1]} : vector<24x192xf32> to vector<8x192xf32>
    %c8_53 = arith.constant 8 : index
    %c256_54 = arith.constant 256 : index
    %50 = vector.load %arg12[%c8_53, %c256_54] : memref<16x1280xf32, #tpu.memory_space<vmem>>, vector<8x192xf32>
    tpu.vector_store %arg12[%c8_53, %c256_54], %49 {strides = array<i32>} : memref<16x1280xf32, #tpu.memory_space<vmem>>, vector<8x192xf32>,
    %51 = vector.extract_strided_slice %36 {offsets = [14, 0], sizes = [8, 192], strides = [1, 1]} : vector<24x192xf32> to vector<8x192xf32>
    %c8_55 = arith.constant 8 : index
    %c512_56 = arith.constant 512 : index
    %52 = vector.load %arg12[%c8_55, %c512_56] : memref<16x1280xf32, #tpu.memory_space<vmem>>, vector<8x192xf32>
    tpu.vector_store %arg12[%c8_55, %c512_56], %51 {strides = array<i32>} : memref<16x1280xf32, #tpu.memory_space<vmem>>, vector<8x192xf32>,
    %53 = vector.extract_strided_slice %36 {offsets = [15, 0], sizes = [8, 192], strides = [1, 1]} : vector<24x192xf32> to vector<8x192xf32>
    %c8_57 = arith.constant 8 : index
    %c768_58 = arith.constant 768 : index
    %54 = vector.load %arg12[%c8_57, %c768_58] : memref<16x1280xf32, #tpu.memory_space<vmem>>, vector<8x192xf32>
    tpu.vector_store %arg12[%c8_57, %c768_58], %53 {strides = array<i32>} : memref<16x1280xf32, #tpu.memory_space<vmem>>, vector<8x192xf32>,
    %55 = vector.extract_strided_slice %36 {offsets = [16, 0], sizes = [8, 192], strides = [1, 1]} : vector<24x192xf32> to vector<8x192xf32>
    %c8_59 = arith.constant 8 : index
    %c1024_60 = arith.constant 1024 : index
    %56 = vector.load %arg12[%c8_59, %c1024_60] : memref<16x1280xf32, #tpu.memory_space<vmem>>, vector<8x192xf32>
    tpu.vector_store %arg12[%c8_59, %c1024_60], %55 {strides = array<i32>} : memref<16x1280xf32, #tpu.memory_space<vmem>>, vector<8x192xf32>,
    %c0_61 = arith.constant 0 : index
    %c0_62 = arith.constant 0 : index
    %57 = vector.load %arg12[%c0_61, %c0_62] : memref<16x1280xf32, #tpu.memory_space<vmem>>, vector<16x1280xf32>
    %58 = arith.truncf %57 : vector<16x1280xf32> to vector<16x1280xbf16>
    %c0_63 = arith.constant 0 : index
    %c0_64 = arith.constant 0 : index
    %59 = vector.load %arg4[%c0_63, %c0_64] : memref<1280x256xbf16, #tpu.memory_space<vmem>>, vector<1280x256xbf16>
    %cst_65 = arith.constant dense<0.000000e+00> : vector<16x256xf32>
    %60 = tpu.matmul %58, %59, %cst_65 {dimension_numbers = #tpu.dot_dimension_numbers<[1], [0], [0], [1], [0, 0, 1, 1], [], []>} : vector<16x1280xbf16>, vector<1280x256xbf16>, vector<16x256xf32> -> vector<16x256xf32>
    %c1_66 = arith.constant 1 : index
    %c0_67 = arith.constant 0 : index
    %61 = vector.load %arg2[%c1_66, %c0_67] : memref<6x2048xf32, #tpu.memory_space<vmem>>, vector<1x256xf32>
    %62 = vector.broadcast %61 : vector<1x256xf32> to vector<16x256xf32>
    %63 = arith.addf %60, %62 : vector<16x256xf32>
    %cst_68 = arith.constant 0.000000e+00 : f32
    %64 = vector.broadcast %cst_68 : f32 to vector<16x256xf32>
    %65 = arith.maximumf %63, %64 : vector<16x256xf32>
    %66 = vector.extract_strided_slice %65 {offsets = [0, 0], sizes = [1, 256], strides = [1, 1]} : vector<16x256xf32> to vector<1x256xf32>
    %c0_69 = arith.constant 0 : index
    %c0_70 = arith.constant 0 : index
    %67 = vector.load %arg13[%c0_69, %c0_70] : memref<2x2048xf32, #tpu.memory_space<vmem>>, vector<1x256xf32>
    tpu.vector_store %arg13[%c0_69, %c0_70], %66 {strides = array<i32>} : memref<2x2048xf32, #tpu.memory_space<vmem>>, vector<1x256xf32>,
    %68 = vector.extract_strided_slice %65 {offsets = [1, 0], sizes = [1, 256], strides = [1, 1]} : vector<16x256xf32> to vector<1x256xf32>
    %c0_71 = arith.constant 0 : index
    %c256_72 = arith.constant 256 : index
    %69 = vector.load %arg13[%c0_71, %c256_72] : memref<2x2048xf32, #tpu.memory_space<vmem>>, vector<1x256xf32>
    tpu.vector_store %arg13[%c0_71, %c256_72], %68 {strides = array<i32>} : memref<2x2048xf32, #tpu.memory_space<vmem>>, vector<1x256xf32>,
    %70 = vector.extract_strided_slice %65 {offsets = [2, 0], sizes = [1, 256], strides = [1, 1]} : vector<16x256xf32> to vector<1x256xf32>
    %c0_73 = arith.constant 0 : index
    %c512_74 = arith.constant 512 : index
    %71 = vector.load %arg13[%c0_73, %c512_74] : memref<2x2048xf32, #tpu.memory_space<vmem>>, vector<1x256xf32>
    tpu.vector_store %arg13[%c0_73, %c512_74], %70 {strides = array<i32>} : memref<2x2048xf32, #tpu.memory_space<vmem>>, vector<1x256xf32>,
    %72 = vector.extract_strided_slice %65 {offsets = [3, 0], sizes = [1, 256], strides = [1, 1]} : vector<16x256xf32> to vector<1x256xf32>
    %c0_75 = arith.constant 0 : index
    %c768_76 = arith.constant 768 : index
    %73 = vector.load %arg13[%c0_75, %c768_76] : memref<2x2048xf32, #tpu.memory_space<vmem>>, vector<1x256xf32>
    tpu.vector_store %arg13[%c0_75, %c768_76], %72 {strides = array<i32>} : memref<2x2048xf32, #tpu.memory_space<vmem>>, vector<1x256xf32>,
    %74 = vector.extract_strided_slice %65 {offsets = [4, 0], sizes = [1, 256], strides = [1, 1]} : vector<16x256xf32> to vector<1x256xf32>
    %c0_77 = arith.constant 0 : index
    %c1024_78 = arith.constant 1024 : index
    %75 = vector.load %arg13[%c0_77, %c1024_78] : memref<2x2048xf32, #tpu.memory_space<vmem>>, vector<1x256xf32>
    tpu.vector_store %arg13[%c0_77, %c1024_78], %74 {strides = array<i32>} : memref<2x2048xf32, #tpu.memory_space<vmem>>, vector<1x256xf32>,
    %76 = vector.extract_strided_slice %65 {offsets = [5, 0], sizes = [1, 256], strides = [1, 1]} : vector<16x256xf32> to vector<1x256xf32>
    %c0_79 = arith.constant 0 : index
    %c1280 = arith.constant 1280 : index
    %77 = vector.load %arg13[%c0_79, %c1280] : memref<2x2048xf32, #tpu.memory_space<vmem>>, vector<1x256xf32>
    tpu.vector_store %arg13[%c0_79, %c1280], %76 {strides = array<i32>} : memref<2x2048xf32, #tpu.memory_space<vmem>>, vector<1x256xf32>,
    %78 = vector.extract_strided_slice %65 {offsets = [6, 0], sizes = [1, 256], strides = [1, 1]} : vector<16x256xf32> to vector<1x256xf32>
    %c0_80 = arith.constant 0 : index
    %c1536 = arith.constant 1536 : index
    %79 = vector.load %arg13[%c0_80, %c1536] : memref<2x2048xf32, #tpu.memory_space<vmem>>, vector<1x256xf32>
    tpu.vector_store %arg13[%c0_80, %c1536], %78 {strides = array<i32>} : memref<2x2048xf32, #tpu.memory_space<vmem>>, vector<1x256xf32>,
    %80 = vector.extract_strided_slice %65 {offsets = [7, 0], sizes = [1, 256], strides = [1, 1]} : vector<16x256xf32> to vector<1x256xf32>
    %c0_81 = arith.constant 0 : index
    %c1792 = arith.constant 1792 : index
    %81 = vector.load %arg13[%c0_81, %c1792] : memref<2x2048xf32, #tpu.memory_space<vmem>>, vector<1x256xf32>
    tpu.vector_store %arg13[%c0_81, %c1792], %80 {strides = array<i32>} : memref<2x2048xf32, #tpu.memory_space<vmem>>, vector<1x256xf32>,
    %82 = vector.extract_strided_slice %65 {offsets = [8, 0], sizes = [1, 256], strides = [1, 1]} : vector<16x256xf32> to vector<1x256xf32>
    %c1_82 = arith.constant 1 : index
    %c0_83 = arith.constant 0 : index
    %83 = vector.load %arg13[%c1_82, %c0_83] : memref<2x2048xf32, #tpu.memory_space<vmem>>, vector<1x256xf32>
    tpu.vector_store %arg13[%c1_82, %c0_83], %82 {strides = array<i32>} : memref<2x2048xf32, #tpu.memory_space<vmem>>, vector<1x256xf32>,
    %84 = vector.extract_strided_slice %65 {offsets = [9, 0], sizes = [1, 256], strides = [1, 1]} : vector<16x256xf32> to vector<1x256xf32>
    %c1_84 = arith.constant 1 : index
    %c256_85 = arith.constant 256 : index
    %85 = vector.load %arg13[%c1_84, %c256_85] : memref<2x2048xf32, #tpu.memory_space<vmem>>, vector<1x256xf32>
    tpu.vector_store %arg13[%c1_84, %c256_85], %84 {strides = array<i32>} : memref<2x2048xf32, #tpu.memory_space<vmem>>, vector<1x256xf32>,
    %86 = vector.extract_strided_slice %65 {offsets = [10, 0], sizes = [1, 256], strides = [1, 1]} : vector<16x256xf32> to vector<1x256xf32>
    %c1_86 = arith.constant 1 : index
    %c512_87 = arith.constant 512 : index
    %87 = vector.load %arg13[%c1_86, %c512_87] : memref<2x2048xf32, #tpu.memory_space<vmem>>, vector<1x256xf32>
    tpu.vector_store %arg13[%c1_86, %c512_87], %86 {strides = array<i32>} : memref<2x2048xf32, #tpu.memory_space<vmem>>, vector<1x256xf32>,
    %88 = vector.extract_strided_slice %65 {offsets = [11, 0], sizes = [1, 256], strides = [1, 1]} : vector<16x256xf32> to vector<1x256xf32>
    %c1_88 = arith.constant 1 : index
    %c768_89 = arith.constant 768 : index
    %89 = vector.load %arg13[%c1_88, %c768_89] : memref<2x2048xf32, #tpu.memory_space<vmem>>, vector<1x256xf32>
    tpu.vector_store %arg13[%c1_88, %c768_89], %88 {strides = array<i32>} : memref<2x2048xf32, #tpu.memory_space<vmem>>, vector<1x256xf32>,
    %90 = vector.extract_strided_slice %65 {offsets = [12, 0], sizes = [1, 256], strides = [1, 1]} : vector<16x256xf32> to vector<1x256xf32>
    %c1_90 = arith.constant 1 : index
    %c1024_91 = arith.constant 1024 : index
    %91 = vector.load %arg13[%c1_90, %c1024_91] : memref<2x2048xf32, #tpu.memory_space<vmem>>, vector<1x256xf32>
    tpu.vector_store %arg13[%c1_90, %c1024_91], %90 {strides = array<i32>} : memref<2x2048xf32, #tpu.memory_space<vmem>>, vector<1x256xf32>,
    %92 = vector.extract_strided_slice %65 {offsets = [13, 0], sizes = [1, 256], strides = [1, 1]} : vector<16x256xf32> to vector<1x256xf32>
    %c1_92 = arith.constant 1 : index
    %c1280_93 = arith.constant 1280 : index
    %93 = vector.load %arg13[%c1_92, %c1280_93] : memref<2x2048xf32, #tpu.memory_space<vmem>>, vector<1x256xf32>
    tpu.vector_store %arg13[%c1_92, %c1280_93], %92 {strides = array<i32>} : memref<2x2048xf32, #tpu.memory_space<vmem>>, vector<1x256xf32>,
    %94 = vector.extract_strided_slice %65 {offsets = [14, 0], sizes = [1, 256], strides = [1, 1]} : vector<16x256xf32> to vector<1x256xf32>
    %c1_94 = arith.constant 1 : index
    %c1536_95 = arith.constant 1536 : index
    %95 = vector.load %arg13[%c1_94, %c1536_95] : memref<2x2048xf32, #tpu.memory_space<vmem>>, vector<1x256xf32>
    tpu.vector_store %arg13[%c1_94, %c1536_95], %94 {strides = array<i32>} : memref<2x2048xf32, #tpu.memory_space<vmem>>, vector<1x256xf32>,
    %96 = vector.extract_strided_slice %65 {offsets = [15, 0], sizes = [1, 256], strides = [1, 1]} : vector<16x256xf32> to vector<1x256xf32>
    %c1_96 = arith.constant 1 : index
    %c1792_97 = arith.constant 1792 : index
    %97 = vector.load %arg13[%c1_96, %c1792_97] : memref<2x2048xf32, #tpu.memory_space<vmem>>, vector<1x256xf32>
    tpu.vector_store %arg13[%c1_96, %c1792_97], %96 {strides = array<i32>} : memref<2x2048xf32, #tpu.memory_space<vmem>>, vector<1x256xf32>,
    %c0_98 = arith.constant 0 : index
    %c0_99 = arith.constant 0 : index
    %98 = vector.load %arg13[%c0_98, %c0_99] : memref<2x2048xf32, #tpu.memory_space<vmem>>, vector<2x2048xf32>
    %99 = arith.truncf %98 : vector<2x2048xf32> to vector<2x2048xbf16>
    %c0_100 = arith.constant 0 : index
    %c0_101 = arith.constant 0 : index
    %100 = vector.load %arg5[%c0_100, %c0_101] : memref<2048x64xbf16, #tpu.memory_space<vmem>>, vector<2048x64xbf16>
    %cst_102 = arith.constant dense<0.000000e+00> : vector<2x64xf32>
    %101 = tpu.matmul %99, %100, %cst_102 {dimension_numbers = #tpu.dot_dimension_numbers<[1], [0], [0], [1], [0, 0, 1, 1], [], []>} : vector<2x2048xbf16>, vector<2048x64xbf16>, vector<2x64xf32> -> vector<2x64xf32>
    %c4_103 = arith.constant 4 : index
    %c0_104 = arith.constant 0 : index
    %102 = vector.load %arg2[%c4_103, %c0_104] : memref<6x2048xf32, #tpu.memory_space<vmem>>, vector<1x64xf32>
    %103 = vector.broadcast %102 : vector<1x64xf32> to vector<2x64xf32>
    %104 = arith.addf %101, %103 : vector<2x64xf32>
    %c0_105 = arith.constant 0 : index
    %c0_106 = arith.constant 0 : index
    %105 = vector.load %arg10[%c0_105, %c0_106] : memref<2x64xf32, #tpu.memory_space<vmem>>, vector<2x64xf32>
    tpu.vector_store %arg10[%c0_105, %c0_106], %104 {strides = array<i32>} : memref<2x64xf32, #tpu.memory_space<vmem>>, vector<2x64xf32>,
    %106 = vector.extract_strided_slice %104 {offsets = [0, 0], sizes = [2, 32], strides = [1, 1]} : vector<2x64xf32> to vector<2x32xf32>
    %107 = vector.extract_strided_slice %104 {offsets = [0, 32], sizes = [2, 32], strides = [1, 1]} : vector<2x64xf32> to vector<2x32xf32>
    %cst_107 = arith.constant 5.000000e-01 : f32
    %108 = vector.broadcast %cst_107 : f32 to vector<2x32xf32>
    %109 = arith.mulf %107, %108 : vector<2x32xf32>
    %110 = math.exp %109 : vector<2x32xf32>
    %c0_108 = arith.constant 0 : index
    %c0_109 = arith.constant 0 : index
    %111 = vector.load %arg1[%c0_108, %c0_109] : memref<2x32xf32, #tpu.memory_space<vmem>>, vector<2x32xf32>
    %112 = arith.mulf %110, %111 : vector<2x32xf32>
    %113 = arith.addf %106, %112 : vector<2x32xf32>
    %114 = arith.truncf %113 : vector<2x32xf32> to vector<2x32xbf16>
    %c0_110 = arith.constant 0 : index
    %c0_111 = arith.constant 0 : index
    %115 = vector.load %arg6[%c0_110, %c0_111] : memref<32x2048xbf16, #tpu.memory_space<vmem>>, vector<32x2048xbf16>
    %cst_112 = arith.constant dense<0.000000e+00> : vector<2x2048xf32>
    %116 = tpu.matmul %114, %115, %cst_112 {dimension_numbers = #tpu.dot_dimension_numbers<[1], [0], [0], [1], [0, 0, 1, 1], [], []>} : vector<2x32xbf16>, vector<32x2048xbf16>, vector<2x2048xf32> -> vector<2x2048xf32>
    %c0_113 = arith.constant 0 : index
    %c0_114 = arith.constant 0 : index
    %117 = vector.load %arg2[%c0_113, %c0_114] : memref<6x2048xf32, #tpu.memory_space<vmem>>, vector<1x2048xf32>
    %118 = vector.broadcast %117 : vector<1x2048xf32> to vector<2x2048xf32>
    %119 = arith.addf %116, %118 : vector<2x2048xf32>
    %cst_115 = arith.constant 0.000000e+00 : f32
    %120 = vector.broadcast %cst_115 : f32 to vector<2x2048xf32>
    %121 = arith.maximumf %119, %120 : vector<2x2048xf32>
    %122 = vector.extract_strided_slice %121 {offsets = [0, 0], sizes = [1, 256], strides = [1, 1]} : vector<2x2048xf32> to vector<1x256xf32>
    %c0_116 = arith.constant 0 : index
    %c0_117 = arith.constant 0 : index
    %123 = vector.load %arg14[%c0_116, %c0_117] : memref<16x256xf32, #tpu.memory_space<vmem>>, vector<1x256xf32>
    tpu.vector_store %arg14[%c0_116, %c0_117], %122 {strides = array<i32>} : memref<16x256xf32, #tpu.memory_space<vmem>>, vector<1x256xf32>,
    %124 = vector.extract_strided_slice %121 {offsets = [0, 256], sizes = [1, 256], strides = [1, 1]} : vector<2x2048xf32> to vector<1x256xf32>
    %c1_118 = arith.constant 1 : index
    %c0_119 = arith.constant 0 : index
    %125 = vector.load %arg14[%c1_118, %c0_119] : memref<16x256xf32, #tpu.memory_space<vmem>>, vector<1x256xf32>
    tpu.vector_store %arg14[%c1_118, %c0_119], %124 {strides = array<i32>} : memref<16x256xf32, #tpu.memory_space<vmem>>, vector<1x256xf32>,
    %126 = vector.extract_strided_slice %121 {offsets = [0, 512], sizes = [1, 256], strides = [1, 1]} : vector<2x2048xf32> to vector<1x256xf32>
    %c2_120 = arith.constant 2 : index
    %c0_121 = arith.constant 0 : index
    %127 = vector.load %arg14[%c2_120, %c0_121] : memref<16x256xf32, #tpu.memory_space<vmem>>, vector<1x256xf32>
    tpu.vector_store %arg14[%c2_120, %c0_121], %126 {strides = array<i32>} : memref<16x256xf32, #tpu.memory_space<vmem>>, vector<1x256xf32>,
    %128 = vector.extract_strided_slice %121 {offsets = [0, 768], sizes = [1, 256], strides = [1, 1]} : vector<2x2048xf32> to vector<1x256xf32>
    %c3_122 = arith.constant 3 : index
    %c0_123 = arith.constant 0 : index
    %129 = vector.load %arg14[%c3_122, %c0_123] : memref<16x256xf32, #tpu.memory_space<vmem>>, vector<1x256xf32>
    tpu.vector_store %arg14[%c3_122, %c0_123], %128 {strides = array<i32>} : memref<16x256xf32, #tpu.memory_space<vmem>>, vector<1x256xf32>,
    %130 = vector.extract_strided_slice %121 {offsets = [0, 1024], sizes = [1, 256], strides = [1, 1]} : vector<2x2048xf32> to vector<1x256xf32>
    %c4_124 = arith.constant 4 : index
    %c0_125 = arith.constant 0 : index
    %131 = vector.load %arg14[%c4_124, %c0_125] : memref<16x256xf32, #tpu.memory_space<vmem>>, vector<1x256xf32>
    tpu.vector_store %arg14[%c4_124, %c0_125], %130 {strides = array<i32>} : memref<16x256xf32, #tpu.memory_space<vmem>>, vector<1x256xf32>,
    %132 = vector.extract_strided_slice %121 {offsets = [0, 1280], sizes = [1, 256], strides = [1, 1]} : vector<2x2048xf32> to vector<1x256xf32>
    %c5 = arith.constant 5 : index
    %c0_126 = arith.constant 0 : index
    %133 = vector.load %arg14[%c5, %c0_126] : memref<16x256xf32, #tpu.memory_space<vmem>>, vector<1x256xf32>
    tpu.vector_store %arg14[%c5, %c0_126], %132 {strides = array<i32>} : memref<16x256xf32, #tpu.memory_space<vmem>>, vector<1x256xf32>,
    %134 = vector.extract_strided_slice %121 {offsets = [0, 1536], sizes = [1, 256], strides = [1, 1]} : vector<2x2048xf32> to vector<1x256xf32>
    %c6 = arith.constant 6 : index
    %c0_127 = arith.constant 0 : index
    %135 = vector.load %arg14[%c6, %c0_127] : memref<16x256xf32, #tpu.memory_space<vmem>>, vector<1x256xf32>
    tpu.vector_store %arg14[%c6, %c0_127], %134 {strides = array<i32>} : memref<16x256xf32, #tpu.memory_space<vmem>>, vector<1x256xf32>,
    %136 = vector.extract_strided_slice %121 {offsets = [0, 1792], sizes = [1, 256], strides = [1, 1]} : vector<2x2048xf32> to vector<1x256xf32>
    %c7 = arith.constant 7 : index
    %c0_128 = arith.constant 0 : index
    %137 = vector.load %arg14[%c7, %c0_128] : memref<16x256xf32, #tpu.memory_space<vmem>>, vector<1x256xf32>
    tpu.vector_store %arg14[%c7, %c0_128], %136 {strides = array<i32>} : memref<16x256xf32, #tpu.memory_space<vmem>>, vector<1x256xf32>,
    %138 = vector.extract_strided_slice %121 {offsets = [1, 0], sizes = [1, 256], strides = [1, 1]} : vector<2x2048xf32> to vector<1x256xf32>
    %c8_129 = arith.constant 8 : index
    %c0_130 = arith.constant 0 : index
    %139 = vector.load %arg14[%c8_129, %c0_130] : memref<16x256xf32, #tpu.memory_space<vmem>>, vector<1x256xf32>
    tpu.vector_store %arg14[%c8_129, %c0_130], %138 {strides = array<i32>} : memref<16x256xf32, #tpu.memory_space<vmem>>, vector<1x256xf32>,
    %140 = vector.extract_strided_slice %121 {offsets = [1, 256], sizes = [1, 256], strides = [1, 1]} : vector<2x2048xf32> to vector<1x256xf32>
    %c9 = arith.constant 9 : index
    %c0_131 = arith.constant 0 : index
    %141 = vector.load %arg14[%c9, %c0_131] : memref<16x256xf32, #tpu.memory_space<vmem>>, vector<1x256xf32>
    tpu.vector_store %arg14[%c9, %c0_131], %140 {strides = array<i32>} : memref<16x256xf32, #tpu.memory_space<vmem>>, vector<1x256xf32>,
    %142 = vector.extract_strided_slice %121 {offsets = [1, 512], sizes = [1, 256], strides = [1, 1]} : vector<2x2048xf32> to vector<1x256xf32>
    %c10 = arith.constant 10 : index
    %c0_132 = arith.constant 0 : index
    %143 = vector.load %arg14[%c10, %c0_132] : memref<16x256xf32, #tpu.memory_space<vmem>>, vector<1x256xf32>
    tpu.vector_store %arg14[%c10, %c0_132], %142 {strides = array<i32>} : memref<16x256xf32, #tpu.memory_space<vmem>>, vector<1x256xf32>,
    %144 = vector.extract_strided_slice %121 {offsets = [1, 768], sizes = [1, 256], strides = [1, 1]} : vector<2x2048xf32> to vector<1x256xf32>
    %c11 = arith.constant 11 : index
    %c0_133 = arith.constant 0 : index
    %145 = vector.load %arg14[%c11, %c0_133] : memref<16x256xf32, #tpu.memory_space<vmem>>, vector<1x256xf32>
    tpu.vector_store %arg14[%c11, %c0_133], %144 {strides = array<i32>} : memref<16x256xf32, #tpu.memory_space<vmem>>, vector<1x256xf32>,
    %146 = vector.extract_strided_slice %121 {offsets = [1, 1024], sizes = [1, 256], strides = [1, 1]} : vector<2x2048xf32> to vector<1x256xf32>
    %c12_134 = arith.constant 12 : index
    %c0_135 = arith.constant 0 : index
    %147 = vector.load %arg14[%c12_134, %c0_135] : memref<16x256xf32, #tpu.memory_space<vmem>>, vector<1x256xf32>
    tpu.vector_store %arg14[%c12_134, %c0_135], %146 {strides = array<i32>} : memref<16x256xf32, #tpu.memory_space<vmem>>, vector<1x256xf32>,
    %148 = vector.extract_strided_slice %121 {offsets = [1, 1280], sizes = [1, 256], strides = [1, 1]} : vector<2x2048xf32> to vector<1x256xf32>
    %c13 = arith.constant 13 : index
    %c0_136 = arith.constant 0 : index
    %149 = vector.load %arg14[%c13, %c0_136] : memref<16x256xf32, #tpu.memory_space<vmem>>, vector<1x256xf32>
    tpu.vector_store %arg14[%c13, %c0_136], %148 {strides = array<i32>} : memref<16x256xf32, #tpu.memory_space<vmem>>, vector<1x256xf32>,
    %150 = vector.extract_strided_slice %121 {offsets = [1, 1536], sizes = [1, 256], strides = [1, 1]} : vector<2x2048xf32> to vector<1x256xf32>
    %c14 = arith.constant 14 : index
    %c0_137 = arith.constant 0 : index
    %151 = vector.load %arg14[%c14, %c0_137] : memref<16x256xf32, #tpu.memory_space<vmem>>, vector<1x256xf32>
    tpu.vector_store %arg14[%c14, %c0_137], %150 {strides = array<i32>} : memref<16x256xf32, #tpu.memory_space<vmem>>, vector<1x256xf32>,
    %152 = vector.extract_strided_slice %121 {offsets = [1, 1792], sizes = [1, 256], strides = [1, 1]} : vector<2x2048xf32> to vector<1x256xf32>
    %c15 = arith.constant 15 : index
    %c0_138 = arith.constant 0 : index
    %153 = vector.load %arg14[%c15, %c0_138] : memref<16x256xf32, #tpu.memory_space<vmem>>, vector<1x256xf32>
    tpu.vector_store %arg14[%c15, %c0_138], %152 {strides = array<i32>} : memref<16x256xf32, #tpu.memory_space<vmem>>, vector<1x256xf32>,
    %c0_139 = arith.constant 0 : index
    %c0_140 = arith.constant 0 : index
    %154 = vector.load %arg14[%c0_139, %c0_140] : memref<16x256xf32, #tpu.memory_space<vmem>>, vector<8x256xf32>
    %c4_141 = arith.constant 4 : index
    %c0_142 = arith.constant 0 : index
    %155 = vector.load %arg15[%c4_141, %c0_142] : memref<24x1280xf32, #tpu.memory_space<vmem>>, vector<8x256xf32>
    tpu.vector_store %arg15[%c4_141, %c0_142], %154 {strides = array<i32>} : memref<24x1280xf32, #tpu.memory_space<vmem>>, vector<8x256xf32>,
    %c0_143 = arith.constant 0 : index
    %c0_144 = arith.constant 0 : index
    %156 = vector.load %arg14[%c0_143, %c0_144] : memref<16x256xf32, #tpu.memory_space<vmem>>, vector<8x256xf32>
    %c3_145 = arith.constant 3 : index
    %c256_146 = arith.constant 256 : index
    %157 = vector.load %arg15[%c3_145, %c256_146] : memref<24x1280xf32, #tpu.memory_space<vmem>>, vector<8x256xf32>
    tpu.vector_store %arg15[%c3_145, %c256_146], %156 {strides = array<i32>} : memref<24x1280xf32, #tpu.memory_space<vmem>>, vector<8x256xf32>,
    %c0_147 = arith.constant 0 : index
    %c0_148 = arith.constant 0 : index
    %158 = vector.load %arg14[%c0_147, %c0_148] : memref<16x256xf32, #tpu.memory_space<vmem>>, vector<8x256xf32>
    %c2_149 = arith.constant 2 : index
    %c512_150 = arith.constant 512 : index
    %159 = vector.load %arg15[%c2_149, %c512_150] : memref<24x1280xf32, #tpu.memory_space<vmem>>, vector<8x256xf32>
    tpu.vector_store %arg15[%c2_149, %c512_150], %158 {strides = array<i32>} : memref<24x1280xf32, #tpu.memory_space<vmem>>, vector<8x256xf32>,
    %c0_151 = arith.constant 0 : index
    %c0_152 = arith.constant 0 : index
    %160 = vector.load %arg14[%c0_151, %c0_152] : memref<16x256xf32, #tpu.memory_space<vmem>>, vector<8x256xf32>
    %c1_153 = arith.constant 1 : index
    %c768_154 = arith.constant 768 : index
    %161 = vector.load %arg15[%c1_153, %c768_154] : memref<24x1280xf32, #tpu.memory_space<vmem>>, vector<8x256xf32>
    tpu.vector_store %arg15[%c1_153, %c768_154], %160 {strides = array<i32>} : memref<24x1280xf32, #tpu.memory_space<vmem>>, vector<8x256xf32>,
    %c0_155 = arith.constant 0 : index
    %c0_156 = arith.constant 0 : index
    %162 = vector.load %arg14[%c0_155, %c0_156] : memref<16x256xf32, #tpu.memory_space<vmem>>, vector<8x256xf32>
    %c0_157 = arith.constant 0 : index
    %c1024_158 = arith.constant 1024 : index
    %163 = vector.load %arg15[%c0_157, %c1024_158] : memref<24x1280xf32, #tpu.memory_space<vmem>>, vector<8x256xf32>
    tpu.vector_store %arg15[%c0_157, %c1024_158], %162 {strides = array<i32>} : memref<24x1280xf32, #tpu.memory_space<vmem>>, vector<8x256xf32>,
    %c8_159 = arith.constant 8 : index
    %c0_160 = arith.constant 0 : index
    %164 = vector.load %arg14[%c8_159, %c0_160] : memref<16x256xf32, #tpu.memory_space<vmem>>, vector<8x256xf32>
    %c16_161 = arith.constant 16 : index
    %c0_162 = arith.constant 0 : index
    %165 = vector.load %arg15[%c16_161, %c0_162] : memref<24x1280xf32, #tpu.memory_space<vmem>>, vector<8x256xf32>
    tpu.vector_store %arg15[%c16_161, %c0_162], %164 {strides = array<i32>} : memref<24x1280xf32, #tpu.memory_space<vmem>>, vector<8x256xf32>,
    %c8_163 = arith.constant 8 : index
    %c0_164 = arith.constant 0 : index
    %166 = vector.load %arg14[%c8_163, %c0_164] : memref<16x256xf32, #tpu.memory_space<vmem>>, vector<8x256xf32>
    %c15_165 = arith.constant 15 : index
    %c256_166 = arith.constant 256 : index
    %167 = vector.load %arg15[%c15_165, %c256_166] : memref<24x1280xf32, #tpu.memory_space<vmem>>, vector<8x256xf32>
    tpu.vector_store %arg15[%c15_165, %c256_166], %166 {strides = array<i32>} : memref<24x1280xf32, #tpu.memory_space<vmem>>, vector<8x256xf32>,
    %c8_167 = arith.constant 8 : index
    %c0_168 = arith.constant 0 : index
    %168 = vector.load %arg14[%c8_167, %c0_168] : memref<16x256xf32, #tpu.memory_space<vmem>>, vector<8x256xf32>
    %c14_169 = arith.constant 14 : index
    %c512_170 = arith.constant 512 : index
    %169 = vector.load %arg15[%c14_169, %c512_170] : memref<24x1280xf32, #tpu.memory_space<vmem>>, vector<8x256xf32>
    tpu.vector_store %arg15[%c14_169, %c512_170], %168 {strides = array<i32>} : memref<24x1280xf32, #tpu.memory_space<vmem>>, vector<8x256xf32>,
    %c8_171 = arith.constant 8 : index
    %c0_172 = arith.constant 0 : index
    %170 = vector.load %arg14[%c8_171, %c0_172] : memref<16x256xf32, #tpu.memory_space<vmem>>, vector<8x256xf32>
    %c13_173 = arith.constant 13 : index
    %c768_174 = arith.constant 768 : index
    %171 = vector.load %arg15[%c13_173, %c768_174] : memref<24x1280xf32, #tpu.memory_space<vmem>>, vector<8x256xf32>
    tpu.vector_store %arg15[%c13_173, %c768_174], %170 {strides = array<i32>} : memref<24x1280xf32, #tpu.memory_space<vmem>>, vector<8x256xf32>,
    %c8_175 = arith.constant 8 : index
    %c0_176 = arith.constant 0 : index
    %172 = vector.load %arg14[%c8_175, %c0_176] : memref<16x256xf32, #tpu.memory_space<vmem>>, vector<8x256xf32>
    %c12_177 = arith.constant 12 : index
    %c1024_178 = arith.constant 1024 : index
    %173 = vector.load %arg15[%c12_177, %c1024_178] : memref<24x1280xf32, #tpu.memory_space<vmem>>, vector<8x256xf32>
    tpu.vector_store %arg15[%c12_177, %c1024_178], %172 {strides = array<i32>} : memref<24x1280xf32, #tpu.memory_space<vmem>>, vector<8x256xf32>,
    %c0_179 = arith.constant 0 : index
    %c0_180 = arith.constant 0 : index
    %174 = vector.load %arg15[%c0_179, %c0_180] : memref<24x1280xf32, #tpu.memory_space<vmem>>, vector<24x1280xf32>
    %175 = arith.truncf %174 : vector<24x1280xf32> to vector<24x1280xbf16>
    %c0_181 = arith.constant 0 : index
    %c0_182 = arith.constant 0 : index
    %176 = vector.load %arg7[%c0_181, %c0_182] : memref<1280x192xbf16, #tpu.memory_space<vmem>>, vector<1280x192xbf16>
    %cst_183 = arith.constant dense<0.000000e+00> : vector<24x192xf32>
    %177 = tpu.matmul %175, %176, %cst_183 {dimension_numbers = #tpu.dot_dimension_numbers<[1], [0], [0], [1], [0, 0, 1, 1], [], []>} : vector<24x1280xbf16>, vector<1280x192xbf16>, vector<24x192xf32> -> vector<24x192xf32>
    %c3_184 = arith.constant 3 : index
    %c0_185 = arith.constant 0 : index
    %178 = vector.load %arg2[%c3_184, %c0_185] : memref<6x2048xf32, #tpu.memory_space<vmem>>, vector<1x192xf32>
    %179 = vector.broadcast %178 : vector<1x192xf32> to vector<24x192xf32>
    %180 = arith.addf %177, %179 : vector<24x192xf32>
    %cst_186 = arith.constant 0.000000e+00 : f32
    %181 = vector.broadcast %cst_186 : f32 to vector<24x192xf32>
    %182 = arith.maximumf %180, %181 : vector<24x192xf32>
    %183 = vector.extract_strided_slice %182 {offsets = [0, 0], sizes = [12, 192], strides = [1, 1]} : vector<24x192xf32> to vector<12x192xf32>
    %c4_187 = arith.constant 4 : index
    %c0_188 = arith.constant 0 : index
    %184 = vector.load %arg16[%c4_187, %c0_188] : memref<32x1280xf32, #tpu.memory_space<vmem>>, vector<12x192xf32>
    tpu.vector_store %arg16[%c4_187, %c0_188], %183 {strides = array<i32>} : memref<32x1280xf32, #tpu.memory_space<vmem>>, vector<12x192xf32>,
    %185 = vector.extract_strided_slice %182 {offsets = [0, 0], sizes = [12, 192], strides = [1, 1]} : vector<24x192xf32> to vector<12x192xf32>
    %c3_189 = arith.constant 3 : index
    %c256_190 = arith.constant 256 : index
    %186 = vector.load %arg16[%c3_189, %c256_190] : memref<32x1280xf32, #tpu.memory_space<vmem>>, vector<12x192xf32>
    tpu.vector_store %arg16[%c3_189, %c256_190], %185 {strides = array<i32>} : memref<32x1280xf32, #tpu.memory_space<vmem>>, vector<12x192xf32>,
    %187 = vector.extract_strided_slice %182 {offsets = [0, 0], sizes = [12, 192], strides = [1, 1]} : vector<24x192xf32> to vector<12x192xf32>
    %c2_191 = arith.constant 2 : index
    %c512_192 = arith.constant 512 : index
    %188 = vector.load %arg16[%c2_191, %c512_192] : memref<32x1280xf32, #tpu.memory_space<vmem>>, vector<12x192xf32>
    tpu.vector_store %arg16[%c2_191, %c512_192], %187 {strides = array<i32>} : memref<32x1280xf32, #tpu.memory_space<vmem>>, vector<12x192xf32>,
    %189 = vector.extract_strided_slice %182 {offsets = [0, 0], sizes = [12, 192], strides = [1, 1]} : vector<24x192xf32> to vector<12x192xf32>
    %c1_193 = arith.constant 1 : index
    %c768_194 = arith.constant 768 : index
    %190 = vector.load %arg16[%c1_193, %c768_194] : memref<32x1280xf32, #tpu.memory_space<vmem>>, vector<12x192xf32>
    tpu.vector_store %arg16[%c1_193, %c768_194], %189 {strides = array<i32>} : memref<32x1280xf32, #tpu.memory_space<vmem>>, vector<12x192xf32>,
    %191 = vector.extract_strided_slice %182 {offsets = [0, 0], sizes = [12, 192], strides = [1, 1]} : vector<24x192xf32> to vector<12x192xf32>
    %c0_195 = arith.constant 0 : index
    %c1024_196 = arith.constant 1024 : index
    %192 = vector.load %arg16[%c0_195, %c1024_196] : memref<32x1280xf32, #tpu.memory_space<vmem>>, vector<12x192xf32>
    tpu.vector_store %arg16[%c0_195, %c1024_196], %191 {strides = array<i32>} : memref<32x1280xf32, #tpu.memory_space<vmem>>, vector<12x192xf32>,
    %193 = vector.extract_strided_slice %182 {offsets = [12, 0], sizes = [12, 192], strides = [1, 1]} : vector<24x192xf32> to vector<12x192xf32>
    %c20_197 = arith.constant 20 : index
    %c0_198 = arith.constant 0 : index
    %194 = vector.load %arg16[%c20_197, %c0_198] : memref<32x1280xf32, #tpu.memory_space<vmem>>, vector<12x192xf32>
    tpu.vector_store %arg16[%c20_197, %c0_198], %193 {strides = array<i32>} : memref<32x1280xf32, #tpu.memory_space<vmem>>, vector<12x192xf32>,
    %195 = vector.extract_strided_slice %182 {offsets = [12, 0], sizes = [12, 192], strides = [1, 1]} : vector<24x192xf32> to vector<12x192xf32>
    %c19_199 = arith.constant 19 : index
    %c256_200 = arith.constant 256 : index
    %196 = vector.load %arg16[%c19_199, %c256_200] : memref<32x1280xf32, #tpu.memory_space<vmem>>, vector<12x192xf32>
    tpu.vector_store %arg16[%c19_199, %c256_200], %195 {strides = array<i32>} : memref<32x1280xf32, #tpu.memory_space<vmem>>, vector<12x192xf32>,
    %197 = vector.extract_strided_slice %182 {offsets = [12, 0], sizes = [12, 192], strides = [1, 1]} : vector<24x192xf32> to vector<12x192xf32>
    %c18_201 = arith.constant 18 : index
    %c512_202 = arith.constant 512 : index
    %198 = vector.load %arg16[%c18_201, %c512_202] : memref<32x1280xf32, #tpu.memory_space<vmem>>, vector<12x192xf32>
    tpu.vector_store %arg16[%c18_201, %c512_202], %197 {strides = array<i32>} : memref<32x1280xf32, #tpu.memory_space<vmem>>, vector<12x192xf32>,
    %199 = vector.extract_strided_slice %182 {offsets = [12, 0], sizes = [12, 192], strides = [1, 1]} : vector<24x192xf32> to vector<12x192xf32>
    %c17_203 = arith.constant 17 : index
    %c768_204 = arith.constant 768 : index
    %200 = vector.load %arg16[%c17_203, %c768_204] : memref<32x1280xf32, #tpu.memory_space<vmem>>, vector<12x192xf32>
    tpu.vector_store %arg16[%c17_203, %c768_204], %199 {strides = array<i32>} : memref<32x1280xf32, #tpu.memory_space<vmem>>, vector<12x192xf32>,
    %201 = vector.extract_strided_slice %182 {offsets = [12, 0], sizes = [12, 192], strides = [1, 1]} : vector<24x192xf32> to vector<12x192xf32>
    %c16_205 = arith.constant 16 : index
    %c1024_206 = arith.constant 1024 : index
    %202 = vector.load %arg16[%c16_205, %c1024_206] : memref<32x1280xf32, #tpu.memory_space<vmem>>, vector<12x192xf32>
    tpu.vector_store %arg16[%c16_205, %c1024_206], %201 {strides = array<i32>} : memref<32x1280xf32, #tpu.memory_space<vmem>>, vector<12x192xf32>,
    %c0_207 = arith.constant 0 : index
    %c0_208 = arith.constant 0 : index
    %203 = vector.load %arg16[%c0_207, %c0_208] : memref<32x1280xf32, #tpu.memory_space<vmem>>, vector<32x1280xf32>
    %204 = arith.truncf %203 : vector<32x1280xf32> to vector<32x1280xbf16>
    %c0_209 = arith.constant 0 : index
    %c0_210 = arith.constant 0 : index
    %205 = vector.load %arg8[%c0_209, %c0_210] : memref<1280x16xbf16, #tpu.memory_space<vmem>>, vector<1280x16xbf16>
    %cst_211 = arith.constant dense<0.000000e+00> : vector<32x16xf32>
    %206 = tpu.matmul %204, %205, %cst_211 {dimension_numbers = #tpu.dot_dimension_numbers<[1], [0], [0], [1], [0, 0, 1, 1], [], []>} : vector<32x1280xbf16>, vector<1280x16xbf16>, vector<32x16xf32> -> vector<32x16xf32>
    %c5_212 = arith.constant 5 : index
    %c0_213 = arith.constant 0 : index
    %207 = vector.load %arg2[%c5_212, %c0_213] : memref<6x2048xf32, #tpu.memory_space<vmem>>, vector<1x16xf32>
    %208 = vector.broadcast %207 : vector<1x16xf32> to vector<32x16xf32>
    %209 = arith.addf %206, %208 : vector<32x16xf32>
    %210 = arith.negf %209 : vector<32x16xf32>
    %211 = math.exp %210 : vector<32x16xf32>
    %cst_214 = arith.constant 1.000000e+00 : f32
    %212 = vector.broadcast %cst_214 : f32 to vector<32x16xf32>
    %213 = arith.addf %212, %211 : vector<32x16xf32>
    %214 = arith.divf %212, %213 : vector<32x16xf32>
    %c0_215 = arith.constant 0 : index
    %c0_216 = arith.constant 0 : index
    %215 = vector.load %arg9[%c0_215, %c0_216] : memref<32x16xf32, #tpu.memory_space<vmem>>, vector<32x16xf32>
    tpu.vector_store %arg9[%c0_215, %c0_216], %214 {strides = array<i32>} : memref<32x16xf32, #tpu.memory_space<vmem>>, vector<32x16xf32>,
    return
  }
}

</mosaic_0001>

<bundles_post_ra>
// kernel: vae_forward.1
= control target key start
LH: loop header
LB: loop body
LE: loop exit
PB: predicated region body
PF: predicated region fallthrough
CT: control target
= control target key end

     0   :  { %v9158_v2 = vmov 0.0   ;;  %vm11798_vm0 = vcmask 130048   ;;  %vm145_vm1 = vcmask 125952   ;;  %vm173_vm2 = vcmask 130052   ;;  %s11787_s0 = inlined_call_operand.vmem [shape: f32[32,16], index: 0, kind: input, shape index: {}]   ;;  %s11788_s1 = inlined_call_operand.vmem [shape: f32[2,32], index: 1, kind: input, shape index: {}]   ;;  %s11789_s2 = inlined_call_operand.vmem [shape: f32[6,2048], index: 2, kind: input, shape index: {}]   ;;  %s11790_s3 = inlined_call_operand.vmem [shape: bf16[640,192], index: 3, kind: input, shape index: {}]   ;;  %s11791_s4 = inlined_call_operand.vmem [shape: bf16[1280,256], index: 4, kind: input, shape index: {}]   ;;  %s11792_s5 = inlined_call_operand.vmem [shape: bf16[2048,64], index: 5, kind: input, shape index: {}]   ;;  %s11793_s6 = inlined_call_operand.vmem [shape: bf16[32,2048], index: 6, kind: input, shape index: {}]   ;;  %s11794_s7 = inlined_call_operand.vmem [shape: bf16[1280,192], index: 7, kind: input, shape index: {}]   ;;  %s11795_s8 = inlined_call_operand.vmem [shape: bf16[1280,16], index: 8, kind: input, shape index: {}]   ;;  %s11796_s9 = inlined_call_operand.hbm [shape: f32[32,16], index: 9, kind: output, shape index: {0}]   ;;  %s11797_s10 = inlined_call_operand.vmem [shape: f32[2,64], index: 10, kind: output, shape index: {1}]  }
   0x1   :  { %v9225_v0 = vld [vmem:[%s11790_s3 + $0x104] ss:$8 sps:$4 sm:$0xff]   ;;  %v9230_v1 = vld [vmem:[%s11790_s3 + $0x100] ss:$8 sps:$4 sm:$0xff]   ;;  %39 = vst [vmem:[#allocation2 + $0x18] sm:$0xff] %v9158_v2  ;;  %44 = vst [vmem:[#allocation2 + $0x40] sm:$0xff] %v9158_v2 }
   0x2   :  { %36 = vst [vmem:[#allocation2] sm:$0xff] %v9158_v2  ;;  %37 = vst [vmem:[#allocation2 + $0x8] sm:$0xff] %v9158_v2  ;;  %789 = vmatprep.subr.bf16.mxu0 %v9225_v0  ;;  %v8308_v3 = vld [vmem:[%s11790_s3 + $0x114] ss:$8 sps:$4 sm:$0xff]   ;;  %v8310_v4 = vld [vmem:[%s11790_s3 + $0x110] ss:$8 sps:$4 sm:$0xff]  }
   0x3   :  { %38 = vst [vmem:[#allocation2 + $0x10] sm:$0xff] %v9158_v2  ;;  %40 = vst [vmem:[#allocation2 + $0x20] sm:$0xff] %v9158_v2  ;;  %790 = vmatpush1.bf16.msra.mxu0 %v9230_v1  ;;  %v8311_v5 = vld [vmem:[%s11790_s3 + $0x124] ss:$8 sps:$4 sm:$0xff]   ;;  %v8313_v6 = vld [vmem:[%s11790_s3 + $0x120] ss:$8 sps:$4 sm:$0xff]  }
   0x4   :  { %41 = vst [vmem:[#allocation2 + $0x28] sm:$0xff] %v9158_v2  ;;  %42 = vst [vmem:[#allocation2 + $0x30] sm:$0xff] %v9158_v2  ;;  %791 = vmatprep.subr.bf16.mxu0 %v8308_v3  ;;  %v8314_v7 = vld [vmem:[%s11790_s3 + $0x134] ss:$8 sps:$4 sm:$0xff]   ;;  %v8326_v8 = vld [vmem:[%s11790_s3 + $0x4] ss:$8 sps:$4 sm:$0xff]  }
   0x5   :  { %43 = vst [vmem:[#allocation2 + $0x38] sm:$0xff] %v9158_v2  ;;  %45 = vst [vmem:[#allocation2 + $0x48] sm:$0xff] %v9158_v2  ;;  %v8328_v9 = vld [vmem:[%s11790_s3] ss:$8 sps:$4 sm:$0xff]   ;;  %v8316_v10 = vld [vmem:[%s11790_s3 + $0x130] ss:$8 sps:$4 sm:$0xff]   ;;  %738 = vmatprep.subr.bf16.mxu1 %v8326_v8 }
   0x6   :  { %46 = vst [vmem:[#allocation2 + $0x50] sm:$0xff] %v9158_v2  ;;  %47 = vst [vmem:[#allocation2 + $0x58] sm:$0xff] %v9158_v2  ;;  %v8317_v11 = vld [vmem:[%s11790_s3 + $0x144] ss:$8 sps:$4 sm:$0xff]   ;;  %v8332_v12 = vld [vmem:[%s11790_s3 + $0x14] ss:$8 sps:$4 sm:$0xff]   ;;  %739 = vmatpush1.bf16.msra.mxu1 %v8328_v9 }
   0x7   :  { %48 = vst [vmem:[#allocation2 + $0x60] sm:$0xff] %v9158_v2  ;;  %49 = vst [vmem:[#allocation2 + $0x68] sm:$0xff] %v9158_v2  ;;  %792 = vmatpush1.bf16.msra.mxu0 %v8310_v4  ;;  %v8334_v13 = vld [vmem:[%s11790_s3 + $0x10] ss:$8 sps:$4 sm:$0xff]   ;;  %740 = vmatprep.subr.bf16.mxu1 %v8332_v12  ;;  %v8319_v14 = vld [vmem:[%s11790_s3 + $0x140] ss:$8 sps:$4 sm:$0xff]  }
   0x8   :  { %50 = vst [vmem:[#allocation2 + $0x70] sm:$0xff] %v9158_v2  ;;  %52 = vst [vmem:[#allocation3 + $0x8] sm:$0xff] %v9158_v2  ;;  %793 = vmatprep.subr.bf16.mxu0 %v8311_v5  ;;  %v8338_v15 = vld [vmem:[%s11790_s3 + $0x24] ss:$8 sps:$4 sm:$0xff]   ;;  %v8320_v16 = vld [vmem:[%s11790_s3 + $0x154] ss:$8 sps:$4 sm:$0xff]  }
   0x9   :  { %54 = vst [vmem:[#allocation3 + $0x18] sm:$0xff] %v9158_v2  ;;  %56 = vst [vmem:[#allocation3 + $0x28] sm:$0xff] %v9158_v2  ;;  %v8340_v17 = vld [vmem:[%s11790_s3 + $0x20] ss:$8 sps:$4 sm:$0xff]   ;;  %v8344_v18 = vld [vmem:[%s11790_s3 + $0x34] ss:$8 sps:$4 sm:$0xff]  }
   0xa   :  { %58 = vst [vmem:[#allocation3 + $0x38] sm:$0xff] %v9158_v2  ;;  %60 = vst [vmem:[#allocation3 + $0x48] sm:$0xff] %v9158_v2  ;;  %741 = vmatpush1.bf16.msra.mxu1 %v8334_v13  ;;  %v8322_v19 = vld [vmem:[%s11790_s3 + $0x150] ss:$8 sps:$4 sm:$0xff]   ;;  %v8323_v20 = vld [vmem:[%s11790_s3 + $0x164] ss:$8 sps:$4 sm:$0xff]  }
   0xb   :  { %62 = vst [vmem:[#allocation3 + $0x58] sm:$0xff] %v9158_v2  ;;  %64 = vst [vmem:[#allocation3 + $0x68] sm:$0xff] %v9158_v2  ;;  %794 = vmatpush1.bf16.msra.mxu0 %v8313_v6  ;;  %742 = vmatprep.subr.bf16.mxu1 %v8338_v15  ;;  %v8346_v21 = vld [vmem:[%s11790_s3 + $0x30] ss:$8 sps:$4 sm:$0xff]   ;;  %v8350_v22 = vld [vmem:[%s11790_s3 + $0x44] ss:$8 sps:$4 sm:$0xff]  }
   0xc   :  { %66 = vst [vmem:[#allocation3 + $0x78] sm:$0xff] %v9158_v2  ;;  %68 = vst [vmem:[#allocation3 + $0x88] sm:$0xff] %v9158_v2  ;;  %795 = vmatprep.subr.bf16.mxu0 %v8314_v7  ;;  %v8325_v23 = vld [vmem:[%s11790_s3 + $0x160] ss:$8 sps:$4 sm:$0xff]   ;;  %v8329_v24 = vld [vmem:[%s11790_s3 + $0x174] ss:$8 sps:$4 sm:$0xff]  }
   0xd   :  { %70 = vst [vmem:[#allocation3 + $0x98] sm:$0xff] %v9158_v2  ;;  %71 = vst [vmem:[#allocation6] sm:$0xff] %v9158_v2  ;;  %v8352_v25 = vld [vmem:[%s11790_s3 + $0x40] ss:$8 sps:$4 sm:$0xff]   ;;  %v8356_v26 = vld [vmem:[%s11790_s3 + $0x54] ss:$8 sps:$4 sm:$0xff]  }
   0xe   :  { %72 = vst [vmem:[#allocation6 + $0x8] sm:$0xff] %v9158_v2  ;;  %73 = vst [vmem:[#allocation6 + $0x10] sm:$0xff] %v9158_v2  ;;  %743 = vmatpush1.bf16.msra.mxu1 %v8340_v17  ;;  %v8331_v27 = vld [vmem:[%s11790_s3 + $0x170] ss:$8 sps:$4 sm:$0xff]   ;;  %v8335_v28 = vld [vmem:[%s11790_s3 + $0x184] ss:$8 sps:$4 sm:$0xff]  }
   0xf   :  { %74 = vst [vmem:[#allocation6 + $0x18] sm:$0xff] %v9158_v2  ;;  %75 = vst [vmem:[#allocation6 + $0x20] sm:$0xff] %v9158_v2  ;;  %796 = vmatpush1.bf16.msra.mxu0 %v8316_v10  ;;  %744 = vmatprep.subr.bf16.mxu1 %v8344_v18  ;;  %v8358_v29 = vld [vmem:[%s11790_s3 + $0x50] ss:$8 sps:$4 sm:$0xff]   ;;  %v8362_v30 = vld [vmem:[%s11790_s3 + $0x64] ss:$8 sps:$4 sm:$0xff]  }
  0x10   :  { %76 = vst [vmem:[#allocation6 + $0x28] sm:$0xff] %v9158_v2  ;;  %77 = vst [vmem:[#allocation6 + $0x30] sm:$0xff] %v9158_v2  ;;  %797 = vmatprep.subr.bf16.mxu0 %v8317_v11  ;;  %v8337_v31 = vld [vmem:[%s11790_s3 + $0x180] ss:$8 sps:$4 sm:$0xff]   ;;  %v8341_v32 = vld [vmem:[%s11790_s3 + $0x194] ss:$8 sps:$4 sm:$0xff]  }
  0x11   :  { %78 = vst [vmem:[#allocation6 + $0x38] sm:$0xff] %v9158_v2  ;;  %81 = vst [vmem:[#allocation6 + $0x50] sm:$0xff] %v9158_v2  ;;  %v8364_v33 = vld [vmem:[%s11790_s3 + $0x60] ss:$8 sps:$4 sm:$0xff]   ;;  %v8343_v34 = vld [vmem:[%s11790_s3 + $0x190] ss:$8 sps:$4 sm:$0xff]  }
  0x12   :  { %82 = vst [vmem:[#allocation6 + $0x58] sm:$0xff] %v9158_v2  ;;  %83 = vst [vmem:[#allocation6 + $0x60] sm:$0xff] %v9158_v2  ;;  %745 = vmatpush1.bf16.msra.mxu1 %v8346_v21  ;;  %v8368_v35 = vld [vmem:[%s11790_s3 + $0x74] ss:$8 sps:$4 sm:$0xff]   ;;  %v155_v36 = vld [vmem:[%s11787_s0 + $0x3] sm:$0xff]  ;;  %vm167_vm3 = vcmask 1043456  }
  0x13   :  { %84 = vst [vmem:[#allocation6 + $0x68] sm:$0xff] %v9158_v2  ;;  %85 = vst [vmem:[#allocation6 + $0x70] sm:$0xff] %v9158_v2  ;;  %798 = vmatpush1.bf16.msra.mxu0 %v8319_v14  ;;  %746 = vmatprep.subr.bf16.mxu1 %v8350_v22  ;;  %v156_v37 = vld [vmem:[%s11787_s0 + $0xb] sm:$0xf]  ;;  %v9430_v38 = vld [vmem:[%s11787_s0 + $0x13] sm:$0xff]  ;;  %vm898_vm4 = vcmask 523264  }
  0x14   :  { %86 = vst [vmem:[#allocation6 + $0x78] sm:$0xff] %v9158_v2  ;;  %87 = vst [vmem:[#allocation6 + $0x80] sm:$0xff] %v9158_v2  ;;  %799 = vmatprep.subr.bf16.mxu0 %v8320_v16  ;;  %v8347_v39 = vld [vmem:[%s11790_s3 + $0x1a4] ss:$8 sps:$4 sm:$0xff]   ;;  %v8370_v40 = vld [vmem:[%s11790_s3 + $0x70] ss:$8 sps:$4 sm:$0xff]  }
  0x15   :  { %88 = vst [vmem:[#allocation6 + $0x88] sm:$0xff] %v9158_v2  ;;  %89 = vst [vmem:[#allocation6 + $0x90] sm:$0xff] %v9158_v2  ;;  %v202_v41 = vrot.slane %v9430_v38, 4  ;;  %v151_v42 = vld [vmem:[%s11787_s0 + $0x2] sm:$0xff]  ;;  %v152_v43 = vld [vmem:[%s11787_s0 + $0xa] sm:$0xf] }
  0x16   :  { %90 = vst [vmem:[#allocation6 + $0x98] sm:$0xff] %v9158_v2  ;;  %93 = vst [vmem:[#allocation6 + $0xb0] sm:$0xff] %v9158_v2  ;;  %747 = vmatpush1.bf16.msra.mxu1 %v8352_v25  ;;  %v9449_v44 = vld [vmem:[%s11787_s0 + $0x12] sm:$0xff]  ;;  %v8374_v45 = vld [vmem:[%s11790_s3 + $0x84] ss:$8 sps:$4 sm:$0xff]   ;;  %vm904_vm5 = vcmask 1046528  }
  0x17   :  { %94 = vst [vmem:[#allocation6 + $0xb8] sm:$0xff] %v9158_v2  ;;  %95 = vst [vmem:[#allocation6 + $0xc0] sm:$0xff] %v9158_v2  ;;  %800 = vmatpush1.bf16.msra.mxu0 %v8322_v19  ;;  %748 = vmatprep.subr.bf16.mxu1 %v8356_v26  ;;  %v191_v46 = vrot.slane %v9449_v44, 4  ;;  %v8349_v47 = vld [vmem:[%s11790_s3 + $0x1a0] ss:$8 sps:$4 sm:$0xff]   ;;  %v176_v12 = vld [vmem:[%s11787_s0 + $0x11] sm:$0xff] }
  0x18   :  { %96 = vst [vmem:[#allocation6 + $0xc8] sm:$0xff] %v9158_v2  ;;  %97 = vst [vmem:[#allocation6 + $0xd0] sm:$0xff] %v9158_v2  ;;  %801 = vmatprep.subr.bf16.mxu0 %v8323_v20  ;;  %v8353_v48 = vld [vmem:[%s11790_s3 + $0x1b4] ss:$8 sps:$4 sm:$0xff]   ;;  %v8376_v49 = vld [vmem:[%s11790_s3 + $0x80] ss:$8 sps:$4 sm:$0xff]  }
  0x19   :  { %98 = vst [vmem:[#allocation6 + $0xd8] sm:$0xff] %v9158_v2  ;;  %99 = vst [vmem:[#allocation6 + $0xe0] sm:$0xff] %v9158_v2  ;;  %v8380_v50 = vld [vmem:[%s11790_s3 + $0x94] ss:$8 sps:$4 sm:$0xff]   ;;  %v8355_v51 = vld [vmem:[%s11790_s3 + $0x1b0] ss:$8 sps:$4 sm:$0xff]  }
  0x1a   :  { %100 = vst [vmem:[#allocation6 + $0xe8] sm:$0xff] %v9158_v2  ;;  %101 = vst [vmem:[#allocation7] sm:$0xff] %v9158_v2  ;;  %749 = vmatpush1.bf16.msra.mxu1 %v8358_v29  ;;  %v8359_v53 = vld [vmem:[%s11790_s3 + $0x1c4] ss:$8 sps:$4 sm:$0xff]   ;;  %v8382_v54 = vld [vmem:[%s11790_s3 + $0x90] ss:$8 sps:$4 sm:$0xff]  }
  0x1b   :  { %102 = vst [vmem:[#allocation7 + $0x8] sm:$0xff] %v9158_v2  ;;  %103 = vst [vmem:[#allocation7 + $0x10] sm:$0xff] %v9158_v2  ;;  %802 = vmatpush1.bf16.msra.mxu0 %v8325_v23  ;;  %750 = vmatprep.subr.bf16.mxu1 %v8362_v30  ;;  %v8386_v57 = vld [vmem:[%s11790_s3 + $0xa4] ss:$8 sps:$4 sm:$0xff]   ;;  %v8361_v58 = vld [vmem:[%s11790_s3 + $0x1c0] ss:$8 sps:$4 sm:$0xff]  }
  0x1c   :  { %104 = vst [vmem:[#allocation7 + $0x18] sm:$0xff] %v9158_v2  ;;  %105 = vst [vmem:[#allocation7 + $0x20] sm:$0xff] %v9158_v2  ;;  %803 = vmatprep.subr.bf16.mxu0 %v8329_v24  ;;  %v8365_v59 = vld [vmem:[%s11790_s3 + $0x1d4] ss:$8 sps:$4 sm:$0xff]   ;;  %v8388_v60 = vld [vmem:[%s11790_s3 + $0xa0] ss:$8 sps:$4 sm:$0xff]  }
  0x1d   :  { %106 = vst [vmem:[#allocation7 + $0x28] sm:$0xff] %v9158_v2  ;;  %107 = vst [vmem:[#allocation7 + $0x30] sm:$0xff] %v9158_v2  ;;  %v8392_v61 = vld [vmem:[%s11790_s3 + $0xb4] ss:$8 sps:$4 sm:$0xff]   ;;  %v8367_v62 = vld [vmem:[%s11790_s3 + $0x1d0] ss:$8 sps:$4 sm:$0xff]  }
  0x1e   :  { %108 = vst [vmem:[#allocation7 + $0x38] sm:$0xff] %v9158_v2  ;;  %110 = vst [vmem:[#allocation7 + $0x48] sm:$0xff] %v9158_v2  ;;  %751 = vmatpush1.bf16.msra.mxu1 %v8364_v33  ;;  %v8371_v63 = vld [vmem:[%s11790_s3 + $0x1e4] ss:$8 sps:$4 sm:$0xff]   ;;  %v8373_v0 = vld [vmem:[%s11790_s3 + $0x1e0] ss:$8 sps:$4 sm:$0xff]  }
  0x1f   :  { %112 = vst [vmem:[#allocation7 + $0x58] sm:$0xff] %v9158_v2  ;;  %113 = vst [vmem:[#allocation7 + $0x60] sm:$0xff] %v9158_v2  ;;  %804 = vmatpush1.bf16.msra.mxu0 %v8331_v27  ;;  %752 = vmatprep.subr.bf16.mxu1 %v8368_v35  ;;  %v8394_v1 = vld [vmem:[%s11790_s3 + $0xb0] ss:$8 sps:$4 sm:$0xff]   ;;  %v8377_v6 = vld [vmem:[%s11790_s3 + $0x1f4] ss:$8 sps:$4 sm:$0xff]  }
  0x20   :  { %114 = vst [vmem:[#allocation7 + $0x68] sm:$0xff] %v9158_v2  ;;  %115 = vst [vmem:[#allocation7 + $0x70] sm:$0xff] %v9158_v2  ;;  %805 = vmatprep.subr.bf16.mxu0 %v8335_v28  ;;  %v199_v3 = vld [vmem:[%s11787_s0 + $0x1b] sm:$0xf]  ;;  %v8400_v7 = vld [vmem:[%s11790_s3 + $0xc0] ss:$8 sps:$4 sm:$0xff]  }
  0x21   :  { %116 = vst [vmem:[#allocation7 + $0x78] sm:$0xff] %v9158_v2  ;;  %117 = vst [vmem:[#allocation7 + $0x80] sm:$0xff] %v9158_v2  ;;  %v203_v4 = vrot.slane %v199_v3, 4  ;;  %v188_v5 = vld [vmem:[%s11787_s0 + $0x1a] sm:$0xf]  ;;  %v147_v9 = vld [vmem:[%s11787_s0 + $0x1] sm:$0xff] }
  0x22   :  { %118 = vst [vmem:[#allocation7 + $0x88] sm:$0xff] %v9158_v2  ;;  %119 = vst [vmem:[#allocation7 + $0x90] sm:$0xff] %v9158_v2  ;;  %753 = vmatpush1.bf16.msra.mxu1 %v8370_v40  ;;  %v192_v8 = vrot.slane %v188_v5, 4  ;;  %v148_v11 = vld [vmem:[%s11787_s0 + $0x9] sm:$0xf]  ;;  %v141_v13 = vld [vmem:[%s11787_s0] sm:$0xff] }
  0x23   :  { %120 = vst [vmem:[#allocation7 + $0x98] sm:$0xff] %v9158_v2  ;;  %121 = vst [vmem:[#allocation7 + $0xa0] sm:$0xff] %v9158_v2  ;;  %806 = vmatpush1.bf16.msra.mxu0 %v8337_v31  ;;  %754 = vmatprep.subr.bf16.mxu1 %v8374_v45  ;;  %v204_v10 = vsel %vm167_vm3, %v202_v41, %v203_v4  ;;  %v8379_v14 = vld [vmem:[%s11790_s3 + $0x1f0] ss:$8 sps:$4 sm:$0xff]   ;;  %v180_v17 = vrot.slane %v176_v12, 4  ;;  %v159_v25 = vld [vmem:[%s11787_s0 + $0x4] sm:$0xff] }
  0x24   :  { %122 = vst [vmem:[#allocation7 + $0xa8] sm:$0xff] %v9158_v2  ;;  %123 = vst [vmem:[#allocation7 + $0xb0] sm:$0xff] %v9158_v2  ;;  %807 = vmatprep.subr.bf16.mxu0 %v8341_v32  ;;  %v193_v16 = vsel %vm167_vm3, %v191_v46, %v192_v8  ;;  %v142_v18 = vld [vmem:[%s11787_s0 + $0x8] sm:$0xf]  ;;  %v163_v19 = vld [vmem:[%s11787_s0 + $0x10] sm:$0xff]  ;;  %v9159_v4 = vmov 0  }
  0x25   :  { %124 = vst [vmem:[#allocation7 + $0xb8] sm:$0xff] %v9158_v2  ;;  %125 = vst [vmem:[#allocation7 + $0xc0] sm:$0xff] %v9158_v2  ;;  %v8385_v20 = vld [vmem:[%s11790_s3 + $0x204] ss:$8 sps:$4 sm:$0xff]   ;;  %v8404_v22 = vld [vmem:[%s11790_s3 + $0xd4] ss:$8 sps:$4 sm:$0xff]  }
  0x26   :  { %126 = vst [vmem:[#allocation7 + $0xc8] sm:$0xff] %v9158_v2  ;;  %127 = vst [vmem:[#allocation7 + $0xd0] sm:$0xff] %v9158_v2  ;;  %755 = vmatpush1.bf16.msra.mxu1 %v8376_v49  ;;  %v168_v23 = vrot.slane %v163_v19, 4  ;;  %v8406_v24 = vld [vmem:[%s11790_s3 + $0xd0] ss:$8 sps:$4 sm:$0xff]   ;;  %vm915_vm6 = vcmask 1045504  }
  0x27   :  { %128 = vst [vmem:[#allocation7 + $0xd8] sm:$0xff] %v9158_v2  ;;  %130 = vst [vmem:[#allocation7 + $0xe8] sm:$0xff] %v9158_v2  ;;  %808 = vmatpush1.bf16.msra.mxu0 %v8343_v34  ;;  %756 = vmatprep.subr.bf16.mxu1 %v8380_v50  ;;  %v160_v26 = vld [vmem:[%s11787_s0 + $0xc] sm:$0xf]  ;;  %v209_v27 = vld [vmem:[%s11787_s0 + $0x14] sm:$0xff]  ;;  %vm926_vm7 = vcmask 1044480  }
  0x28   :  { %132 = vst [vmem:[#allocation7 + $0xf8] sm:$0xff] %v9158_v2  ;;  %133 = vst [vmem:[#allocation7 + $0x100] sm:$0xff] %v9158_v2  ;;  %809 = vmatprep.subr.bf16.mxu0 %v8347_v39  ;;  %v213_v28 = vrot.slane %v209_v27, 4  ;;  %v177_v29 = vld [vmem:[%s11787_s0 + $0x19] sm:$0xf]  ;;  %v275_v45 = vld [vmem:[%s11790_s3 + $0xf0] sm:$0xff] }
  0x29   :  { %134 = vst [vmem:[#allocation7 + $0x108] sm:$0xff] %v9158_v2  ;;  %135 = vst [vmem:[#allocation7 + $0x110] sm:$0xff] %v9158_v2  ;;  %v164_v30 = vld [vmem:[%s11787_s0 + $0x18] sm:$0xf]  ;;  %v181_v31 = vrot.slane %v177_v29, 4  ;;  %vm957_vm8 = vcmask 1042432  }
  0x2a   :  { %136 = vst [vmem:[#allocation7 + $0x118] sm:$0xff] %v9158_v2  ;;  %137 = vst [vmem:[#allocation7 + $0x120] sm:$0xff] %v9158_v2  ;;  %757 = vmatpush1.bf16.msra.mxu1 %v8382_v54  ;;  %v169_v32 = vrot.slane %v164_v30, 4  ;;  %v210_v33 = vld [vmem:[%s11787_s0 + $0x1c] sm:$0xf]  ;;  %vm968_vm9 = vcmask 1041408  }
  0x2b   :  { %138 = vst [vmem:[#allocation7 + $0x128] sm:$0xff] %v9158_v2  ;;  %139 = vst [vmem:[#allocation7 + $0x130] sm:$0xff] %v9158_v2  ;;  %810 = vmatpush1.bf16.msra.mxu0 %v8349_v47  ;;  %758 = vmatprep.subr.bf16.mxu1 %v8386_v57  ;;  %v8410_v35 = vld [vmem:[%s11790_s3 + $0xe4] ss:$8 sps:$4 sm:$0xff]   ;;  %v8391_v38 = vld [vmem:[%s11790_s3 + $0x214] ss:$8 sps:$4 sm:$0xff]   ;;  %v182_v40 = vsel %vm167_vm3, %v180_v17, %v181_v31 }
  0x2c   :  { %140 = vst [vmem:[#allocation7 + $0x138] sm:$0xff] %v9158_v2  ;;  %157 = vst.msk [vmem:[#allocation2 + $0x18] sm:$0xff] %vm11798_vm0, %v155_v36  ;;  %811 = vmatprep.subr.bf16.mxu0 %v8353_v48  ;;  %v8398_v2 = vld [vmem:[%s11790_s3 + $0xc4] ss:$8 sps:$4 sm:$0xff]   ;;  %v214_v36 = vrot.slane %v210_v33, 4  ;;  %vm979_vm10 = vcmask 1040384  }
  0x2d   :  { %158 = vst.msk [vmem:[#allocation2 + $0x40] sm:$0xf] %vm145_vm1, %v156_v37  ;;  %154 = vst.msk [vmem:[#allocation2 + $0x38] sm:$0xf] %vm145_vm1, %v152_v43  ;;  %v8383_v37 = vld [vmem:[%s11790_s3 + $0x200] ss:$8 sps:$4 sm:$0xff]  }
  0x2e   :  { %207 = vst.msk [vmem:[#allocation2 + $0x40] sm:$0xf0] %vm173_vm2, %v202_v41  ;;  %196 = vst.msk [vmem:[#allocation2 + $0x38] sm:$0xf0] %vm173_vm2, %v191_v46  ;;  %759 = vmatpush1.bf16.msra.mxu1 %v8388_v60  ;;  %v8412_v39 = vld [vmem:[%s11790_s3 + $0xe0] ss:$8 sps:$4 sm:$0xff]   ;;  %v170_v41 = vsel %vm167_vm3, %v168_v23, %v169_v32  ;;  %v215_v44 = vsel %vm167_vm3, %v213_v28, %v214_v36 }
  0x2f   :  { %153 = vst.msk [vmem:[#allocation2 + $0x10] sm:$0xff] %vm11798_vm0, %v151_v42  ;;  %812 = vmatpush1.bf16.msra.mxu0 %v8355_v51  ;;  %760 = vmatprep.subr.bf16.mxu1 %v8392_v61  ;;  %149 = vst.msk [vmem:[#allocation2 + $0x8] sm:$0xff] %vm11798_vm0, %v147_v9  ;;  %v276_v46 = vld [vmem:[%s11790_s3 + $0xf8] sm:$0xff]  ;;  %v8407_v8 = vld [vmem:[%s11790_s3 + $0x240] ss:$8 sps:$4 sm:$0xff]  }
  0x30   :  { %813 = vmatprep.subr.bf16.mxu0 %v8359_v53  ;;  %208 = vst.msk [vmem:[#allocation2 + $0x68] sm:$0xff] %vm11798_vm0, %v204_v10  ;;  %144 = vst.msk [vmem:[#allocation2] sm:$0xff] %vm11798_vm0, %v141_v13  ;;  %v8416_v48 = vld [vmem:[%s11790_s3 + $0xf4] ss:$8 sps:$4 sm:$0xff]   ;;  %v8389_v50 = vld [vmem:[%s11790_s3 + $0x210] ss:$8 sps:$4 sm:$0xff]   ;;  %v7276_v54 = vcombine.low %v275_v45, %v276_v46 }
  0x31   :  { %150 = vst.msk [vmem:[#allocation2 + $0x30] sm:$0xf] %vm145_vm1, %v148_v11  ;;  %146 = vst.msk [vmem:[#allocation2 + $0x28] sm:$0xf] %vm145_vm1, %v142_v18  ;;  %v8397_v53 = vld [vmem:[%s11790_s3 + $0x224] ss:$8 sps:$4 sm:$0xff]  }
  0x32   :  { %761 = vmatpush1.bf16.msra.mxu1 %v8394_v1  ;;  %197 = vst.msk [vmem:[#allocation2 + $0x60] sm:$0xff] %vm11798_vm0, %v193_v16  ;;  %161 = vst.msk [vmem:[#allocation2 + $0x20] sm:$0xff] %vm11798_vm0, %v159_v25  ;;  %v8403_v61 = vld [vmem:[%s11790_s3 + $0x234] ss:$8 sps:$4 sm:$0xff]   ;;  %v8424_v1 = vld [vmem:[%s11791_s4] ss:$8 sps:$4 sm:$0xff]  }
  0x33   :  { %v223_v52 = vld [vmem:[#allocation2 + $0x18] sm:$0xff]  ;;  %814 = vmatpush1.bf16.msra.mxu0 %v8361_v58  ;;  %762 = vmatprep.subr.bf16.mxu1 %v8398_v2  ;;  %185 = vst.msk [vmem:[#allocation2 + $0x30] sm:$0xf0] %vm173_vm2, %v180_v17  ;;  %174 = vst.msk [vmem:[#allocation2 + $0x28] sm:$0xf0] %vm173_vm2, %v168_v23 }
  0x34   :  { %815 = vmatprep.subr.bf16.mxu0 %v8365_v59  ;;  %162 = vst.msk [vmem:[#allocation2 + $0x48] sm:$0xf] %vm145_vm1, %v160_v26  ;;  %v8426_v58 = vld [vmem:[%s11791_s4 + $0x4] ss:$8 sps:$4 sm:$0xff]   ;;  %v8395_v59 = vld [vmem:[%s11790_s3 + $0x220] ss:$8 sps:$4 sm:$0xff]  }
  0x35   :  { %v228_v55 = vld [vmem:[#allocation2 + $0x40] sm:$0xff]  ;;  %v227_v21 = vld [vmem:[#allocation2 + $0x38] sm:$0xff]  ;;  %218 = vst.msk [vmem:[#allocation2 + $0x48] sm:$0xf0] %vm173_vm2, %v213_v28 }
  0x36   :  { %v238_v56 = vpack.c.bf16 %v228_v55, %v223_v52  ;;  %v222_v15 = vld [vmem:[#allocation2 + $0x10] sm:$0xff]  ;;  %763 = vmatpush1.bf16.msra.mxu1 %v8400_v7  ;;  %v221_v43 = vld [vmem:[#allocation2 + $0x8] sm:$0xff]  ;;  %186 = vst.msk [vmem:[#allocation2 + $0x58] sm:$0xff] %vm11798_vm0, %v182_v40  ;;  %175 = vst.msk [vmem:[#allocation2 + $0x50] sm:$0xff] %vm11798_vm0, %v170_v41 }
  0x37   :  { %816 = vmatpush1.bf16.msra.mxu0 %v8367_v62  ;;  %v237_v34 = vpack.c.bf16 %v227_v21, %v222_v15  ;;  %764 = vmatprep.subr.bf16.mxu1 %v8404_v22  ;;  %v233_v42 = vld [vmem:[#allocation2 + $0x68] sm:$0xff]  ;;  %219 = vst.msk [vmem:[#allocation2 + $0x70] sm:$0xff] %vm11798_vm0, %v215_v44  ;;  %v220_v55 = vld [vmem:[#allocation2] sm:$0xff]  ;;  %v8429_v3 = vld [vmem:[%s11791_s4 + $0x14] ss:$8 sps:$4 sm:$0xff]  }
  0x38   :  { %821 = vmatprep.mubr.bf16.mxu0 %v238_v56  ;;  %817 = vmatprep.subr.bf16.mxu0 %v8371_v63  ;;  %v243_v47 = vpack.c.bf16 %v233_v42, %v233_v42  ;;  %v8401_v63 = vld [vmem:[%s11790_s3 + $0x230] ss:$8 sps:$4 sm:$0xff]   ;;  %v8409_v2 = vld [vmem:[%s11790_s3 + $0x244] ss:$8 sps:$4 sm:$0xff]   ;;  %v8415_v9 = vld [vmem:[%s11790_s3 + $0x254] ss:$8 sps:$4 sm:$0xff]  }
  0x39   :  { %v232_v51 = vld [vmem:[#allocation2 + $0x60] sm:$0xff]  ;;  %v8435_v12 = vld [vmem:[%s11791_s4 + $0x34] ss:$8 sps:$4 sm:$0xff]   ;;  %v8413_v13 = vld [vmem:[%s11790_s3 + $0x250] ss:$8 sps:$4 sm:$0xff]  }
  0x3a   :  { %765 = vmatpush1.bf16.msra.mxu1 %v8406_v24  ;;  %v226_v49 = vld [vmem:[#allocation2 + $0x30] sm:$0xff]  ;;  %v225_v56 = vld [vmem:[#allocation2 + $0x28] sm:$0xff]  ;;  %v242_v57 = vpack.c.bf16 %v232_v51, %v232_v51  ;;  %v224_v22 = vld [vmem:[#allocation2 + $0x20] sm:$0xff]  ;;  %v328_v51 = vlaneseq }
  0x3b   :  { %818 = vmatpush1.bf16.msra.mxu0 %v8373_v0  ;;  %766 = vmatprep.subr.bf16.mxu1 %v8410_v35  ;;  %v236_v52 = vpack.c.bf16 %v226_v49, %v221_v43  ;;  %v235_v62 = vpack.c.bf16 %v225_v56, %v220_v55  ;;  %v8432_v7 = vld [vmem:[%s11791_s4 + $0x24] ss:$8 sps:$4 sm:$0xff]   ;;  %v8430_v10 = vld [vmem:[%s11791_s4 + $0x20] ss:$8 sps:$4 sm:$0xff]   ;;  %v8433_v15 = vld [vmem:[%s11791_s4 + $0x30] ss:$8 sps:$4 sm:$0xff]  }
  0x3c   :  { %819 = vmatprep.subr.bf16.mxu0 %v8377_v6  ;;  %v8427_v6 = vld [vmem:[%s11791_s4 + $0x10] ss:$8 sps:$4 sm:$0xff]   ;;  %v8438_v16 = vld [vmem:[%s11791_s4 + $0x44] ss:$8 sps:$4 sm:$0xff]   ;;  %v8418_v17 = vld [vmem:[%s11790_s3 + $0x260] ss:$8 sps:$4 sm:$0xff]  }
  0x3d   :  { %770 = vmatprep.mubr.bf16.mxu1 %v236_v52  ;;  %v231_v60 = vld [vmem:[#allocation2 + $0x58] sm:$0xff]  ;;  %v230_v5 = vld [vmem:[#allocation2 + $0x50] sm:$0xff]  ;;  %v8436_v19 = vld [vmem:[%s11791_s4 + $0x40] ss:$8 sps:$4 sm:$0xff]  }
  0x3e   :  { %767 = vmatpush1.bf16.msra.mxu1 %v8412_v39  ;;  %v241_v0 = vpack.c.bf16 %v231_v60, %v231_v60  ;;  %v240_v11 = vpack.c.bf16 %v230_v5, %v230_v5  ;;  %v8423_v18 = vld [vmem:[%s11790_s3 + $0x274] ss:$8 sps:$4 sm:$0xff]   ;;  %v8421_v21 = vld [vmem:[%s11790_s3 + $0x270] ss:$8 sps:$4 sm:$0xff]   ;;  %v229_v23 = vld [vmem:[#allocation2 + $0x48] sm:$0xff] }
  0x3f   :  { %820 = vmatpush1.bf16.msra.mxu0 %v8379_v14  ;;  %768 = vmatprep.subr.bf16.mxu1 %v8416_v48  ;;  %v8420_v14 = vld [vmem:[%s11790_s3 + $0x264] ss:$8 sps:$4 sm:$0xff]   ;;  %v8439_v24 = vld [vmem:[%s11791_s4 + $0x50] ss:$8 sps:$4 sm:$0xff]   ;;  %v239_v26 = vpack.c.bf16 %v229_v23, %v224_v22  ;;  %v8442_v27 = vld [vmem:[%s11791_s4 + $0x60] ss:$8 sps:$4 sm:$0xff]  }
  0x40   :  { %840 = vmatprep.subr.bf16.mxu0 %v8385_v20  ;;  %v8441_v20 = vld [vmem:[%s11791_s4 + $0x54] ss:$8 sps:$4 sm:$0xff]   ;;  %v8444_v25 = vld [vmem:[%s11791_s4 + $0x64] ss:$8 sps:$4 sm:$0xff]   ;;  %v8445_v30 = vld [vmem:[%s11791_s4 + $0x70] ss:$8 sps:$4 sm:$0xff]  }
  0x41   :  { %v8447_v28 = vld [vmem:[%s11791_s4 + $0x74] ss:$8 sps:$4 sm:$0xff]   ;;  %v8448_v32 = vld [vmem:[%s11791_s4 + $0x80] ss:$8 sps:$4 sm:$0xff]   ;;  %v8450_v33 = vld [vmem:[%s11791_s4 + $0x84] ss:$8 sps:$4 sm:$0xff]  }
  0x42   :  { %822 = vmatmul.mubr.bf16.vlgmr.msra.gmra.mrb[0].mxu0 %v237_v34  ;;  %769 = vmatpush1.bf16.msra.mxu1 %v7276_v54  ;;  %v234_v29 = vld [vmem:[#allocation2 + $0x70] sm:$0xff]  ;;  %v8456_v36 = vld [vmem:[%s11791_s4 + $0xa4] ss:$8 sps:$4 sm:$0xff]   ;;  %v8460_v41 = vld [vmem:[%s11791_s4 + $0xc0] ss:$8 sps:$4 sm:$0xff]   ;;  %v9751_v54 = vshrl.u32 %v328_v51, 7 }
  0x43   :  { %841 = vmatpush1.bf16.msra.mxu0 %v8383_v37  ;;  %831 = vmatprep.mubr.bf16.mxu0 %v243_v47  ;;  %v244_v31 = vpack.c.bf16 %v234_v29, %v234_v29  ;;  %v8451_v34 = vld [vmem:[%s11791_s4 + $0x90] ss:$8 sps:$4 sm:$0xff]   ;;  %v8453_v35 = vld [vmem:[%s11791_s4 + $0x94] ss:$8 sps:$4 sm:$0xff]   ;;  %v8454_v37 = vld [vmem:[%s11791_s4 + $0xa0] ss:$8 sps:$4 sm:$0xff]  }
  0x44   :  { %842 = vmatprep.subr.bf16.mxu0 %v8391_v38  ;;  %1995 = vmatprep.subr.bf16.mxu1 %v8426_v58  ;;  %v8459_v38 = vld [vmem:[%s11791_s4 + $0xb4] ss:$8 sps:$4 sm:$0xff]   ;;  %v8457_v39 = vld [vmem:[%s11791_s4 + $0xb0] ss:$8 sps:$4 sm:$0xff]   ;;  %v8462_v40 = vld [vmem:[%s11791_s4 + $0xc4] ss:$8 sps:$4 sm:$0xff]  }
  0x45   :  { %771 = vmatmul.mubr.bf16.vlgmr.msra.gmra.mrb[0].mxu1 %v235_v62  ;;  %v8465_v42 = vld [vmem:[%s11791_s4 + $0xd4] ss:$8 sps:$4 sm:$0xff]   ;;  %v8463_v43 = vld [vmem:[%s11791_s4 + $0xd0] ss:$8 sps:$4 sm:$0xff]   ;;  %v8468_v44 = vld [vmem:[%s11791_s4 + $0xe4] ss:$8 sps:$4 sm:$0xff]  }
  0x46   :  { %780 = vmatprep.mubr.bf16.mxu1 %v241_v0  ;;  %1996 = vmatpush1.bf16.msra.mxu1 %v8424_v1  ;;  %v8466_v45 = vld [vmem:[%s11791_s4 + $0xe0] ss:$8 sps:$4 sm:$0xff]   ;;  %v8471_v46 = vld [vmem:[%s11791_s4 + $0xf4] ss:$8 sps:$4 sm:$0xff]   ;;  %v8469_v47 = vld [vmem:[%s11791_s4 + $0xf0] ss:$8 sps:$4 sm:$0xff]  }
  0x47   :  { %843 = vmatpush1.bf16.msra.mxu0 %v8389_v50  ;;  %1997 = vmatprep.subr.bf16.mxu1 %v8429_v3  ;;  %v8474_v48 = vld [vmem:[%s11791_s4 + $0x104] ss:$8 sps:$4 sm:$0xff]   ;;  %v9757_v58 = vsub.s32 0, %v9751_v54  ;;  %v9760_v60 = vsub.s32 1, %v9751_v54 }
  0x48   :  { %844 = vmatprep.subr.bf16.mxu0 %v8397_v53 }
  0x4a   :  { %832 = vmatmul.mubr.bf16.gmra.mrb[4].mxu0 %v242_v57  ;;  %1998 = vmatpush1.bf16.msra.mxu1 %v8427_v6  ;;  %v7245_v57 = vld [vmem:[%s11789_s2 + $0x2] ss:$8 sm:$0x3] }
  0x4b   :  { %845 = vmatpush1.bf16.msra.mxu0 %v8395_v59  ;;  %872 = vmatprep.mubr.bf16.mxu0 %v9159_v4  ;;  %v331_v62 = vrot.slane %v7245_v57, %v9757_v58 }
  0x4c   :  { %846 = vmatprep.subr.bf16.mxu0 %v8403_v61  ;;  %1999 = vmatprep.subr.bf16.mxu1 %v8432_v7 }
  0x4d   :  { %781 = vmatmul.mubr.bf16.gmra.mrb[4].mxu1 %v240_v11 }
  0x4e   :  { %2000 = vmatpush1.bf16.msra.mxu1 %v8430_v10 }
  0x4f   :  { %847 = vmatpush1.bf16.msra.mxu0 %v8401_v63  ;;  %2001 = vmatprep.subr.bf16.mxu1 %v8435_v12  ;;  %v335_v63 = vrot.slane %v7245_v57, %v9760_v60 }
  0x50   :  { %848 = vmatprep.subr.bf16.mxu0 %v8409_v2 }
  0x52   :  { %2002 = vmatpush1.bf16.msra.mxu1 %v8433_v15 }
  0x53   :  { %849 = vmatpush1.bf16.msra.mxu0 %v8407_v8  ;;  %2003 = vmatprep.subr.bf16.mxu1 %v8438_v16 }
  0x54   :  { %850 = vmatprep.subr.bf16.mxu0 %v8415_v9 }
  0x56   :  { %2004 = vmatpush1.bf16.msra.mxu1 %v8436_v19 }
  0x57   :  { %851 = vmatpush1.bf16.msra.mxu0 %v8413_v13  ;;  %2005 = vmatprep.subr.bf16.mxu1 %v8441_v20 }
  0x58   :  { %852 = vmatprep.subr.bf16.mxu0 %v8420_v14 }
  0x5a   :  { %2006 = vmatpush1.bf16.msra.mxu1 %v8439_v24 }
  0x5b   :  { %853 = vmatpush1.bf16.msra.mxu0 %v8418_v17  ;;  %2007 = vmatprep.subr.bf16.mxu1 %v8444_v25 }
  0x5c   :  { %854 = vmatprep.subr.bf16.mxu0 %v8423_v18 }
  0x5e   :  { %2008 = vmatpush1.bf16.msra.mxu1 %v8442_v27 }
  0x5f   :  { %855 = vmatpush1.bf16.msra.mxu0 %v8421_v21  ;;  %2009 = vmatprep.subr.bf16.mxu1 %v8447_v28 }
  0x62   :  { %873 = vmatmul.mubr.bf16.vlgmr.msra.gmra.mrb[0].mxu0 %v239_v26  ;;  %2010 = vmatpush1.bf16.msra.mxu1 %v8445_v30 }
  0x63   :  { %882 = vmatprep.mubr.bf16.mxu0 %v9159_v4  ;;  %2011 = vmatprep.subr.bf16.mxu1 %v8450_v33 }
  0x66   :  { %2012 = vmatpush1.bf16.msra.mxu1 %v8448_v32 }
  0x67   :  { %2013 = vmatprep.subr.bf16.mxu1 %v8453_v35 }
  0x6a   :  { %883 = vmatmul.mubr.bf16.gmra.mrb[4].mxu0 %v244_v31  ;;  %2014 = vmatpush1.bf16.msra.mxu1 %v8451_v34 }
  0x6b   :  { %2015 = vmatprep.subr.bf16.mxu1 %v8456_v36 }
  0x6e   :  { %2016 = vmatpush1.bf16.msra.mxu1 %v8454_v37 }
  0x6f   :  { %2017 = vmatprep.subr.bf16.mxu1 %v8459_v38 }
  0x72   :  { %2018 = vmatpush1.bf16.msra.mxu1 %v8457_v39 }
  0x73   :  { %2019 = vmatprep.subr.bf16.mxu1 %v8462_v40 }
  0x76   :  { %2020 = vmatpush1.bf16.msra.mxu1 %v8460_v41 }
  0x77   :  { %2021 = vmatprep.subr.bf16.mxu1 %v8465_v42 }
  0x7a   :  { %2022 = vmatpush1.bf16.msra.mxu1 %v8463_v43 }
  0x7b   :  { %2023 = vmatprep.subr.bf16.mxu1 %v8468_v44 }
  0x7e   :  { %2024 = vmatpush1.bf16.msra.mxu1 %v8466_v45 }
  0x7f   :  { %2025 = vmatprep.subr.bf16.mxu1 %v8471_v46 }
  0x82   :  { %2026 = vmatpush1.bf16.msra.mxu1 %v8469_v47 }
  0x83   :  { %2038 = vmatprep.subr.bf16.mxu1 %v8474_v48 }
 0x118   :  { %v772_v49 = vpop.f32.mrb[0].mxu1 }
 0x119   :  { %v774_v50 = vpop.f32.mrb[1].mxu1  ;;  %v773_v0 = vadd.f32 %v772_v49, %v331_v62 }
 0x11a   :  { %v776_v52 = vpop.f32.mrb[2].mxu1  ;;  %v775_v1 = vadd.f32 %v774_v50, %v335_v63 }
 0x11b   :  { %v778_v53 = vpop.f32.mrb[3].mxu1  ;;  %v777_v3 = vadd.f32 %v776_v52, %v331_v62 }
 0x11c   :  { %v779_v7 = vadd.f32 %v778_v53, %v335_v63 }
 0x120   :  { %v782_v55 = vpop.f32.mrb[4].mxu1 }
 0x121   :  { %v784_v56 = vpop.f32.mrb[5].mxu1  ;;  %v783_v15 = vadd.f32 %v782_v55, %v331_v62 }
 0x122   :  { %v786_v59 = vpop.f32.mrb[6].mxu1  ;;  %v785_v22 = vadd.f32 %v784_v56, %v335_v63 }
 0x123   :  { %v787_v61 = vpop.f32.mrb[7].mxu1 }
 0x135   :  { %v874_v2 = vpop.f32.mrb[0].mxu0 }
 0x136   :  { %v8219_v5 = vadd.f32 %v874_v2, %v773_v0  ;;  %v876_v6 = vpop.f32.mrb[1].mxu0 }
 0x137   :  { %v8221_v8 = vadd.f32 %v876_v6, %v775_v1  ;;  %v878_v9 = vpop.f32.mrb[2].mxu0 }
 0x138   :  { %v9764_v10 = vmax.f32 %v8219_v5, 0.0  ;;  %v8223_v11 = vadd.f32 %v878_v9, %v777_v3  ;;  %v880_v12 = vpop.f32.mrb[3].mxu0 }
 0x139   :  { %v892_v13 = vmax.f32 %v8221_v8, 0.0  ;;  %v8225_v14 = vadd.f32 %v880_v12, %v779_v7 }
 0x13a   :  { %v905_v16 = vrot.slane %v9764_v10, 1  ;;  %v916_v17 = vrot.slane %v9764_v10, 2  ;;  %v927_v18 = vrot.slane %v9764_v10, 3  ;;  %v937_v19 = vrot.slane %v9764_v10, 4 }
 0x13b   :  { %899 = vst.msk [vmem:[#allocation3 + $0x8] sm:$0xff] %vm898_vm4, %v892_v13  ;;  %v893_v20 = vmax.f32 %v8223_v11, 0.0  ;;  %v9771_v21 = vmax.f32 %v8225_v14, 0.0  ;;  %v908_v23 = vrot.slane %v892_v13, 1  ;;  %v919_v24 = vrot.slane %v892_v13, 2 }
 0x13c   :  { %v930_v25 = vrot.slane %v892_v13, 3  ;;  %v940_v26 = vrot.slane %v892_v13, 4 }
 0x13d   :  { %v884_v27 = vpop.f32.mrb[4].mxu0  ;;  %v906_v28 = vrot.slane %v893_v20, 1  ;;  %v917_v29 = vrot.slane %v893_v20, 2  ;;  %v928_v30 = vrot.slane %v893_v20, 3  ;;  %v909_v31 = vrot.slane %v9771_v21, 1 }
 0x13e   :  { %v886_v32 = vpop.f32.mrb[5].mxu0  ;;  %v920_v33 = vrot.slane %v9771_v21, 2  ;;  %v931_v34 = vrot.slane %v9771_v21, 3  ;;  %v8227_v35 = vadd.f32 %v884_v27, %v783_v15  ;;  %v938_v36 = vrot.slane %v893_v20, 4  ;;  %v8475_v27 = vld [vmem:[%s11791_s4 + $0x110] ss:$8 sps:$4 sm:$0xff]  }
 0x13f   :  { %v888_v37 = vpop.f32.mrb[6].mxu0  ;;  %v9777_v38 = vsel %vm904_vm5, %v905_v16, %v906_v28  ;;  %v9780_v39 = vsel %vm915_vm6, %v916_v17, %v917_v29  ;;  %v9783_v40 = vsel %vm926_vm7, %v927_v18, %v928_v30  ;;  %v910_v41 = vsel %vm904_vm5, %v908_v23, %v909_v31  ;;  %v8477_v23 = vld [vmem:[%s11791_s4 + $0x114] ss:$8 sps:$4 sm:$0xff]   ;;  %v8480_v28 = vld [vmem:[%s11791_s4 + $0x124] ss:$8 sps:$4 sm:$0xff]  }
 0x140   :  { %v889_v42 = vpop.f32.mrb[7].mxu0  ;;  %914 = vst.msk [vmem:[#allocation3 + $0x18] sm:$0xff] %vm898_vm4, %v910_v41  ;;  %v921_v43 = vsel %vm915_vm6, %v919_v24, %v920_v33  ;;  %v932_v44 = vsel %vm926_vm7, %v930_v25, %v931_v34  ;;  %v9789_v45 = vmax.f32 %v8227_v35, 0.0  ;;  %v9792_v46 = vsel %vm167_vm3, %v937_v19, %v938_v36  ;;  %v8472_v19 = vld [vmem:[%s11791_s4 + $0x100] ss:$8 sps:$4 sm:$0xff]  }
 0x141   :  { %925 = vst.msk [vmem:[#allocation3 + $0x28] sm:$0xff] %vm898_vm4, %v921_v43  ;;  %936 = vst.msk [vmem:[#allocation3 + $0x38] sm:$0xff] %vm898_vm4, %v932_v44  ;;  %v958_v47 = vrot.slane %v893_v20, 5  ;;  %v969_v48 = vrot.slane %v893_v20, 6  ;;  %v980_v49 = vrot.slane %v893_v20, 7  ;;  %v8229_v50 = vadd.f32 %v886_v32, %v785_v22 }
 0x142   :  { %v949_v52 = vrot.slane %v9789_v45, 4  ;;  %v959_v53 = vrot.slane %v9789_v45, 5  ;;  %v970_v55 = vrot.slane %v9789_v45, 6  ;;  %v981_v56 = vrot.slane %v9789_v45, 7  ;;  %v993_v20 = vld [vmem:[#allocation3 + $0x8] sm:$0xff] }
 0x143   :  { %v896_v57 = vmax.f32 %v8229_v50, 0.0  ;;  %v941_v59 = vrot.slane %v9771_v21, 4  ;;  %v961_v61 = vrot.slane %v9771_v21, 5  ;;  %v972_v62 = vrot.slane %v9771_v21, 6  ;;  %v8478_v29 = vld [vmem:[%s11791_s4 + $0x120] ss:$8 sps:$4 sm:$0xff]  }
 0x144   :  { %v950_v63 = vsel %vm167_vm3, %v938_v36, %v949_v52  ;;  %v9805_v0 = vsel %vm957_vm8, %v958_v47, %v959_v53  ;;  %v9808_v1 = vsel %vm968_vm9, %v969_v48, %v970_v55  ;;  %v9811_v2 = vsel %vm979_vm10, %v980_v49, %v981_v56  ;;  %v8483_v30 = vld [vmem:[%s11791_s4 + $0x134] ss:$8 sps:$4 sm:$0xff]   ;;  %v8481_v31 = vld [vmem:[%s11791_s4 + $0x130] ss:$8 sps:$4 sm:$0xff]   ;;  %v8486_v32 = vld [vmem:[%s11791_s4 + $0x144] ss:$8 sps:$4 sm:$0xff]  }
 0x145   :  { %v942_v3 = vsel %vm167_vm3, %v940_v26, %v941_v59  ;;  %v951_v5 = vrot.slane %v896_v57, 4  ;;  %v962_v6 = vrot.slane %v896_v57, 5  ;;  %v973_v7 = vrot.slane %v896_v57, 6  ;;  %991 = vst.msk [vmem:[#allocation3 + $0x98] sm:$0xff] %vm898_vm4, %v896_v57  ;;  %v8484_v33 = vld [vmem:[%s11791_s4 + $0x140] ss:$8 sps:$4 sm:$0xff]  }
 0x146   :  { %946 = vst.msk [vmem:[#allocation3 + $0x48] sm:$0xff] %vm898_vm4, %v942_v3  ;;  %v983_v8 = vrot.slane %v9771_v21, 7  ;;  %v984_v9 = vrot.slane %v896_v57, 7  ;;  %v1012_v11 = vpack.c.bf16 %v950_v63, %v9764_v10  ;;  %v1014_v12 = vpack.c.bf16 %v9805_v0, %v9777_v38  ;;  %v8489_v34 = vld [vmem:[%s11791_s4 + $0x154] ss:$8 sps:$4 sm:$0xff]  }
 0x147   :  { %v952_v13 = vsel %vm167_vm3, %v941_v59, %v951_v5  ;;  %v963_v14 = vsel %vm957_vm8, %v961_v61, %v962_v6  ;;  %v974_v15 = vsel %vm968_vm9, %v972_v62, %v973_v7  ;;  %v1016_v16 = vpack.c.bf16 %v9808_v1, %v9780_v39  ;;  %v995_v25 = vld [vmem:[#allocation3 + $0x18] sm:$0xff]  ;;  %v8492_v36 = vld [vmem:[%s11791_s4 + $0x164] ss:$8 sps:$4 sm:$0xff]   ;;  %v8490_v37 = vld [vmem:[%s11791_s4 + $0x160] ss:$8 sps:$4 sm:$0xff]  }
 0x148   :  { %956 = vst.msk [vmem:[#allocation3 + $0x58] sm:$0xff] %vm898_vm4, %v952_v13  ;;  %967 = vst.msk [vmem:[#allocation3 + $0x68] sm:$0xff] %vm898_vm4, %v963_v14  ;;  %v985_v10 = vsel %vm979_vm10, %v983_v8, %v984_v9  ;;  %v1018_v17 = vpack.c.bf16 %v9811_v2, %v9783_v40  ;;  %v1020_v18 = vpack.c.bf16 %v9789_v45, %v9792_v46  ;;  %v8487_v35 = vld [vmem:[%s11791_s4 + $0x150] ss:$8 sps:$4 sm:$0xff]   ;;  %v8495_v41 = vld [vmem:[%s11791_s4 + $0x174] ss:$8 sps:$4 sm:$0xff]  }
 0x149   :  { %978 = vst.msk [vmem:[#allocation3 + $0x78] sm:$0xff] %vm898_vm4, %v974_v15  ;;  %989 = vst.msk [vmem:[#allocation3 + $0x88] sm:$0xff] %vm898_vm4, %v985_v10 }
 0x14f   :  { %v1003_v21 = vld [vmem:[#allocation3 + $0x58] sm:$0xff]  ;;  %v1005_v22 = vld [vmem:[#allocation3 + $0x68] sm:$0xff] }
 0x150   :  { %v1013_v24 = vpack.c.bf16 %v1003_v21, %v993_v20  ;;  %v1015_v26 = vpack.c.bf16 %v1005_v22, %v995_v25 }
 0x152   :  { %2027 = vmatprep.mubr.bf16.mxu1 %v1013_v24 }
 0x153   :  { %2028 = vmatmul.mubr.bf16.vlgmr.msra.gmra.mrb[8].mxu1 %v1012_v11 }
 0x154   :  { %2039 = vmatpush1.bf16.msra.mxu1 %v8472_v19  ;;  %2070 = vmatprep.mubr.bf16.mxu1 %v1015_v26 }
 0x155   :  { %2040 = vmatprep.subr.bf16.mxu1 %v8477_v23 }
 0x158   :  { %2041 = vmatpush1.bf16.msra.mxu1 %v8475_v27 }
 0x159   :  { %2042 = vmatprep.subr.bf16.mxu1 %v8480_v28 }
 0x15c   :  { %2043 = vmatpush1.bf16.msra.mxu1 %v8478_v29 }
 0x15d   :  { %2044 = vmatprep.subr.bf16.mxu1 %v8483_v30 }
 0x160   :  { %2045 = vmatpush1.bf16.msra.mxu1 %v8481_v31 }
 0x161   :  { %2046 = vmatprep.subr.bf16.mxu1 %v8486_v32 }
 0x164   :  { %2047 = vmatpush1.bf16.msra.mxu1 %v8484_v33 }
 0x165   :  { %2048 = vmatprep.subr.bf16.mxu1 %v8489_v34 }
 0x168   :  { %2049 = vmatpush1.bf16.msra.mxu1 %v8487_v35 }
 0x169   :  { %2050 = vmatprep.subr.bf16.mxu1 %v8492_v36 }
 0x16a   :  { %16 = vsyncpa [#allocation9], 0  ;;  %v8493_v42 = vld [vmem:[%s11791_s4 + $0x170] ss:$8 sps:$4 sm:$0xff]   ;;  %v8498_v43 = vld [vmem:[%s11791_s4 + $0x184] ss:$8 sps:$4 sm:$0xff]  }
 0x16b   :  { %v8496_v44 = vld [vmem:[%s11791_s4 + $0x180] ss:$8 sps:$4 sm:$0xff]   ;;  %v8501_v47 = vld [vmem:[%s11791_s4 + $0x194] ss:$8 sps:$4 sm:$0xff]   ;;  %v8499_v48 = vld [vmem:[%s11791_s4 + $0x190] ss:$8 sps:$4 sm:$0xff]  }
 0x16c   :  { %2051 = vmatpush1.bf16.msra.mxu1 %v8490_v37  ;;  %v8504_v49 = vld [vmem:[%s11791_s4 + $0x1a4] ss:$8 sps:$4 sm:$0xff]   ;;  %v8502_v50 = vld [vmem:[%s11791_s4 + $0x1a0] ss:$8 sps:$4 sm:$0xff]   ;;  %v8507_v52 = vld [vmem:[%s11791_s4 + $0x1b4] ss:$8 sps:$4 sm:$0xff]  }
 0x16d   :  { %2052 = vmatprep.subr.bf16.mxu1 %v8495_v41  ;;  %v8505_v53 = vld [vmem:[%s11791_s4 + $0x1b0] ss:$8 sps:$4 sm:$0xff]   ;;  %v8510_v55 = vld [vmem:[%s11791_s4 + $0x1c4] ss:$8 sps:$4 sm:$0xff]   ;;  %v8508_v56 = vld [vmem:[%s11791_s4 + $0x1c0] ss:$8 sps:$4 sm:$0xff]  }
 0x16e   :  { %v8513_v57 = vld [vmem:[%s11791_s4 + $0x1d4] ss:$8 sps:$4 sm:$0xff]   ;;  %v8511_v59 = vld [vmem:[%s11791_s4 + $0x1d0] ss:$8 sps:$4 sm:$0xff]   ;;  %v8516_v61 = vld [vmem:[%s11791_s4 + $0x1e4] ss:$8 sps:$4 sm:$0xff]  }
 0x16f   :  { %v8514_v62 = vld [vmem:[%s11791_s4 + $0x1e0] ss:$8 sps:$4 sm:$0xff]   ;;  %v8519_v63 = vld [vmem:[%s11791_s4 + $0x1f4] ss:$8 sps:$4 sm:$0xff]   ;;  %v8517_v3 = vld [vmem:[%s11791_s4 + $0x1f0] ss:$8 sps:$4 sm:$0xff]  }
 0x170   :  { %2053 = vmatpush1.bf16.msra.mxu1 %v8493_v42  ;;  %v8522_v5 = vld [vmem:[%s11791_s4 + $0x204] ss:$8 sps:$4 sm:$0xff]   ;;  %v1007_v6 = vld [vmem:[#allocation3 + $0x78] sm:$0xff]  ;;  %v8520_v7 = vld [vmem:[%s11791_s4 + $0x200] ss:$8 sps:$4 sm:$0xff]   ;;  %vm10337_vm11 = vcmp.lt.s32.totalorder %v328_v51, 256 }
 0x171   :  { %2054 = vmatprep.subr.bf16.mxu1 %v8498_v43  ;;  %v997_v8 = vld [vmem:[#allocation3 + $0x28] sm:$0xff]  ;;  %v8525_v9 = vld [vmem:[%s11791_s4 + $0x214] ss:$8 sps:$4 sm:$0xff]   ;;  %v8523_v13 = vld [vmem:[%s11791_s4 + $0x210] ss:$8 sps:$4 sm:$0xff]   ;;  %s9162_s11 = smov 32  }
 0x172   :  { %v1017_v11 = vpack.c.bf16 %v1007_v6, %v997_v8  ;;  %v8528_v14 = vld [vmem:[%s11791_s4 + $0x224] ss:$8 sps:$4 sm:$0xff]   ;;  %v8526_v15 = vld [vmem:[%s11791_s4 + $0x220] ss:$8 sps:$4 sm:$0xff]   ;;  %v8531_v38 = vld [vmem:[%s11791_s4 + $0x234] ss:$8 sps:$4 sm:$0xff]  }
 0x173   :  { %v8529_v0 = vld [vmem:[%s11791_s4 + $0x230] ss:$8 sps:$4 sm:$0xff]   ;;  %v8532_v10 = vld [vmem:[%s11791_s4 + $0x240] ss:$8 sps:$4 sm:$0xff]   ;;  %v8537_v19 = vld [vmem:[%s11791_s4 + $0x254] ss:$8 sps:$4 sm:$0xff]  }
 0x174   :  { %2055 = vmatpush1.bf16.msra.mxu1 %v8496_v44  ;;  %v8535_v20 = vld [vmem:[%s11791_s4 + $0x250] ss:$8 sps:$4 sm:$0xff]   ;;  %v8540_v21 = vld [vmem:[%s11791_s4 + $0x264] ss:$8 sps:$4 sm:$0xff]   ;;  %v8538_v22 = vld [vmem:[%s11791_s4 + $0x260] ss:$8 sps:$4 sm:$0xff]  }
 0x175   :  { %2056 = vmatprep.subr.bf16.mxu1 %v8501_v47  ;;  %v8543_v23 = vld [vmem:[%s11791_s4 + $0x274] ss:$8 sps:$4 sm:$0xff]   ;;  %v8541_v24 = vld [vmem:[%s11791_s4 + $0x270] ss:$8 sps:$4 sm:$0xff]   ;;  %v8546_v25 = vld [vmem:[%s11791_s4 + $0x284] ss:$8 sps:$4 sm:$0xff]  }
 0x176   :  { %v8544_v26 = vld [vmem:[%s11791_s4 + $0x280] ss:$8 sps:$4 sm:$0xff]   ;;  %v8549_v27 = vld [vmem:[%s11791_s4 + $0x294] ss:$8 sps:$4 sm:$0xff]   ;;  %v8547_v28 = vld [vmem:[%s11791_s4 + $0x290] ss:$8 sps:$4 sm:$0xff]  }
 0x177   :  { %v8552_v29 = vld [vmem:[%s11791_s4 + $0x2a4] ss:$8 sps:$4 sm:$0xff]   ;;  %v8550_v30 = vld [vmem:[%s11791_s4 + $0x2a0] ss:$8 sps:$4 sm:$0xff]   ;;  %v8555_v31 = vld [vmem:[%s11791_s4 + $0x2b4] ss:$8 sps:$4 sm:$0xff]  }
 0x178   :  { %2057 = vmatpush1.bf16.msra.mxu1 %v8499_v48  ;;  %v8553_v32 = vld [vmem:[%s11791_s4 + $0x2b0] ss:$8 sps:$4 sm:$0xff]   ;;  %v8558_v33 = vld [vmem:[%s11791_s4 + $0x2c4] ss:$8 sps:$4 sm:$0xff]   ;;  %v8556_v34 = vld [vmem:[%s11791_s4 + $0x2c0] ss:$8 sps:$4 sm:$0xff]  }
 0x179   :  { %2058 = vmatprep.subr.bf16.mxu1 %v8504_v49  ;;  %v8561_v35 = vld [vmem:[%s11791_s4 + $0x2d4] ss:$8 sps:$4 sm:$0xff]   ;;  %v8559_v36 = vld [vmem:[%s11791_s4 + $0x2d0] ss:$8 sps:$4 sm:$0xff]   ;;  %v8564_v37 = vld [vmem:[%s11791_s4 + $0x2e4] ss:$8 sps:$4 sm:$0xff]  }
 0x17a   :  { %v8562_v41 = vld [vmem:[%s11791_s4 + $0x2e0] ss:$8 sps:$4 sm:$0xff]   ;;  %v8567_v42 = vld [vmem:[%s11791_s4 + $0x2f4] ss:$8 sps:$4 sm:$0xff]   ;;  %v8565_v43 = vld [vmem:[%s11791_s4 + $0x2f0] ss:$8 sps:$4 sm:$0xff]  }
 0x17b   :  { %v8570_v44 = vld [vmem:[%s11791_s4 + $0x304] ss:$8 sps:$4 sm:$0xff]   ;;  %v8568_v48 = vld [vmem:[%s11791_s4 + $0x300] ss:$8 sps:$4 sm:$0xff]   ;;  %v999_v49 = vld [vmem:[#allocation3 + $0x38] sm:$0xff]  ;;  %vm3822_vm12 = vcmask 517120  }
 0x17c   :  { %2059 = vmatpush1.bf16.msra.mxu1 %v8502_v50  ;;  %v1009_v47 = vld [vmem:[#allocation3 + $0x88] sm:$0xff]  ;;  %v8573_v50 = vld [vmem:[%s11791_s4 + $0x314] ss:$8 sps:$4 sm:$0xff]   ;;  %v8625_v2 = vld [vmem:[%s11791_s4 + $0x430] ss:$8 sps:$4 sm:$0xff]   ;;  %s9163_s25 = smov 96  }
 0x17d   :  { %2060 = vmatprep.subr.bf16.mxu1 %v8507_v52  ;;  %v1019_v52 = vpack.c.bf16 %v1009_v47, %v999_v49  ;;  %v8576_v39 = vld [vmem:[%s11791_s4 + $0x324] ss:$8 sps:$4 sm:$0xff]   ;;  %v8574_v1 = vld [vmem:[%s11791_s4 + $0x320] ss:$8 sps:$4 sm:$0xff]   ;;  %v8591_v6 = vld [vmem:[%s11791_s4 + $0x374] ss:$8 sps:$4 sm:$0xff]  }
 0x17e   :  { %v8594_v8 = vld [vmem:[%s11791_s4 + $0x384] ss:$8 sps:$4 sm:$0xff]   ;;  %v8627_v40 = vld [vmem:[%s11791_s4 + $0x434] ss:$8 sps:$4 sm:$0xff]   ;;  %v8640_v47 = vld [vmem:[%s11791_s4 + $0x480] ss:$8 sps:$4 sm:$0xff]  }
 0x17f   :  { %v8643_v49 = vld [vmem:[%s11791_s4 + $0x490] ss:$8 sps:$4 sm:$0xff]   ;;  %v8670_v45 = vld [vmem:[%s11792_s5 + $0x348] sm:$0xff]   ;;  %vm4120_vm13 = vcmask 261120   ;;  %vm6134_vm14 = vcmask 523268   ;;  %vm6149_vm15 = vcmask 523267  }
 0x180   :  { %2061 = vmatpush1.bf16.msra.mxu1 %v8505_v53  ;;  %v8664_v53 = vld [vmem:[%s11792_s5 + $0x40] sm:$0xff]   ;;  %v8671_v46 = vld [vmem:[%s11792_s5 + $0x50] sm:$0xff]   ;;  %vm6165_vm1 = vcmask 523266   ;;  %vm6181_vm2 = vcmask 523265   ;;  %vm6184_vm0 = vcmask 520192  }
 0x181   :  { %2062 = vmatprep.subr.bf16.mxu1 %v8510_v55  ;;  %v8665_v55 = vld [vmem:[%s11792_s5] sm:$0xff]   ;;  %7902 = vmatprep.subr.bf16.mxu0 %v8664_v53  ;;  %v8651_v53 = vld [vmem:[%s11791_s4 + $0x4b4] ss:$8 sps:$4 sm:$0xff]  }
 0x182   :  { %7903 = vmatpush3.bf16.msra.mxu0 %v8665_v55  ;;  %v8649_v55 = vld [vmem:[%s11791_s4 + $0x4b0] ss:$8 sps:$4 sm:$0xff]  }
 0x184   :  { %2063 = vmatpush1.bf16.msra.mxu1 %v8508_v56  ;;  %v8571_v56 = vld [vmem:[%s11791_s4 + $0x310] ss:$8 sps:$4 sm:$0xff]  }
 0x185   :  { %2064 = vmatprep.subr.bf16.mxu1 %v8513_v57  ;;  %v8577_v57 = vld [vmem:[%s11791_s4 + $0x330] ss:$8 sps:$4 sm:$0xff]  }
 0x188   :  { %2065 = vmatpush1.bf16.msra.mxu1 %v8511_v59  ;;  %v8582_v59 = vld [vmem:[%s11791_s4 + $0x344] ss:$8 sps:$4 sm:$0xff]  }
 0x189   :  { %2066 = vmatprep.subr.bf16.mxu1 %v8516_v61  ;;  %v8580_v61 = vld [vmem:[%s11791_s4 + $0x340] ss:$8 sps:$4 sm:$0xff]  }
 0x18c   :  { %2067 = vmatpush1.bf16.msra.mxu1 %v8514_v62  ;;  %v8585_v62 = vld [vmem:[%s11791_s4 + $0x354] ss:$8 sps:$4 sm:$0xff]  }
 0x18d   :  { %2068 = vmatprep.subr.bf16.mxu1 %v8519_v63  ;;  %v8583_v63 = vld [vmem:[%s11791_s4 + $0x350] ss:$8 sps:$4 sm:$0xff]  }
 0x190   :  { %2069 = vmatpush1.bf16.msra.mxu1 %v8517_v3  ;;  %v8588_v3 = vld [vmem:[%s11791_s4 + $0x364] ss:$8 sps:$4 sm:$0xff]  }
 0x191   :  { %2081 = vmatprep.subr.bf16.mxu1 %v8522_v5  ;;  %v8586_v5 = vld [vmem:[%s11791_s4 + $0x360] ss:$8 sps:$4 sm:$0xff]  }
 0x193   :  { %2071 = vmatmul.mubr.bf16.vlgmr.msra.gmra.mrb[8].mxu1 %v1014_v12  ;;  %v8534_v12 = vld [vmem:[%s11791_s4 + $0x244] ss:$8 sps:$4 sm:$0xff]  }
 0x194   :  { %2082 = vmatpush1.bf16.msra.mxu1 %v8520_v7  ;;  %2113 = vmatprep.mubr.bf16.mxu1 %v1017_v11  ;;  %v8589_v7 = vld [vmem:[%s11791_s4 + $0x370] ss:$8 sps:$4 sm:$0xff]   ;;  %v8597_v11 = vld [vmem:[%s11791_s4 + $0x394] ss:$8 sps:$4 sm:$0xff]  }
 0x195   :  { %2083 = vmatprep.subr.bf16.mxu1 %v8525_v9  ;;  %v8592_v9 = vld [vmem:[%s11791_s4 + $0x380] ss:$8 sps:$4 sm:$0xff]  }
 0x198   :  { %2084 = vmatpush1.bf16.msra.mxu1 %v8523_v13  ;;  %v8595_v13 = vld [vmem:[%s11791_s4 + $0x390] ss:$8 sps:$4 sm:$0xff]  }
 0x199   :  { %2085 = vmatprep.subr.bf16.mxu1 %v8528_v14  ;;  %v8600_v14 = vld [vmem:[%s11791_s4 + $0x3a4] ss:$8 sps:$4 sm:$0xff]  }
 0x19c   :  { %2086 = vmatpush1.bf16.msra.mxu1 %v8526_v15  ;;  %v8598_v15 = vld [vmem:[%s11791_s4 + $0x3a0] ss:$8 sps:$4 sm:$0xff]  }
 0x19d   :  { %2087 = vmatprep.subr.bf16.mxu1 %v8531_v38  ;;  %v8603_v38 = vld [vmem:[%s11791_s4 + $0x3b4] ss:$8 sps:$4 sm:$0xff]  }
 0x1a0   :  { %2088 = vmatpush1.bf16.msra.mxu1 %v8529_v0  ;;  %v8601_v0 = vld [vmem:[%s11791_s4 + $0x3b0] ss:$8 sps:$4 sm:$0xff]  }
 0x1a1   :  { %2089 = vmatprep.subr.bf16.mxu1 %v8534_v12  ;;  %v8606_v12 = vld [vmem:[%s11791_s4 + $0x3c4] ss:$8 sps:$4 sm:$0xff]  }
 0x1a4   :  { %2090 = vmatpush1.bf16.msra.mxu1 %v8532_v10  ;;  %v8604_v10 = vld [vmem:[%s11791_s4 + $0x3c0] ss:$8 sps:$4 sm:$0xff]  }
 0x1a5   :  { %2091 = vmatprep.subr.bf16.mxu1 %v8537_v19  ;;  %v8609_v19 = vld [vmem:[%s11791_s4 + $0x3d4] ss:$8 sps:$4 sm:$0xff]  }
 0x1a8   :  { %2092 = vmatpush1.bf16.msra.mxu1 %v8535_v20  ;;  %v8607_v20 = vld [vmem:[%s11791_s4 + $0x3d0] ss:$8 sps:$4 sm:$0xff]  }
 0x1a9   :  { %2093 = vmatprep.subr.bf16.mxu1 %v8540_v21  ;;  %v8612_v21 = vld [vmem:[%s11791_s4 + $0x3e4] ss:$8 sps:$4 sm:$0xff]  }
 0x1ac   :  { %2094 = vmatpush1.bf16.msra.mxu1 %v8538_v22  ;;  %v8610_v22 = vld [vmem:[%s11791_s4 + $0x3e0] ss:$8 sps:$4 sm:$0xff]  }
 0x1ad   :  { %2095 = vmatprep.subr.bf16.mxu1 %v8543_v23  ;;  %v8615_v23 = vld [vmem:[%s11791_s4 + $0x3f4] ss:$8 sps:$4 sm:$0xff]  }
 0x1b0   :  { %2096 = vmatpush1.bf16.msra.mxu1 %v8541_v24  ;;  %v8613_v24 = vld [vmem:[%s11791_s4 + $0x3f0] ss:$8 sps:$4 sm:$0xff]  }
 0x1b1   :  { %2097 = vmatprep.subr.bf16.mxu1 %v8546_v25  ;;  %v8618_v25 = vld [vmem:[%s11791_s4 + $0x404] ss:$8 sps:$4 sm:$0xff]  }
 0x1b4   :  { %2098 = vmatpush1.bf16.msra.mxu1 %v8544_v26  ;;  %v1011_v26 = vld [vmem:[#allocation3 + $0x98] sm:$0xff] }
 0x1b5   :  { %2099 = vmatprep.subr.bf16.mxu1 %v8549_v27  ;;  %v8616_v27 = vld [vmem:[%s11791_s4 + $0x400] ss:$8 sps:$4 sm:$0xff]  }
 0x1b8   :  { %2100 = vmatpush1.bf16.msra.mxu1 %v8547_v28  ;;  %v1001_v28 = vld [vmem:[#allocation3 + $0x48] sm:$0xff] }
 0x1b9   :  { %2101 = vmatprep.subr.bf16.mxu1 %v8552_v29  ;;  %v8621_v29 = vld [vmem:[%s11791_s4 + $0x414] ss:$8 sps:$4 sm:$0xff]  }
 0x1bc   :  { %2102 = vmatpush1.bf16.msra.mxu1 %v8550_v30  ;;  %v1021_v30 = vpack.c.bf16 %v1011_v26, %v1001_v28  ;;  %v8691_v26 = vld [vmem:[%s11792_s5 + $0x78] sm:$0xff]  }
 0x1bd   :  { %2103 = vmatprep.subr.bf16.mxu1 %v8555_v31  ;;  %v8619_v31 = vld [vmem:[%s11791_s4 + $0x410] ss:$8 sps:$4 sm:$0xff]  }
 0x1be   :  { %v8693_v28 = vld [vmem:[%s11792_s5 + $0x38] sm:$0xff]  }
 0x1c0   :  { %2104 = vmatpush1.bf16.msra.mxu1 %v8553_v32  ;;  %v8624_v32 = vld [vmem:[%s11791_s4 + $0x424] ss:$8 sps:$4 sm:$0xff]  }
 0x1c1   :  { %2105 = vmatprep.subr.bf16.mxu1 %v8558_v33  ;;  %v8622_v33 = vld [vmem:[%s11791_s4 + $0x420] ss:$8 sps:$4 sm:$0xff]  }
 0x1c4   :  { %2106 = vmatpush1.bf16.msra.mxu1 %v8556_v34  ;;  %v8628_v34 = vld [vmem:[%s11791_s4 + $0x440] ss:$8 sps:$4 sm:$0xff]  }
 0x1c5   :  { %2107 = vmatprep.subr.bf16.mxu1 %v8561_v35  ;;  %v8633_v35 = vld [vmem:[%s11791_s4 + $0x454] ss:$8 sps:$4 sm:$0xff]  }
 0x1c8   :  { %2108 = vmatpush1.bf16.msra.mxu1 %v8559_v36  ;;  %v8631_v36 = vld [vmem:[%s11791_s4 + $0x450] ss:$8 sps:$4 sm:$0xff]  }
 0x1c9   :  { %2109 = vmatprep.subr.bf16.mxu1 %v8564_v37  ;;  %v8636_v37 = vld [vmem:[%s11791_s4 + $0x464] ss:$8 sps:$4 sm:$0xff]  }
 0x1cc   :  { %2110 = vmatpush1.bf16.msra.mxu1 %v8562_v41  ;;  %v8634_v41 = vld [vmem:[%s11791_s4 + $0x460] ss:$8 sps:$4 sm:$0xff]  }
 0x1cd   :  { %2111 = vmatprep.subr.bf16.mxu1 %v8567_v42  ;;  %v8639_v42 = vld [vmem:[%s11791_s4 + $0x474] ss:$8 sps:$4 sm:$0xff]  }
 0x1d0   :  { %2112 = vmatpush1.bf16.msra.mxu1 %v8565_v43  ;;  %v8637_v43 = vld [vmem:[%s11791_s4 + $0x470] ss:$8 sps:$4 sm:$0xff]  }
 0x1d1   :  { %2124 = vmatprep.subr.bf16.mxu1 %v8570_v44  ;;  %v8642_v44 = vld [vmem:[%s11791_s4 + $0x484] ss:$8 sps:$4 sm:$0xff]  }
 0x1d3   :  { %2114 = vmatmul.mubr.bf16.vlgmr.msra.gmra.mrb[8].mxu1 %v1016_v16  ;;  %v8579_v16 = vld [vmem:[%s11791_s4 + $0x334] ss:$8 sps:$4 sm:$0xff]  }
 0x1d4   :  { %2125 = vmatpush1.bf16.msra.mxu1 %v8568_v48  ;;  %2156 = vmatprep.mubr.bf16.mxu1 %v1019_v52  ;;  %v8645_v48 = vld [vmem:[%s11791_s4 + $0x494] ss:$8 sps:$4 sm:$0xff]   ;;  %v8646_v52 = vld [vmem:[%s11791_s4 + $0x4a0] ss:$8 sps:$4 sm:$0xff]  }
 0x1d5   :  { %2126 = vmatprep.subr.bf16.mxu1 %v8573_v50  ;;  %v8648_v50 = vld [vmem:[%s11791_s4 + $0x4a4] ss:$8 sps:$4 sm:$0xff]  }
 0x1d8   :  { %2127 = vmatpush1.bf16.msra.mxu1 %v8571_v56  ;;  %v8654_v56 = vld [vmem:[%s11791_s4 + $0x4c4] ss:$8 sps:$4 sm:$0xff]  }
 0x1d9   :  { %2128 = vmatprep.subr.bf16.mxu1 %v8576_v39  ;;  %v8652_v39 = vld [vmem:[%s11791_s4 + $0x4c0] ss:$8 sps:$4 sm:$0xff]  }
 0x1dc   :  { %2129 = vmatpush1.bf16.msra.mxu1 %v8574_v1  ;;  %v8657_v1 = vld [vmem:[%s11791_s4 + $0x4d4] ss:$8 sps:$4 sm:$0xff]  }
 0x1dd   :  { %2130 = vmatprep.subr.bf16.mxu1 %v8579_v16  ;;  %v8655_v16 = vld [vmem:[%s11791_s4 + $0x4d0] ss:$8 sps:$4 sm:$0xff]  }
 0x1e0   :  { %2131 = vmatpush1.bf16.msra.mxu1 %v8577_v57  ;;  %v8660_v57 = vld [vmem:[%s11791_s4 + $0x4e4] ss:$8 sps:$4 sm:$0xff]  }
 0x1e1   :  { %2132 = vmatprep.subr.bf16.mxu1 %v8582_v59  ;;  %v8658_v59 = vld [vmem:[%s11791_s4 + $0x4e0] ss:$8 sps:$4 sm:$0xff]  }
 0x1e4   :  { %2133 = vmatpush1.bf16.msra.mxu1 %v8580_v61  ;;  %v8663_v61 = vld [vmem:[%s11791_s4 + $0x4f4] ss:$8 sps:$4 sm:$0xff]  }
 0x1e5   :  { %2134 = vmatprep.subr.bf16.mxu1 %v8585_v62  ;;  %v8661_v62 = vld [vmem:[%s11791_s4 + $0x4f0] ss:$8 sps:$4 sm:$0xff]  }
 0x1e8   :  { %2135 = vmatpush1.bf16.msra.mxu1 %v8583_v63  ;;  %v8666_v63 = vld [vmem:[%s11792_s5 + $0x340] sm:$0xff]  }
 0x1e9   :  { %2136 = vmatprep.subr.bf16.mxu1 %v8588_v3  ;;  %v8667_v3 = vld [vmem:[%s11792_s5 + $0x48] sm:$0xff]  }
 0x1ea   :  { %7904 = vmatprep.subr.bf16.mxu0 %v8667_v3 }
 0x1ec   :  { %2137 = vmatpush1.bf16.msra.mxu1 %v8586_v5  ;;  %v8668_v5 = vld [vmem:[%s11792_s5 + $0x300] sm:$0xff]  }
 0x1ed   :  { %2138 = vmatprep.subr.bf16.mxu1 %v8591_v6  ;;  %v8669_v6 = vld [vmem:[%s11792_s5 + $0x8] sm:$0xff]  }
 0x1ee   :  { %7905 = vmatpush3.bf16.msra.mxu0 %v8669_v6 }
 0x1ef   :  { %7906 = vmatprep.subr.bf16.mxu0 %v8671_v46 }
 0x1f0   :  { %2139 = vmatpush1.bf16.msra.mxu1 %v8589_v7  ;;  %v8673_v7 = vld [vmem:[%s11792_s5 + $0x10] sm:$0xff]  }
 0x1f1   :  { %2140 = vmatprep.subr.bf16.mxu1 %v8594_v8  ;;  %v8674_v8 = vld [vmem:[%s11792_s5 + $0x350] sm:$0xff]  }
 0x1f2   :  { %7907 = vmatpush3.bf16.msra.mxu0 %v8673_v7 }
 0x1f4   :  { %2141 = vmatpush1.bf16.msra.mxu1 %v8592_v9  ;;  %v8675_v9 = vld [vmem:[%s11792_s5 + $0x58] sm:$0xff]  }
 0x1f5   :  { %2142 = vmatprep.subr.bf16.mxu1 %v8597_v11  ;;  %v8676_v11 = vld [vmem:[%s11792_s5 + $0x310] sm:$0xff]   ;;  %7908 = vmatprep.subr.bf16.mxu0 %v8675_v9 }
 0x1f8   :  { %2143 = vmatpush1.bf16.msra.mxu1 %v8595_v13  ;;  %v8677_v13 = vld [vmem:[%s11792_s5 + $0x18] sm:$0xff]  }
 0x1f9   :  { %2144 = vmatprep.subr.bf16.mxu1 %v8600_v14  ;;  %7909 = vmatpush3.bf16.msra.mxu0 %v8677_v13  ;;  %v8678_v14 = vld [vmem:[%s11792_s5 + $0x358] sm:$0xff]  }
 0x1fc   :  { %2145 = vmatpush1.bf16.msra.mxu1 %v8598_v15  ;;  %v8679_v15 = vld [vmem:[%s11792_s5 + $0x60] sm:$0xff]  }
 0x1fd   :  { %2146 = vmatprep.subr.bf16.mxu1 %v8603_v38  ;;  %v8680_v38 = vld [vmem:[%s11792_s5 + $0x318] sm:$0xff]   ;;  %7910 = vmatprep.subr.bf16.mxu0 %v8679_v15 }
 0x200   :  { %2147 = vmatpush1.bf16.msra.mxu1 %v8601_v0  ;;  %v8681_v0 = vld [vmem:[%s11792_s5 + $0x20] sm:$0xff]  }
 0x201   :  { %2148 = vmatprep.subr.bf16.mxu1 %v8606_v12  ;;  %v8682_v12 = vld [vmem:[%s11792_s5 + $0x360] sm:$0xff]   ;;  %7911 = vmatpush3.bf16.msra.mxu0 %v8681_v0 }
 0x204   :  { %2149 = vmatpush1.bf16.msra.mxu1 %v8604_v10  ;;  %v8683_v10 = vld [vmem:[%s11792_s5 + $0x68] sm:$0xff]  }
 0x205   :  { %2150 = vmatprep.subr.bf16.mxu1 %v8609_v19  ;;  %v8684_v19 = vld [vmem:[%s11792_s5 + $0x320] sm:$0xff]   ;;  %7912 = vmatprep.subr.bf16.mxu0 %v8683_v10 }
 0x208   :  { %2151 = vmatpush1.bf16.msra.mxu1 %v8607_v20  ;;  %v8685_v20 = vld [vmem:[%s11792_s5 + $0x28] sm:$0xff]  }
 0x209   :  { %2152 = vmatprep.subr.bf16.mxu1 %v8612_v21  ;;  %v8686_v21 = vld [vmem:[%s11792_s5 + $0x368] sm:$0xff]   ;;  %7913 = vmatpush3.bf16.msra.mxu0 %v8685_v20 }
 0x20c   :  { %2153 = vmatpush1.bf16.msra.mxu1 %v8610_v22  ;;  %v8687_v22 = vld [vmem:[%s11792_s5 + $0x70] sm:$0xff]  }
 0x20d   :  { %2154 = vmatprep.subr.bf16.mxu1 %v8615_v23  ;;  %v8688_v23 = vld [vmem:[%s11792_s5 + $0x328] sm:$0xff]   ;;  %7914 = vmatprep.subr.bf16.mxu0 %v8687_v22 }
 0x210   :  { %2155 = vmatpush1.bf16.msra.mxu1 %v8613_v24  ;;  %v8689_v24 = vld [vmem:[%s11792_s5 + $0x30] sm:$0xff]  }
 0x211   :  { %2167 = vmatprep.subr.bf16.mxu1 %v8618_v25  ;;  %v8690_v25 = vld [vmem:[%s11792_s5 + $0x370] sm:$0xff]   ;;  %7915 = vmatpush3.bf16.msra.mxu0 %v8689_v24 }
 0x212   :  { %7916 = vmatprep.subr.bf16.mxu0 %v8691_v26 }
 0x213   :  { %2157 = vmatmul.mubr.bf16.vlgmr.msra.gmra.mrb[8].mxu1 %v1018_v17  ;;  %v8630_v17 = vld [vmem:[%s11791_s4 + $0x444] ss:$8 sps:$4 sm:$0xff]  }
 0x214   :  { %2168 = vmatpush1.bf16.msra.mxu1 %v8616_v27  ;;  %2199 = vmatprep.mubr.bf16.mxu1 %v1021_v30  ;;  %v8692_v27 = vld [vmem:[%s11792_s5 + $0x330] sm:$0xff]   ;;  %v8695_v30 = vld [vmem:[%s11792_s5 + $0xc0] sm:$0xff]  }
 0x215   :  { %2169 = vmatprep.subr.bf16.mxu1 %v8621_v29  ;;  %v8694_v29 = vld [vmem:[%s11792_s5 + $0x378] sm:$0xff]   ;;  %7917 = vmatpush3.bf16.msra.mxu0 %v8693_v28 }
 0x216   :  { %7924 = vmatprep.subr.bf16.mxu0 %v8695_v30 }
 0x218   :  { %2170 = vmatpush1.bf16.msra.mxu1 %v8619_v31  ;;  %v8696_v31 = vld [vmem:[%s11792_s5 + $0x338] sm:$0xff]  }
 0x219   :  { %2171 = vmatprep.subr.bf16.mxu1 %v8624_v32  ;;  %v7326_v32 = vld [vmem:[%s11789_s2 + $0x1] ss:$8 sm:$0x3] }
 0x21c   :  { %2172 = vmatpush1.bf16.msra.mxu1 %v8622_v33  ;;  %v9160_v33 = vmov 1966171168  }
 0x21d   :  { %2173 = vmatprep.subr.bf16.mxu1 %v8627_v40  ;;  %v2218_v40 = vunpack.c.l.s4 %v9160_v33 }
 0x220   :  { %2174 = vmatpush1.bf16.msra.mxu1 %v8625_v2  ;;  %v1188_v2 = vrot.slane %v7326_v32, %v9757_v58 }
 0x221   :  { %2175 = vmatprep.subr.bf16.mxu1 %v8630_v17  ;;  %v1192_v17 = vrot.slane %v7326_v32, %v9760_v60  ;;  %v8697_v32 = vld [vmem:[%s11792_s5 + $0x80] sm:$0xff]  }
 0x224   :  { %2176 = vmatpush1.bf16.msra.mxu1 %v8628_v34 }
 0x225   :  { %2177 = vmatprep.subr.bf16.mxu1 %v8633_v35  ;;  %v2219_v35 = vunpack.c.0.s8 %v2218_v40 }
 0x228   :  { %2178 = vmatpush1.bf16.msra.mxu1 %v8631_v36 }
 0x229   :  { %2179 = vmatprep.subr.bf16.mxu1 %v8636_v37 }
 0x22c   :  { %2180 = vmatpush1.bf16.msra.mxu1 %v8634_v41 }
 0x22d   :  { %2181 = vmatprep.subr.bf16.mxu1 %v8639_v42 }
 0x230   :  { %2182 = vmatpush1.bf16.msra.mxu1 %v8637_v43 }
 0x231   :  { %2183 = vmatprep.subr.bf16.mxu1 %v8642_v44 }
 0x234   :  { %2184 = vmatpush1.bf16.msra.mxu1 %v8640_v47 }
 0x235   :  { %2185 = vmatprep.subr.bf16.mxu1 %v8645_v48 }
 0x238   :  { %2186 = vmatpush1.bf16.msra.mxu1 %v8643_v49  ;;  %v10332_v49 = vsub.s32 %v2219_v35, %v9751_v54 }
 0x239   :  { %2187 = vmatprep.subr.bf16.mxu1 %v8648_v50 }
 0x23c   :  { %2188 = vmatpush1.bf16.msra.mxu1 %v8646_v52 }
 0x23d   :  { %2189 = vmatprep.subr.bf16.mxu1 %v8651_v53 }
 0x240   :  { %2190 = vmatpush1.bf16.msra.mxu1 %v8649_v55 }
 0x241   :  { %2191 = vmatprep.subr.bf16.mxu1 %v8654_v56 }
 0x244   :  { %2192 = vmatpush1.bf16.msra.mxu1 %v8652_v39 }
 0x245   :  { %2193 = vmatprep.subr.bf16.mxu1 %v8657_v1 }
 0x248   :  { %2194 = vmatpush1.bf16.msra.mxu1 %v8655_v16 }
 0x249   :  { %2195 = vmatprep.subr.bf16.mxu1 %v8660_v57 }
 0x24c   :  { %2196 = vmatpush1.bf16.msra.mxu1 %v8658_v59 }
 0x24d   :  { %2197 = vmatprep.subr.bf16.mxu1 %v8663_v61 }
 0x250   :  { %2198 = vmatpush1.bf16.msra.mxu1 %v8661_v62 }
 0x251   :  { %8034 = vmatprep.subr.bf16.mxu1 %v8666_v63 }
 0x253   :  { %2200 = vmatmul.mubr.bf16.vlgmr.msra.gmra.mrb[8].mxu1 %v1020_v18  ;;  %v8672_v18 = vld [vmem:[%s11792_s5 + $0x308] sm:$0xff]  }
 0x254   :  { %8035 = vmatpush3.bf16.msra.mxu1 %v8668_v5 }
 0x255   :  { %8036 = vmatprep.subr.bf16.mxu1 %v8670_v45  ;;  %v9161_v45 = vmov 1983009808  }
 0x256   :  { %v2379_v46 = vunpack.c.l.s4 %v9161_v45 }
 0x258   :  { %8037 = vmatpush3.bf16.msra.mxu1 %v8672_v18  ;;  %v2380_v22 = vunpack.c.0.s8 %v2379_v46  ;;  %v8716_v46 = vld [vmem:[%s11792_s5 + $0x108] sm:$0xff]  }
 0x259   :  { %8038 = vmatprep.subr.bf16.mxu1 %v8674_v8 }
 0x25c   :  { %8039 = vmatpush3.bf16.msra.mxu1 %v8676_v11 }
 0x25d   :  { %8040 = vmatprep.subr.bf16.mxu1 %v8678_v14 }
 0x260   :  { %8041 = vmatpush3.bf16.msra.mxu1 %v8680_v38 }
 0x261   :  { %8042 = vmatprep.subr.bf16.mxu1 %v8682_v12 }
 0x264   :  { %8043 = vmatpush3.bf16.msra.mxu1 %v8684_v19 }
 0x265   :  { %8044 = vmatprep.subr.bf16.mxu1 %v8686_v21 }
 0x268   :  { %8045 = vmatpush3.bf16.msra.mxu1 %v8688_v23  ;;  %v10384_v23 = vsub.s32 %v2380_v22, %v9751_v54  ;;  %v8730_v22 = vld [vmem:[%s11792_s5 + $0x180] sm:$0xff]  }
 0x269   :  { %8046 = vmatprep.subr.bf16.mxu1 %v8690_v25 }
 0x26c   :  { %8047 = vmatpush3.bf16.msra.mxu1 %v8692_v27 }
 0x26d   :  { %8048 = vmatprep.subr.bf16.mxu1 %v8694_v29 }
 0x270   :  { %8049 = vmatpush3.bf16.msra.mxu1 %v8696_v31 }
 0x326   :  { %v2201_v34 = vpop.f32.mrb[8].mxu1 }
 0x327   :  { %v8230_v36 = vadd.f32 %v2201_v34, %v1188_v2  ;;  %v2203_v37 = vpop.f32.mrb[9].mxu1 }
 0x328   :  { %v8231_v41 = vadd.f32 %v2203_v37, %v1192_v17  ;;  %v2205_v42 = vpop.f32.mrb[10].mxu1 }
 0x329   :  { %v2210_v43 = vmax.f32 %v8230_v36, 0.0  ;;  %v8232_v44 = vadd.f32 %v2205_v42, %v1188_v2  ;;  %v2207_v47 = vpop.f32.mrb[11].mxu1  ;;  %v8701_v42 = vld [vmem:[%s11792_s5 + $0xd0] sm:$0xff]  }
 0x32a   :  { %v2211_v48 = vmax.f32 %v8231_v41, 0.0  ;;  %v8233_v50 = vadd.f32 %v2207_v47, %v1192_v17  ;;  %v8699_v17 = vld [vmem:[%s11792_s5 + $0xc8] sm:$0xff]   ;;  %v8703_v47 = vld [vmem:[%s11792_s5 + $0xd8] sm:$0xff]  }
 0x32b   :  { %v2212_v52 = vmax.f32 %v8232_v44, 0.0  ;;  %v8700_v41 = vld [vmem:[%s11792_s5 + $0x88] sm:$0xff]   ;;  %v8702_v44 = vld [vmem:[%s11792_s5 + $0x90] sm:$0xff]  }
 0x32c   :  { %v2216_v53 = vcombine.low %v2210_v43, %v2211_v48  ;;  %v2256_v55 = vcombine.high %v2210_v43, %v2211_v48  ;;  %v2213_v56 = vmax.f32 %v8233_v50, 0.0  ;;  %v8704_v48 = vld [vmem:[%s11792_s5 + $0x98] sm:$0xff]   ;;  %v8705_v50 = vld [vmem:[%s11792_s5 + $0xe0] sm:$0xff]  }
 0x32e   :  { %v2223_v39 = vrot.slane %v2216_v53, %v10332_v49  ;;  %v2263_v1 = vrot.slane %v2256_v55, %v10332_v49  ;;  %v2295_v16 = vcombine.low %v2212_v52, %v2213_v56  ;;  %v2332_v57 = vcombine.high %v2212_v52, %v2213_v56  ;;  %v8706_v52 = vld [vmem:[%s11792_s5 + $0xa0] sm:$0xff]   ;;  %v8707_v53 = vld [vmem:[%s11792_s5 + $0xe8] sm:$0xff]   ;;  %v8709_v56 = vld [vmem:[%s11792_s5 + $0xf0] sm:$0xff]  }
 0x32f   :  { %v8708_v55 = vld [vmem:[%s11792_s5 + $0xa8] sm:$0xff]  }
 0x330   :  { %v2230_v61 = vrot.slane %v2223_v39, %v10332_v49  ;;  %v2237_v62 = vcombine.high %v2223_v39, %v2223_v39  ;;  %v2270_v63 = vrot.slane %v2263_v1, %v10332_v49  ;;  %v2274_v3 = vcombine.high %v2263_v1, %v2263_v1  ;;  %v8710_v1 = vld [vmem:[%s11792_s5 + $0xb0] sm:$0xff]  }
 0x331   :  { %v2302_v5 = vrot.slane %v2295_v16, %v10332_v49  ;;  %v2339_v6 = vrot.slane %v2332_v57, %v10332_v49  ;;  %v8711_v16 = vld [vmem:[%s11792_s5 + $0xf8] sm:$0xff]  }
 0x332   :  { %2236 = vst.msk [vmem:[#allocation4] ss:$2 sm:$0x3] %vm10337_vm11, %v2230_v61  ;;  %v2244_v51 = vrot.slane %v2237_v62, %v10332_v49  ;;  %v2248_v18 = vcombine.high %v2230_v61, %v2230_v61  ;;  %2273 = vst.msk [vmem:[#allocation4 + $0x10] ss:$2 sm:$0x3] %vm10337_vm11, %v2270_v63  ;;  %v2281_v7 = vrot.slane %v2274_v3, %v10332_v49 }
 0x333   :  { %v2285_v8 = vcombine.high %v2270_v63, %v2270_v63  ;;  %v2309_v9 = vrot.slane %v2302_v5, %v10332_v49  ;;  %v2313_v11 = vcombine.high %v2302_v5, %v2302_v5  ;;  %v2346_v13 = vrot.slane %v2339_v6, %v10332_v49  ;;  %v8712_v61 = vld [vmem:[%s11792_s5 + $0xb8] sm:$0xff]   ;;  %v8713_v62 = vld [vmem:[%s11792_s5 + $0x140] sm:$0xff]  }
 0x334   :  { %v2350_v14 = vcombine.high %v2339_v6, %v2339_v6  ;;  %2247 = vst.msk [vmem:[#allocation4 + $0x4] ss:$2 sm:$0x3] %vm10337_vm11, %v2244_v51  ;;  %2251 = vst.msk [vmem:[#allocation4 + $0x8] ss:$2 sm:$0x3] %vm10337_vm11, %v2248_v18  ;;  %v2252_v15 = vcombine.high %v2244_v51, %v2244_v51  ;;  %v2289_v38 = vcombine.high %v2281_v7, %v2281_v7 }
 0x335   :  { %2284 = vst.msk [vmem:[#allocation4 + $0x14] ss:$2 sm:$0x3] %vm10337_vm11, %v2281_v7  ;;  %2288 = vst.msk [vmem:[#allocation4 + $0x18] ss:$2 sm:$0x3] %vm10337_vm11, %v2285_v8  ;;  %v2320_v0 = vrot.slane %v2313_v11, %v10332_v49  ;;  %v2324_v12 = vcombine.high %v2309_v9, %v2309_v9  ;;  %v2361_v19 = vcombine.high %v2346_v13, %v2346_v13 }
 0x336   :  { %2312 = vst.msk [vmem:[#allocation4 + $0x1] ss:$2 sm:$0x3] %vm10337_vm11, %v2309_v9  ;;  %2349 = vst.msk [vmem:[#allocation4 + $0x11] ss:$2 sm:$0x3] %vm10337_vm11, %v2346_v13  ;;  %v2357_v10 = vrot.slane %v2350_v14, %v10332_v49 }
 0x337   :  { %2255 = vst.msk [vmem:[#allocation4 + $0xc] ss:$2 sm:$0x3] %vm10337_vm11, %v2252_v15  ;;  %2292 = vst.msk [vmem:[#allocation4 + $0x1c] ss:$2 sm:$0x3] %vm10337_vm11, %v2289_v38  ;;  %v2328_v20 = vcombine.high %v2320_v0, %v2320_v0 }
 0x338   :  { %2323 = vst.msk [vmem:[#allocation4 + $0x5] ss:$2 sm:$0x3] %vm10337_vm11, %v2320_v0  ;;  %2327 = vst.msk [vmem:[#allocation4 + $0x9] ss:$2 sm:$0x3] %vm10337_vm11, %v2324_v12  ;;  %v2365_v21 = vcombine.high %v2357_v10, %v2357_v10 }
 0x339   :  { %2360 = vst.msk [vmem:[#allocation4 + $0x15] ss:$2 sm:$0x3] %vm10337_vm11, %v2357_v10  ;;  %2364 = vst.msk [vmem:[#allocation4 + $0x19] ss:$2 sm:$0x3] %vm10337_vm11, %v2361_v19 }
 0x33a   :  { %2331 = vst.msk [vmem:[#allocation4 + $0xd] ss:$2 sm:$0x3] %vm10337_vm11, %v2328_v20  ;;  %2368 = vst.msk [vmem:[#allocation4 + $0x1d] ss:$2 sm:$0x3] %vm10337_vm11, %v2365_v21 }
 0x33b   :  { %v8714_v3 = vld [vmem:[%s11792_s5 + $0x100] sm:$0xff]   ;;  %v8715_v6 = vld [vmem:[%s11792_s5 + $0x148] sm:$0xff]   ;;  %v8717_v51 = vld [vmem:[%s11792_s5 + $0x150] sm:$0xff]  }
 0x33c   :  { %v8718_v18 = vld [vmem:[%s11792_s5 + $0x110] sm:$0xff]   ;;  %v8719_v7 = vld [vmem:[%s11792_s5 + $0x158] sm:$0xff]   ;;  %v8721_v9 = vld [vmem:[%s11792_s5 + $0x160] sm:$0xff]  }
 0x33d   :  { %v8720_v8 = vld [vmem:[%s11792_s5 + $0x118] sm:$0xff]   ;;  %v8722_v11 = vld [vmem:[%s11792_s5 + $0x120] sm:$0xff]   ;;  %v8723_v13 = vld [vmem:[%s11792_s5 + $0x168] sm:$0xff]  }
 0x33e   :  { %v8724_v14 = vld [vmem:[%s11792_s5 + $0x128] sm:$0xff]   ;;  %v8725_v15 = vld [vmem:[%s11792_s5 + $0x170] sm:$0xff]   ;;  %v8727_v12 = vld [vmem:[%s11792_s5 + $0x178] sm:$0xff]  }
 0x33f   :  { %v2369_v24 = vld [vmem:[#allocation4] sm:$0xff]  ;;  %v8726_v0 = vld [vmem:[%s11792_s5 + $0x130] sm:$0xff]   ;;  %v8729_v20 = vld [vmem:[%s11792_s5 + $0x1c0] sm:$0xff]  }
 0x340   :  { %v2384_v25 = vrot.slane %v2369_v24, %v10384_v23  ;;  %v2377_v26 = vcombine.high %v2369_v24, %v2369_v24  ;;  %v8728_v19 = vld [vmem:[%s11792_s5 + $0x138] sm:$0xff]  }
 0x341   :  { %v2372_v27 = vld [vmem:[#allocation4 + $0x18] sm:$0xff]  ;;  %v2370_v39 = vld [vmem:[#allocation4 + $0x8] sm:$0xff] }
 0x342   :  { %v2392_v28 = vcombine.high %v2384_v25, %v2384_v25  ;;  %v2391_v29 = vrot.slane %v2377_v26, %v10384_v23  ;;  %v2435_v30 = vrot.slane %v2372_v27, %v10384_v23  ;;  %v2461_v2 = vpack.c.bf16 %v2384_v25, %v2384_v25  ;;  %v8732_v25 = vld [vmem:[%s11792_s5 + $0x1c8] sm:$0xff]  }
 0x343   :  { %v2428_v36 = vcombine.high %v2372_v27, %v2372_v27  ;;  %v2401_v57 = vrot.slane %v2370_v39, %v10384_v23  ;;  %v2394_v38 = vcombine.high %v2370_v39, %v2370_v39  ;;  %v8733_v27 = vld [vmem:[%s11792_s5 + $0x188] sm:$0xff]   ;;  %v8752_v39 = vld [vmem:[%s11792_s5 + $0x258] sm:$0xff]  }
 0x344   :  { %v2462_v31 = vpack.c.bf16 %v2392_v28, %v2392_v28  ;;  %v2393_v33 = vcombine.high %v2391_v29, %v2391_v29  ;;  %v2443_v40 = vcombine.high %v2435_v30, %v2435_v30  ;;  %v2473_v37 = vpack.c.bf16 %v2435_v30, %v2435_v30  ;;  %v8734_v28 = vld [vmem:[%s11792_s5 + $0x1d0] sm:$0xff]   ;;  %v8736_v30 = vld [vmem:[%s11792_s5 + $0x1d8] sm:$0xff]  }
 0x345   :  { %v10402_v43 = vrot.slane %v2428_v36, %v10384_v23  ;;  %v2409_v63 = vcombine.high %v2401_v57, %v2401_v57  ;;  %v2463_v5 = vpack.c.bf16 %v2391_v29, %v2391_v29  ;;  %v2408_v10 = vrot.slane %v2394_v38, %v10384_v23  ;;  %v8735_v29 = vld [vmem:[%s11792_s5 + $0x190] sm:$0xff]   ;;  %v8744_v36 = vld [vmem:[%s11792_s5 + $0x1f8] sm:$0xff]  }
 0x346   :  { %3534 = vmatprep.mubr.bf16.mxu0 %v2462_v31  ;;  %v2464_v34 = vpack.c.bf16 %v2393_v33, %v2393_v33  ;;  %v2474_v35 = vpack.c.bf16 %v2443_v40, %v2443_v40  ;;  %v2465_v24 = vpack.c.bf16 %v2401_v57, %v2401_v57  ;;  %v8737_v31 = vld [vmem:[%s11792_s5 + $0x198] sm:$0xff]   ;;  %v8739_v33 = vld [vmem:[%s11792_s5 + $0x1a0] sm:$0xff]   ;;  %v8740_v40 = vld [vmem:[%s11792_s5 + $0x1e8] sm:$0xff]  }
 0x347   :  { %3535 = vmatmul.mubr.bf16.vlgmr.msra.gmra.mrb[8].mxu0 %v2461_v2  ;;  %v2466_v45 = vpack.c.bf16 %v2409_v63, %v2409_v63  ;;  %v2410_v21 = vcombine.high %v2408_v10, %v2408_v10  ;;  %v8741_v2 = vld [vmem:[%s11792_s5 + $0x1a8] sm:$0xff]   ;;  %v8755_v57 = vld [vmem:[%s11792_s5 + $0x220] sm:$0xff]   ;;  %v8758_v63 = vld [vmem:[%s11792_s5 + $0x270] sm:$0xff]  }
 0x348   :  { %7925 = vmatpush3.bf16.msra.mxu0 %v8697_v32  ;;  %3574 = vmatprep.mubr.bf16.mxu0 %v2464_v34  ;;  %v8738_v32 = vld [vmem:[%s11792_s5 + $0x1e0] sm:$0xff]   ;;  %v2371_v34 = vld [vmem:[#allocation4 + $0x10] sm:$0xff]  ;;  %v8770_v38 = vld [vmem:[%s11792_s5 + $0x298] sm:$0xff]  }
 0x349   :  { %3774 = vmatprep.mubr.bf16.mxu1 %v2474_v35  ;;  %7926 = vmatprep.subr.bf16.mxu0 %v8699_v17  ;;  %v2468_v26 = vpack.c.bf16 %v2410_v21, %v2410_v21  ;;  %v8742_v17 = vld [vmem:[%s11792_s5 + $0x1f0] sm:$0xff]  }
 0x34a   :  { %3775 = vmatmul.mubr.bf16.vlgmr.msra.gmra.mrb[12].mxu1 %v2473_v37  ;;  %v8743_v35 = vld [vmem:[%s11792_s5 + $0x1b0] sm:$0xff]   ;;  %v2418_v37 = vrot.slane %v2371_v34, %v10384_v23 }
 0x34b   :  { %4156 = vmatprep.mubr.bf16.mxu1 %v9159_v4  ;;  %v8776_v21 = vld [vmem:[%s11792_s5 + $0x2b0] sm:$0xff]  }
 0x34c   :  { %7927 = vmatpush3.bf16.msra.mxu0 %v8700_v41  ;;  %v8745_v41 = vld [vmem:[%s11792_s5 + $0x1b8] sm:$0xff]  }
 0x34d   :  { %7928 = vmatprep.subr.bf16.mxu0 %v8701_v42  ;;  %v8746_v42 = vld [vmem:[%s11792_s5 + $0x240] sm:$0xff]  }
 0x350   :  { %7929 = vmatpush3.bf16.msra.mxu0 %v8702_v44  ;;  %v2426_v44 = vcombine.high %v2418_v37, %v2418_v37 }
 0x351   :  { %7930 = vmatprep.subr.bf16.mxu0 %v8703_v47  ;;  %v8747_v47 = vld [vmem:[%s11792_s5 + $0x200] sm:$0xff]  }
 0x354   :  { %7931 = vmatpush3.bf16.msra.mxu0 %v8704_v48  ;;  %v2467_v48 = vpack.c.bf16 %v2408_v10, %v2408_v10  ;;  %v8773_v10 = vld [vmem:[%s11792_s5 + $0x2e8] sm:$0xff]  }
 0x355   :  { %7932 = vmatprep.subr.bf16.mxu0 %v8705_v50  ;;  %v8748_v50 = vld [vmem:[%s11792_s5 + $0x248] sm:$0xff]  }
 0x358   :  { %7933 = vmatpush3.bf16.msra.mxu0 %v8706_v52  ;;  %v2470_v52 = vpack.c.bf16 %v2426_v44, %v2426_v44  ;;  %v3827_v44 = vld [vmem:[%s11788_s1] sm:$0x3] }
 0x359   :  { %7934 = vmatprep.subr.bf16.mxu0 %v8707_v53  ;;  %v8749_v53 = vld [vmem:[%s11792_s5 + $0x208] sm:$0xff]   ;;  %3829 = vrot.lane.b32.xlu0 %v3827_v44, %s9162_s11 }
 0x35c   :  { %7935 = vmatpush3.bf16.msra.mxu0 %v8708_v55  ;;  %v8750_v55 = vld [vmem:[%s11792_s5 + $0x250] sm:$0xff]  }
 0x35d   :  { %7936 = vmatprep.subr.bf16.mxu0 %v8709_v56  ;;  %v8751_v56 = vld [vmem:[%s11792_s5 + $0x210] sm:$0xff]  }
 0x360   :  { %7937 = vmatpush3.bf16.msra.mxu0 %v8710_v1  ;;  %v8753_v1 = vld [vmem:[%s11792_s5 + $0x218] sm:$0xff]  }
 0x361   :  { %7938 = vmatprep.subr.bf16.mxu0 %v8711_v16  ;;  %v8754_v16 = vld [vmem:[%s11792_s5 + $0x260] sm:$0xff]  }
 0x364   :  { %7939 = vmatpush3.bf16.msra.mxu0 %v8712_v61  ;;  %v8756_v61 = vld [vmem:[%s11792_s5 + $0x268] sm:$0xff]  }
 0x365   :  { %7946 = vmatprep.subr.bf16.mxu0 %v8713_v62  ;;  %v8757_v62 = vld [vmem:[%s11792_s5 + $0x228] sm:$0xff]  }
 0x367   :  { %3575 = vmatmul.mubr.bf16.vlgmr.msra.gmra.mrb[12].mxu0 %v2463_v5  ;;  %v8759_v5 = vld [vmem:[%s11792_s5 + $0x230] sm:$0xff]  }
 0x368   :  { %7947 = vmatpush3.bf16.msra.mxu0 %v8714_v3  ;;  %3614 = vmatprep.mubr.bf16.mxu0 %v2466_v45  ;;  %v2411_v3 = vcombine.high %v2371_v34, %v2371_v34  ;;  %v8789_v34 = vld [vmem:[%s11792_s5 + $0x3a0] sm:$0xff]  }
 0x369   :  { %7948 = vmatprep.subr.bf16.mxu0 %v8715_v6  ;;  %v8760_v6 = vld [vmem:[%s11792_s5 + $0x278] sm:$0xff]  }
 0x36a   :  { %v2425_v45 = vrot.slane %v2411_v3, %v10384_v23  ;;  %v8765_v23 = vld [vmem:[%s11792_s5 + $0x2c8] sm:$0xff]  }
 0x36c   :  { %7949 = vmatpush3.bf16.msra.mxu0 %v8716_v46  ;;  %v8761_v46 = vld [vmem:[%s11792_s5 + $0x238] sm:$0xff]  }
 0x36d   :  { %7950 = vmatprep.subr.bf16.mxu0 %v8717_v51  ;;  %v8762_v51 = vld [vmem:[%s11792_s5 + $0x2c0] sm:$0xff]  }
 0x370   :  { %7951 = vmatpush3.bf16.msra.mxu0 %v8718_v18  ;;  %v2427_v18 = vcombine.high %v2425_v45, %v2425_v45 }
 0x371   :  { %7952 = vmatprep.subr.bf16.mxu0 %v8719_v7  ;;  %v8763_v7 = vld [vmem:[%s11792_s5 + $0x280] sm:$0xff]  }
 0x374   :  { %7953 = vmatpush3.bf16.msra.mxu0 %v8720_v8  ;;  %v2469_v8 = vpack.c.bf16 %v2418_v37, %v2418_v37  ;;  %v8792_v37 = vld [vmem:[%s11792_s5 + $0x3f0] sm:$0xff]  }
 0x375   :  { %7954 = vmatprep.subr.bf16.mxu0 %v8721_v9  ;;  %v2472_v9 = vpack.c.bf16 %v2427_v18, %v2427_v18 }
 0x378   :  { %7955 = vmatpush3.bf16.msra.mxu0 %v8722_v11  ;;  %v8766_v11 = vld [vmem:[%s11792_s5 + $0x288] sm:$0xff]  }
 0x379   :  { %7956 = vmatprep.subr.bf16.mxu0 %v8723_v13  ;;  %v8767_v13 = vld [vmem:[%s11792_s5 + $0x2d0] sm:$0xff]  }
 0x37c   :  { %7957 = vmatpush3.bf16.msra.mxu0 %v8724_v14  ;;  %v8768_v14 = vld [vmem:[%s11792_s5 + $0x290] sm:$0xff]  }
 0x37d   :  { %7958 = vmatprep.subr.bf16.mxu0 %v8725_v15  ;;  %v8769_v15 = vld [vmem:[%s11792_s5 + $0x2d8] sm:$0xff]  }
 0x380   :  { %7959 = vmatpush3.bf16.msra.mxu0 %v8726_v0  ;;  %v8771_v0 = vld [vmem:[%s11792_s5 + $0x2e0] sm:$0xff]  }
 0x381   :  { %7960 = vmatprep.subr.bf16.mxu0 %v8727_v12  ;;  %v8772_v12 = vld [vmem:[%s11792_s5 + $0x2a0] sm:$0xff]  }
 0x384   :  { %7961 = vmatpush3.bf16.msra.mxu0 %v8728_v19  ;;  %v8774_v19 = vld [vmem:[%s11792_s5 + $0x2a8] sm:$0xff]  }
 0x385   :  { %7968 = vmatprep.subr.bf16.mxu0 %v8729_v20  ;;  %v8775_v20 = vld [vmem:[%s11792_s5 + $0x2f0] sm:$0xff]  }
 0x387   :  { %3615 = vmatmul.mubr.bf16.vlgmr.msra.gmra.mrb[16].mxu0 %v2465_v24  ;;  %v8778_v24 = vld [vmem:[%s11792_s5 + $0x2b8] sm:$0xff]  }
 0x388   :  { %7969 = vmatpush3.bf16.msra.mxu0 %v8730_v22  ;;  %3654 = vmatprep.mubr.bf16.mxu0 %v2468_v26  ;;  %v8777_v22 = vld [vmem:[%s11792_s5 + $0x2f8] sm:$0xff]   ;;  %v2444_v26 = vcombine.high %v10402_v43, %v10402_v43 }
 0x389   :  { %7970 = vmatprep.subr.bf16.mxu0 %v8732_v25  ;;  %v8779_v25 = vld [vmem:[%s11792_s5 + $0x3c0] sm:$0xff]  }
 0x38c   :  { %7971 = vmatpush3.bf16.msra.mxu0 %v8733_v27  ;;  %v8780_v27 = vld [vmem:[%s11792_s5 + $0x380] sm:$0xff]  }
 0x38d   :  { %7972 = vmatprep.subr.bf16.mxu0 %v8734_v28  ;;  %v2471_v28 = vpack.c.bf16 %v2425_v45, %v2425_v45 }
 0x390   :  { %7973 = vmatpush3.bf16.msra.mxu0 %v8735_v29  ;;  %v8782_v29 = vld [vmem:[%s11792_s5 + $0x3c8] sm:$0xff]  }
 0x391   :  { %7974 = vmatprep.subr.bf16.mxu0 %v8736_v30  ;;  %v2476_v30 = vpack.c.bf16 %v2444_v26, %v2444_v26 }
 0x394   :  { %7975 = vmatpush3.bf16.msra.mxu0 %v8737_v31  ;;  %v8783_v31 = vld [vmem:[%s11792_s5 + $0x388] sm:$0xff]  }
 0x395   :  { %7976 = vmatprep.subr.bf16.mxu0 %v8738_v32  ;;  %v8784_v32 = vld [vmem:[%s11792_s5 + $0x3d0] sm:$0xff]  }
 0x398   :  { %7977 = vmatpush3.bf16.msra.mxu0 %v8739_v33  ;;  %v8785_v33 = vld [vmem:[%s11792_s5 + $0x390] sm:$0xff]  }
 0x399   :  { %7978 = vmatprep.subr.bf16.mxu0 %v8740_v40  ;;  %v8786_v40 = vld [vmem:[%s11792_s5 + $0x3d8] sm:$0xff]  }
 0x39c   :  { %7979 = vmatpush3.bf16.msra.mxu0 %v8741_v2  ;;  %v8787_v2 = vld [vmem:[%s11792_s5 + $0x398] sm:$0xff]  }
 0x39d   :  { %7980 = vmatprep.subr.bf16.mxu0 %v8742_v17  ;;  %v8788_v17 = vld [vmem:[%s11792_s5 + $0x3e0] sm:$0xff]  }
 0x3a0   :  { %7981 = vmatpush3.bf16.msra.mxu0 %v8743_v35  ;;  %v8790_v35 = vld [vmem:[%s11792_s5 + $0x3e8] sm:$0xff]  }
 0x3a1   :  { %7982 = vmatprep.subr.bf16.mxu0 %v8744_v36  ;;  %v8791_v36 = vld [vmem:[%s11792_s5 + $0x3a8] sm:$0xff]  }
 0x3a4   :  { %7983 = vmatpush3.bf16.msra.mxu0 %v8745_v41  ;;  %v8793_v41 = vld [vmem:[%s11792_s5 + $0x3b0] sm:$0xff]  }
 0x3a5   :  { %7990 = vmatprep.subr.bf16.mxu0 %v8746_v42  ;;  %v8794_v42 = vld [vmem:[%s11792_s5 + $0x3f8] sm:$0xff]  }
 0x3a7   :  { %3655 = vmatmul.mubr.bf16.vlgmr.msra.gmra.mrb[20].mxu0 %v2467_v48  ;;  %v2475_v48 = vpack.c.bf16 %v10402_v43, %v10402_v43 }
 0x3a8   :  { %7991 = vmatpush3.bf16.msra.mxu0 %v8747_v47  ;;  %3694 = vmatprep.mubr.bf16.mxu0 %v2470_v52  ;;  %v8795_v47 = vld [vmem:[%s11792_s5 + $0x3b8] sm:$0xff]  }
 0x3a9   :  { %7992 = vmatprep.subr.bf16.mxu0 %v8748_v50 }
 0x3ac   :  { %7993 = vmatpush3.bf16.msra.mxu0 %v8749_v53 }
 0x3ad   :  { %7994 = vmatprep.subr.bf16.mxu0 %v8750_v55 }
 0x3b0   :  { %7995 = vmatpush3.bf16.msra.mxu0 %v8751_v56 }
 0x3b1   :  { %7996 = vmatprep.subr.bf16.mxu0 %v8752_v39 }
 0x3b4   :  { %7997 = vmatpush3.bf16.msra.mxu0 %v8753_v1 }
 0x3b5   :  { %7998 = vmatprep.subr.bf16.mxu0 %v8754_v16 }
 0x3b8   :  { %7999 = vmatpush3.bf16.msra.mxu0 %v8755_v57 }
 0x3b9   :  { %8000 = vmatprep.subr.bf16.mxu0 %v8756_v61 }
 0x3bc   :  { %8001 = vmatpush3.bf16.msra.mxu0 %v8757_v62  ;;  %v2733_v62 = vld [vmem:[%s11789_s2 + $0x4] ss:$0 sm:$0xff] }
 0x3bd   :  { %8002 = vmatprep.subr.bf16.mxu0 %v8758_v63 }
 0x3c0   :  { %8003 = vmatpush3.bf16.msra.mxu0 %v8759_v5 }
 0x3c1   :  { %8004 = vmatprep.subr.bf16.mxu0 %v8760_v6 }
 0x3c4   :  { %8005 = vmatpush3.bf16.msra.mxu0 %v8761_v46 }
 0x3c5   :  { %8012 = vmatprep.subr.bf16.mxu0 %v8762_v51 }
 0x3c7   :  { %3695 = vmatmul.mubr.bf16.vlgmr.msra.gmra.mrb[24].mxu0 %v2469_v8 }
 0x3c8   :  { %8013 = vmatpush3.bf16.msra.mxu0 %v8763_v7  ;;  %3734 = vmatprep.mubr.bf16.mxu0 %v2472_v9 }
 0x3c9   :  { %8014 = vmatprep.subr.bf16.mxu0 %v8765_v23 }
 0x3cc   :  { %8015 = vmatpush3.bf16.msra.mxu0 %v8766_v11  ;;  %v3839_v11 = vld [vmem:[%s11793_s6] sm:$0xff] }
 0x3cd   :  { %8016 = vmatprep.subr.bf16.mxu0 %v8767_v13  ;;  %v3847_v13 = vld [vmem:[%s11793_s6 + $0x40] sm:$0xff] }
 0x3d0   :  { %8017 = vmatpush3.bf16.msra.mxu0 %v8768_v14  ;;  %v3855_v14 = vld [vmem:[%s11793_s6 + $0x80] sm:$0xff] }
 0x3d1   :  { %8018 = vmatprep.subr.bf16.mxu0 %v8769_v15  ;;  %v7617_v15 = vcombine.low %v3839_v11, %v3847_v13 }
 0x3d4   :  { %8019 = vmatpush3.bf16.msra.mxu0 %v8770_v38  ;;  %v7618_v38 = vcombine.high %v3839_v11, %v3847_v13 }
 0x3d5   :  { %8020 = vmatprep.subr.bf16.mxu0 %v8771_v0  ;;  %v3863_v0 = vld [vmem:[%s11793_s6 + $0xc0] sm:$0xff] }
 0x3d6   :  { %4124 = vmatprep.subr.bf16.mxu1 %v7618_v38 }
 0x3d7   :  { %4125 = vmatpush1.bf16.msra.mxu1 %v7617_v15  ;;  %v3866_v15 = vld [vmem:[%s11793_s6 + $0xd8] sm:$0xff] }
 0x3d8   :  { %8021 = vmatpush3.bf16.msra.mxu0 %v8772_v12  ;;  %v7634_v12 = vcombine.high %v3855_v14, %v3863_v0 }
 0x3d9   :  { %8022 = vmatprep.subr.bf16.mxu0 %v8773_v10  ;;  %v7633_v10 = vcombine.low %v3855_v14, %v3863_v0  ;;  %v3858_v14 = vld [vmem:[%s11793_s6 + $0x98] sm:$0xff] }
 0x3da   :  { %4126 = vmatprep.subr.bf16.mxu1 %v7634_v12  ;;  %v7640_v0 = vcombine.high %v3858_v14, %v3866_v15  ;;  %v3843_v12 = vld [vmem:[%s11793_s6 + $0x20] sm:$0xff] }
 0x3db   :  { %4127 = vmatpush1.bf16.msra.mxu1 %v7633_v10  ;;  %v3851_v10 = vld [vmem:[%s11793_s6 + $0x60] sm:$0xff] }
 0x3dc   :  { %8023 = vmatpush3.bf16.msra.mxu0 %v8774_v19 }
 0x3dd   :  { %8024 = vmatprep.subr.bf16.mxu0 %v8775_v20 }
 0x3e0   :  { %8025 = vmatpush3.bf16.msra.mxu0 %v8776_v21 }
 0x3e1   :  { %8026 = vmatprep.subr.bf16.mxu0 %v8777_v22 }
 0x3e4   :  { %8027 = vmatpush3.bf16.msra.mxu0 %v8778_v24 }
 0x3e5   :  { %8056 = vmatprep.subr.bf16.mxu0 %v8779_v25 }
 0x3e7   :  { %3735 = vmatmul.mubr.bf16.vlgmr.msra.gmra.mrb[28].mxu0 %v2471_v28 }
 0x3e8   :  { %8057 = vmatpush3.bf16.msra.mxu0 %v8780_v27  ;;  %3814 = vmatprep.mubr.bf16.mxu0 %v2476_v30 }
 0x3e9   :  { %8058 = vmatprep.subr.bf16.mxu0 %v8782_v29 }
 0x3ec   :  { %8059 = vmatpush3.bf16.msra.mxu0 %v8783_v31 }
 0x3ed   :  { %8060 = vmatprep.subr.bf16.mxu0 %v8784_v32 }
 0x3f0   :  { %8061 = vmatpush3.bf16.msra.mxu0 %v8785_v33 }
 0x3f1   :  { %8062 = vmatprep.subr.bf16.mxu0 %v8786_v40 }
 0x3f4   :  { %8063 = vmatpush3.bf16.msra.mxu0 %v8787_v2 }
 0x3f5   :  { %8064 = vmatprep.subr.bf16.mxu0 %v8788_v17 }
 0x3f8   :  { %8065 = vmatpush3.bf16.msra.mxu0 %v8789_v34 }
 0x3f9   :  { %8066 = vmatprep.subr.bf16.mxu0 %v8790_v35 }
 0x3fc   :  { %8067 = vmatpush3.bf16.msra.mxu0 %v8791_v36 }
 0x3fd   :  { %8068 = vmatprep.subr.bf16.mxu0 %v8792_v37 }
 0x400   :  { %8069 = vmatpush3.bf16.msra.mxu0 %v8793_v41 }
 0x401   :  { %8070 = vmatprep.subr.bf16.mxu0 %v8794_v42 }
 0x404   :  { %8071 = vmatpush3.bf16.msra.mxu0 %v8795_v47 }
 0x407   :  { %3815 = vmatmul.mubr.bf16.vlgmr.msra.gmra.mrb[32].mxu0 %v2475_v48 }
 0x41a   :  { %v7918_v50 = vpop.f32.mrb[8].mxu0 }
 0x41b   :  { %v7919_v52 = vpop.f32.mrb[9].mxu0 }
 0x41c   :  { %v7920_v53 = vadd.f32 %v7919_v52, %v7918_v50  ;;  %v7921_v55 = vpop.f32.mrb[10].mxu0  ;;  %v3840_v52 = vld [vmem:[%s11793_s6 + $0x8] sm:$0xff] }
 0x41d   :  { %v8050_v56 = vpop.f32.mrb[12].mxu1  ;;  %v7922_v39 = vpop.f32.mrb[11].mxu0 }
 0x41e   :  { %v8051_v1 = vpop.f32.mrb[13].mxu1  ;;  %v3537_v5 = vadd.f32 %v7920_v53, %v2733_v62  ;;  %v3848_v53 = vld [vmem:[%s11793_s6 + $0x48] sm:$0xff]  ;;  %v3830_v39 = vpop.permute.xlu0 %3829 }
 0x41f   :  { %v8052_v16 = vadd.f32 %v8051_v1, %v8050_v56  ;;  %v8053_v57 = vpop.f32.mrb[14].mxu1  ;;  %v7619_v55 = vcombine.low %v3840_v52, %v3848_v53  ;;  %v7620_v56 = vcombine.high %v3840_v52, %v3848_v53  ;;  %v3864_v62 = vld [vmem:[%s11793_s6 + $0xc8] sm:$0xff]  ;;  %v3870_v52 = vld [vmem:[%s11793_s6 + $0xf8] sm:$0xff] }
 0x420   :  { %v8054_v61 = vpop.f32.mrb[15].mxu1 }
 0x421   :  { %4165 = vmatprep.subr.bf16.mxu1 %v7620_v56  ;;  %v3856_v61 = vld [vmem:[%s11793_s6 + $0x88] sm:$0xff] }
 0x43a   :  { %v7940_v63 = vpop.f32.mrb[12].mxu0 }
 0x43b   :  { %v7941_v3 = vpop.f32.mrb[13].mxu0 }
 0x43c   :  { %v7942_v6 = vadd.f32 %v7941_v3, %v7940_v63  ;;  %v7943_v43 = vpop.f32.mrb[14].mxu0 }
 0x43d   :  { %v7944_v45 = vpop.f32.mrb[15].mxu0  ;;  %v3849_v43 = vld [vmem:[%s11793_s6 + $0x50] sm:$0xff] }
 0x43e   :  { %v3577_v46 = vadd.f32 %v7942_v6, %v3537_v5  ;;  %v7636_v5 = vcombine.high %v3856_v61, %v3864_v62  ;;  %v3841_v6 = vld [vmem:[%s11793_s6 + $0x10] sm:$0xff]  ;;  %v7635_v45 = vcombine.low %v3856_v61, %v3864_v62  ;;  %v8802_v61 = vld [vmem:[%s11794_s7 + $0x20] ss:$8 sps:$4 sm:$0xff]  }
 0x43f   :  { %v8807_v62 = vld [vmem:[%s11794_s7 + $0x34] ss:$8 sps:$4 sm:$0xff]  }
 0x45a   :  { %v7962_v51 = vpop.f32.mrb[16].mxu0 }
 0x45b   :  { %v7963_v18 = vpop.f32.mrb[17].mxu0 }
 0x45c   :  { %v7964_v7 = vadd.f32 %v7963_v18, %v7962_v51  ;;  %v7965_v8 = vpop.f32.mrb[18].mxu0  ;;  %v3857_v51 = vld [vmem:[%s11793_s6 + $0x90] sm:$0xff] }
 0x45d   :  { %v7966_v23 = vpop.f32.mrb[19].mxu0  ;;  %v3865_v18 = vld [vmem:[%s11793_s6 + $0xd0] sm:$0xff] }
 0x45e   :  { %v3617_v9 = vadd.f32 %v7964_v7, %v3577_v46  ;;  %v7622_v46 = vcombine.high %v3841_v6, %v3849_v43  ;;  %v7621_v7 = vcombine.low %v3841_v6, %v3849_v43  ;;  %v7638_v8 = vcombine.high %v3857_v51, %v3865_v18  ;;  %v3842_v23 = vld [vmem:[%s11793_s6 + $0x18] sm:$0xff] }
 0x45f   :  { %v7637_v11 = vcombine.low %v3857_v51, %v3865_v18  ;;  %v8813_v6 = vld [vmem:[%s11794_s7 + $0x54] ss:$8 sps:$4 sm:$0xff]   ;;  %v8811_v43 = vld [vmem:[%s11794_s7 + $0x50] ss:$8 sps:$4 sm:$0xff]  }
 0x460   :  { %v8819_v51 = vld [vmem:[%s11794_s7 + $0x74] ss:$8 sps:$4 sm:$0xff]   ;;  %v8817_v18 = vld [vmem:[%s11794_s7 + $0x70] ss:$8 sps:$4 sm:$0xff]  }
 0x47a   :  { %v7984_v19 = vpop.f32.mrb[20].mxu0 }
 0x47b   :  { %v7985_v20 = vpop.f32.mrb[21].mxu0 }
 0x47c   :  { %v7986_v21 = vadd.f32 %v7985_v20, %v7984_v19  ;;  %v7987_v22 = vpop.f32.mrb[22].mxu0  ;;  %v7639_v19 = vcombine.low %v3858_v14, %v3866_v15  ;;  %v7626_v20 = vcombine.high %v3843_v12, %v3851_v10  ;;  %v8831_v14 = vld [vmem:[%s11794_s7 + $0xb4] ss:$8 sps:$4 sm:$0xff]   ;;  %v8829_v15 = vld [vmem:[%s11794_s7 + $0xb0] ss:$8 sps:$4 sm:$0xff]  }
 0x47d   :  { %v7988_v24 = vpop.f32.mrb[23].mxu0  ;;  %v3867_v22 = vld [vmem:[%s11793_s6 + $0xe0] sm:$0xff] }
 0x47e   :  { %v3657_v25 = vadd.f32 %v7986_v21, %v3617_v9  ;;  %v3850_v9 = vld [vmem:[%s11793_s6 + $0x58] sm:$0xff]  ;;  %v3859_v21 = vld [vmem:[%s11793_s6 + $0xa0] sm:$0xff]  ;;  %v7625_v24 = vcombine.low %v3843_v12, %v3851_v10 }
 0x47f   :  { %v7624_v13 = vcombine.high %v3842_v23, %v3850_v9  ;;  %v7623_v38 = vcombine.low %v3842_v23, %v3850_v9  ;;  %v8825_v23 = vld [vmem:[%s11794_s7 + $0x94] ss:$8 sps:$4 sm:$0xff]   ;;  %v8823_v9 = vld [vmem:[%s11794_s7 + $0x90] ss:$8 sps:$4 sm:$0xff]  }
 0x480   :  { %v8837_v12 = vld [vmem:[%s11794_s7 + $0xd4] ss:$8 sps:$4 sm:$0xff]   ;;  %v8835_v10 = vld [vmem:[%s11794_s7 + $0xd0] ss:$8 sps:$4 sm:$0xff]  }
 0x49a   :  { %v8006_v26 = vpop.f32.mrb[24].mxu0 }
 0x49b   :  { %v8007_v27 = vpop.f32.mrb[25].mxu0 }
 0x49c   :  { %v8008_v28 = vadd.f32 %v8007_v27, %v8006_v26  ;;  %v8009_v29 = vpop.f32.mrb[26].mxu0  ;;  %v3844_v26 = vld [vmem:[%s11793_s6 + $0x28] sm:$0xff] }
 0x49d   :  { %v8010_v30 = vpop.f32.mrb[27].mxu0  ;;  %v3852_v27 = vld [vmem:[%s11793_s6 + $0x68] sm:$0xff] }
 0x49e   :  { %v3697_v31 = vadd.f32 %v8008_v28, %v3657_v25  ;;  %v7642_v25 = vcombine.high %v3859_v21, %v3867_v22  ;;  %v7641_v28 = vcombine.low %v3859_v21, %v3867_v22  ;;  %v7628_v29 = vcombine.high %v3844_v26, %v3852_v27  ;;  %v3860_v30 = vld [vmem:[%s11793_s6 + $0xa8] sm:$0xff]  ;;  %v8843_v21 = vld [vmem:[%s11794_s7 + $0xf4] ss:$8 sps:$4 sm:$0xff]   ;;  %v8841_v22 = vld [vmem:[%s11794_s7 + $0xf0] ss:$8 sps:$4 sm:$0xff]  }
 0x4ba   :  { %v8028_v32 = vpop.f32.mrb[28].mxu0 }
 0x4bb   :  { %v8029_v33 = vpop.f32.mrb[29].mxu0 }
 0x4bc   :  { %v8030_v40 = vadd.f32 %v8029_v33, %v8028_v32  ;;  %v8031_v2 = vpop.f32.mrb[30].mxu0  ;;  %v7627_v32 = vcombine.low %v3844_v26, %v3852_v27  ;;  %v3872_v26 = vld [vmem:[%s11789_s2] ss:$8 sm:$0xf0] }
 0x4bd   :  { %v8032_v17 = vpop.f32.mrb[31].mxu0  ;;  %v3853_v2 = vld [vmem:[%s11793_s6 + $0x70] sm:$0xff] }
 0x4be   :  { %v3737_v34 = vadd.f32 %v8030_v40, %v3697_v31  ;;  %v3868_v31 = vld [vmem:[%s11793_s6 + $0xe8] sm:$0xff]  ;;  %v3845_v40 = vld [vmem:[%s11793_s6 + $0x30] sm:$0xff] }
 0x4bf   :  { %v7644_v33 = vcombine.high %v3860_v30, %v3868_v31  ;;  %v7643_v17 = vcombine.low %v3860_v30, %v3868_v31 }
 0x4c0   :  { %v3777_v35 = vadd.f32 %v8052_v16, %v3737_v34  ;;  %v7630_v34 = vcombine.high %v3845_v40, %v3853_v2 }
 0x4da   :  { %v8072_v36 = vpop.f32.mrb[32].mxu0 }
 0x4db   :  { %v8073_v37 = vpop.f32.mrb[33].mxu0 }
 0x4dc   :  { %v8074_v41 = vadd.f32 %v8073_v37, %v8072_v36  ;;  %v8075_v42 = vpop.f32.mrb[34].mxu0  ;;  %v3869_v36 = vld [vmem:[%s11793_s6 + $0xf0] sm:$0xff]  ;;  %v7629_v37 = vcombine.low %v3845_v40, %v3853_v2 }
 0x4dd   :  { %v8076_v44 = vpop.f32.mrb[35].mxu0  ;;  %v3846_v42 = vld [vmem:[%s11793_s6 + $0x38] sm:$0xff] }
 0x4de   :  { %v3817_v47 = vadd.f32 %v8074_v41, %v3777_v35  ;;  %v3861_v35 = vld [vmem:[%s11793_s6 + $0xb0] sm:$0xff]  ;;  %v3854_v44 = vld [vmem:[%s11793_s6 + $0x78] sm:$0xff] }
 0x4df   :  { %v7646_v41 = vcombine.high %v3861_v35, %v3869_v36  ;;  %v7631_v53 = vcombine.low %v3846_v42, %v3854_v44 }
 0x4e0   :  { %3823 = vst.msk [vmem:[%s11797_s10] sm:$0x3] %vm3822_vm12, %v3817_v47  ;;  %v3824_v48 = vmul.f32 0.5, %v3817_v47  ;;  %vm6152_vm12 = vcmask 522240  }
 0x4e2   :  { %v3825_v50 = vmul.f32 1.442695, %v3824_v48  ;;  %v7632_v48 = vcombine.high %v3846_v42, %v3854_v44 }
 0x4e4   :  { %9116 = vpow2.f32 %v3825_v50  ;;  %v3862_v50 = vld [vmem:[%s11793_s6 + $0xb8] sm:$0xff] }
 0x4e5   :  { %v7647_v56 = vcombine.low %v3862_v50, %v3870_v52 }
 0x4ee   :  { %v9117_v1 = vpop.eup %9116 }
 0x4ef   :  { %v3832_v16 = vmul.f32 %v9117_v1, %v3830_v39  ;;  %v8798_v39 = vld [vmem:[%s11794_s7 + $0x4] ss:$8 sps:$4 sm:$0xff]   ;;  %v8796_v1 = vld [vmem:[%s11794_s7] ss:$8 sps:$4 sm:$0xff]  }
 0x4f0   :  { %5858 = vmatprep.subr.bf16.mxu0 %v8798_v39 }
 0x4f1   :  { %3834 = vrot.lane.b32.xlu0 %v3832_v16, %s9163_s25  ;;  %5859 = vmatpush1.bf16.msra.mxu0 %v8796_v1  ;;  %v8801_v16 = vld [vmem:[%s11794_s7 + $0x14] ss:$8 sps:$4 sm:$0xff]   ;;  %v3902_v1 = vsub.s32 5, %v9751_v54 }
 0x4f2   :  { %5860 = vmatprep.subr.bf16.mxu0 %v8801_v16 }
 0x563   :  { %v3835_v57 = vpop.permute.xlu0 %3834 }
 0x564   :  { %v3837_v63 = vadd.f32 %v3835_v57, %v3817_v47  ;;  %v7645_v47 = vcombine.low %v3861_v35, %v3869_v36  ;;  %v8804_v57 = vld [vmem:[%s11794_s7 + $0x24] ss:$8 sps:$4 sm:$0xff]  }
 0x566   :  { %v10719_v3 = vpack.c.bf16 %v3837_v63, %v3837_v63  ;;  %v8805_v63 = vld [vmem:[%s11794_s7 + $0x30] ss:$8 sps:$4 sm:$0xff]  }
 0x568   :  { %7649 = vmatmul.mubr.msk.bf16.vlgmr.msra.gmra.mrb[16].mxu1 %vm4120_vm13, %v10719_v3 }
 0x569   :  { %4166 = vmatpush1.bf16.msra.mxu1 %v7619_v55  ;;  %4197 = vmatprep.mubr.bf16.mxu1 %v9159_v4  ;;  %v7648_v55 = vcombine.high %v3862_v50, %v3870_v52  ;;  %v3898_v52 = vsub.s32 4, %v9751_v54 }
 0x56a   :  { %4167 = vmatprep.subr.bf16.mxu1 %v7636_v5  ;;  %v8808_v5 = vld [vmem:[%s11794_s7 + $0x40] ss:$8 sps:$4 sm:$0xff]  }
 0x56d   :  { %4168 = vmatpush1.bf16.msra.mxu1 %v7635_v45  ;;  %v8816_v45 = vld [vmem:[%s11794_s7 + $0x64] ss:$8 sps:$4 sm:$0xff]  }
 0x56e   :  { %4206 = vmatprep.subr.bf16.mxu1 %v7622_v46  ;;  %v8814_v46 = vld [vmem:[%s11794_s7 + $0x60] ss:$8 sps:$4 sm:$0xff]  }
 0x570   :  { %7650 = vmatmul.mubr.msk.bf16.vlgmr.msra.gmra.mrb[20].mxu1 %vm4120_vm13, %v10719_v3 }
 0x571   :  { %4207 = vmatpush1.bf16.msra.mxu1 %v7621_v7  ;;  %4238 = vmatprep.mubr.bf16.mxu1 %v9159_v4  ;;  %v8822_v7 = vld [vmem:[%s11794_s7 + $0x84] ss:$8 sps:$4 sm:$0xff]  }
 0x572   :  { %4208 = vmatprep.subr.bf16.mxu1 %v7638_v8  ;;  %v8820_v8 = vld [vmem:[%s11794_s7 + $0x80] ss:$8 sps:$4 sm:$0xff]  }
 0x575   :  { %4209 = vmatpush1.bf16.msra.mxu1 %v7637_v11  ;;  %v8828_v11 = vld [vmem:[%s11794_s7 + $0xa4] ss:$8 sps:$4 sm:$0xff]  }
 0x576   :  { %4247 = vmatprep.subr.bf16.mxu1 %v7624_v13  ;;  %v8826_v13 = vld [vmem:[%s11794_s7 + $0xa0] ss:$8 sps:$4 sm:$0xff]  }
 0x578   :  { %7651 = vmatmul.mubr.msk.bf16.vlgmr.msra.gmra.mrb[24].mxu1 %vm4120_vm13, %v10719_v3 }
 0x579   :  { %4248 = vmatpush1.bf16.msra.mxu1 %v7623_v38  ;;  %4279 = vmatprep.mubr.bf16.mxu1 %v9159_v4  ;;  %v8834_v38 = vld [vmem:[%s11794_s7 + $0xc4] ss:$8 sps:$4 sm:$0xff]  }
 0x57a   :  { %4249 = vmatprep.subr.bf16.mxu1 %v7640_v0  ;;  %v8832_v0 = vld [vmem:[%s11794_s7 + $0xc0] ss:$8 sps:$4 sm:$0xff]  }
 0x57d   :  { %4250 = vmatpush1.bf16.msra.mxu1 %v7639_v19  ;;  %v8840_v19 = vld [vmem:[%s11794_s7 + $0xe4] ss:$8 sps:$4 sm:$0xff]  }
 0x57e   :  { %4288 = vmatprep.subr.bf16.mxu1 %v7626_v20  ;;  %v8838_v20 = vld [vmem:[%s11794_s7 + $0xe0] ss:$8 sps:$4 sm:$0xff]  }
 0x580   :  { %7652 = vmatmul.mubr.msk.bf16.vlgmr.msra.gmra.mrb[28].mxu1 %vm4120_vm13, %v10719_v3 }
 0x581   :  { %4289 = vmatpush1.bf16.msra.mxu1 %v7625_v24  ;;  %4320 = vmatprep.mubr.bf16.mxu1 %v9159_v4  ;;  %v8846_v24 = vld [vmem:[%s11794_s7 + $0x104] ss:$8 sps:$4 sm:$0xff]  }
 0x582   :  { %4290 = vmatprep.subr.bf16.mxu1 %v7642_v25  ;;  %v3871_v25 = vld [vmem:[%s11789_s2] ss:$8 sm:$0xf] }
 0x583   :  { %v3873_v27 = vor.u32 %v3872_v26, %v3871_v25 }
 0x585   :  { %4291 = vmatpush1.bf16.msra.mxu1 %v7641_v28  ;;  %v3883_v28 = vrot.slane %v3873_v27, %v9757_v58 }
 0x586   :  { %4329 = vmatprep.subr.bf16.mxu1 %v7628_v29  ;;  %v3887_v29 = vrot.slane %v3873_v27, %v9760_v60 }
 0x588   :  { %7653 = vmatmul.mubr.msk.bf16.vlgmr.msra.gmra.mrb[32].mxu1 %vm4120_vm13, %v10719_v3 }
 0x589   :  { %4330 = vmatpush1.bf16.msra.mxu1 %v7627_v32  ;;  %4361 = vmatprep.mubr.bf16.mxu1 %v9159_v4 }
 0x58a   :  { %4331 = vmatprep.subr.bf16.mxu1 %v7644_v33  ;;  %v3890_v33 = vsub.s32 2, %v9751_v54 }
 0x58d   :  { %4332 = vmatpush1.bf16.msra.mxu1 %v7643_v17  ;;  %v3894_v17 = vsub.s32 3, %v9751_v54 }
 0x58e   :  { %4370 = vmatprep.subr.bf16.mxu1 %v7630_v34 }
 0x58f   :  { %v3895_v42 = vrot.slane %v3873_v27, %v3894_v17 }
 0x590   :  { %7654 = vmatmul.mubr.msk.bf16.vlgmr.msra.gmra.mrb[36].mxu1 %vm4120_vm13, %v10719_v3 }
 0x591   :  { %4371 = vmatpush1.bf16.msra.mxu1 %v7629_v37  ;;  %4402 = vmatprep.mubr.bf16.mxu1 %v9159_v4  ;;  %v3891_v37 = vrot.slane %v3873_v27, %v3890_v33 }
 0x592   :  { %4372 = vmatprep.subr.bf16.mxu1 %v7646_v41 }
 0x595   :  { %4373 = vmatpush1.bf16.msra.mxu1 %v7645_v47 }
 0x596   :  { %4411 = vmatprep.subr.bf16.mxu1 %v7632_v48 }
 0x598   :  { %7655 = vmatmul.mubr.msk.bf16.vlgmr.msra.gmra.mrb[40].mxu1 %vm4120_vm13, %v10719_v3 }
 0x599   :  { %4412 = vmatpush1.bf16.msra.mxu1 %v7631_v53  ;;  %4443 = vmatprep.mubr.bf16.mxu1 %v9159_v4  ;;  %v8799_v4 = vld [vmem:[%s11794_s7 + $0x10] ss:$8 sps:$4 sm:$0xff]  }
 0x59a   :  { %4413 = vmatprep.subr.bf16.mxu1 %v7648_v55  ;;  %5861 = vmatpush1.bf16.msra.mxu0 %v8799_v4 }
 0x59b   :  { %5862 = vmatprep.subr.bf16.mxu0 %v8804_v57 }
 0x59d   :  { %4414 = vmatpush1.bf16.msra.mxu1 %v7647_v56 }
 0x59e   :  { %5863 = vmatpush1.bf16.msra.mxu0 %v8802_v61 }
 0x59f   :  { %5864 = vmatprep.subr.bf16.mxu0 %v8807_v62  ;;  %v3899_v62 = vrot.slane %v3873_v27, %v3898_v52 }
 0x5a0   :  { %7656 = vmatmul.mubr.msk.bf16.vlgmr.msra.gmra.mrb[44].mxu1 %vm4120_vm13, %v10719_v3  ;;  %v8810_v3 = vld [vmem:[%s11794_s7 + $0x44] ss:$8 sps:$4 sm:$0xff]   ;;  %vm6168_vm13 = vcmask 521216  }
 0x5a2   :  { %5865 = vmatpush1.bf16.msra.mxu0 %v8805_v63 }
 0x5a3   :  { %5866 = vmatprep.subr.bf16.mxu0 %v8810_v3  ;;  %v3903_v3 = vrot.slane %v3873_v27, %v3902_v1 }
 0x5a6   :  { %5867 = vmatpush1.bf16.msra.mxu0 %v8808_v5 }
 0x5a7   :  { %5868 = vmatprep.subr.bf16.mxu0 %v8813_v6 }
 0x5aa   :  { %5869 = vmatpush1.bf16.msra.mxu0 %v8811_v43 }
 0x5ab   :  { %5870 = vmatprep.subr.bf16.mxu0 %v8816_v45 }
 0x5ae   :  { %5871 = vmatpush1.bf16.msra.mxu0 %v8814_v46  ;;  %v3906_v46 = vsub.s32 6, %v9751_v54 }
 0x5af   :  { %5872 = vmatprep.subr.bf16.mxu0 %v8819_v51 }
 0x5b2   :  { %5873 = vmatpush1.bf16.msra.mxu0 %v8817_v18 }
 0x5b3   :  { %5874 = vmatprep.subr.bf16.mxu0 %v8822_v7 }
 0x5b6   :  { %5875 = vmatpush1.bf16.msra.mxu0 %v8820_v8 }
 0x5b7   :  { %5876 = vmatprep.subr.bf16.mxu0 %v8825_v23  ;;  %v3910_v23 = vsub.s32 7, %v9751_v54 }
 0x5ba   :  { %5877 = vmatpush1.bf16.msra.mxu0 %v8823_v9 }
 0x5bb   :  { %5878 = vmatprep.subr.bf16.mxu0 %v8828_v11 }
 0x5be   :  { %5879 = vmatpush1.bf16.msra.mxu0 %v8826_v13 }
 0x5bf   :  { %5880 = vmatprep.subr.bf16.mxu0 %v8831_v14 }
 0x5c2   :  { %5881 = vmatpush1.bf16.msra.mxu0 %v8829_v15  ;;  %v3907_v15 = vrot.slane %v3873_v27, %v3906_v46 }
 0x5c3   :  { %5882 = vmatprep.subr.bf16.mxu0 %v8834_v38 }
 0x5c6   :  { %5883 = vmatpush1.bf16.msra.mxu0 %v8832_v0  ;;  %v3911_v0 = vrot.slane %v3873_v27, %v3910_v23 }
 0x5c7   :  { %5884 = vmatprep.subr.bf16.mxu0 %v8837_v12  ;;  %v7615_v12 = vld [vmem:[%s11789_s2 + $0x40] ss:$8 sm:$0xf] }
 0x5ca   :  { %5885 = vmatpush1.bf16.msra.mxu0 %v8835_v10  ;;  %v7616_v10 = vld [vmem:[%s11789_s2 + $0x40] ss:$8 sm:$0xf0] }
 0x5cb   :  { %5886 = vmatprep.subr.bf16.mxu0 %v8840_v19 }
 0x5ce   :  { %5887 = vmatpush1.bf16.msra.mxu0 %v8838_v20 }
 0x5cf   :  { %5888 = vmatprep.subr.bf16.mxu0 %v8843_v21 }
 0x5d2   :  { %5889 = vmatpush1.bf16.msra.mxu0 %v8841_v22 }
 0x5d3   :  { %5909 = vmatprep.subr.bf16.mxu0 %v8846_v24  ;;  %v10962_v24 = vor.u32 %v7616_v10, %v7615_v12 }
 0x63b   :  { %v4158_v30 = vpop.f32.mrb[16].mxu1 }
 0x63c   :  { %v4159_v31 = vadd.f32 %v4158_v30, %v3883_v28  ;;  %v4160_v32 = vpop.f32.mrb[17].mxu1 }
 0x63d   :  { %v4161_v40 = vadd.f32 %v4160_v32, %v3887_v29  ;;  %v4162_v2 = vpop.f32.mrb[18].mxu1 }
 0x63e   :  { %v4452_v34 = vmax.f32 %v4159_v31, 0.0  ;;  %v4163_v35 = vpop.f32.mrb[19].mxu1 }
 0x63f   :  { %v4453_v36 = vmax.f32 %v4161_v40, 0.0  ;;  %v3915_v40 = vrot.slane %v10962_v24, %v9757_v58 }
 0x641   :  { %v4470_v41 = vcombine.low %v4452_v34, %v4453_v36  ;;  %v3919_v34 = vrot.slane %v10962_v24, %v9760_v60 }
 0x643   :  { %v4477_v44 = vrot.slane %v4470_v41, %v10332_v49  ;;  %v4199_v47 = vpop.f32.mrb[20].mxu1 }
 0x644   :  { %v4200_v48 = vadd.f32 %v4199_v47, %v3891_v37  ;;  %v4201_v50 = vpop.f32.mrb[21].mxu1 }
 0x645   :  { %v4484_v53 = vrot.slane %v4477_v44, %v10332_v49  ;;  %v4635_v55 = vcombine.high %v4477_v44, %v4477_v44  ;;  %v4202_v56 = vadd.f32 %v4201_v50, %v3895_v42  ;;  %v4203_v39 = vpop.f32.mrb[22].mxu1 }
 0x646   :  { %v4454_v16 = vmax.f32 %v4200_v48, 0.0  ;;  %v4204_v4 = vpop.f32.mrb[23].mxu1  ;;  %v3923_v39 = vrot.slane %v10962_v24, %v3890_v33 }
 0x647   :  { %4486 = vst.msk [vmem:[#allocation5] ss:$8 sm:$0x3] %vm10337_vm11, %v4484_v53  ;;  %v4642_v57 = vrot.slane %v4635_v55, %v10332_v49  ;;  %v4455_v61 = vmax.f32 %v4202_v56, 0.0  ;;  %v3927_v4 = vrot.slane %v10962_v24, %v3894_v17  ;;  %v3931_v17 = vrot.slane %v10962_v24, %v3898_v52 }
 0x649   :  { %4645 = vst.msk [vmem:[#allocation5 + $0x10] ss:$8 sm:$0x3] %vm10337_vm11, %v4642_v57  ;;  %v4490_v63 = vcombine.low %v4454_v16, %v4455_v61 }
 0x64b   :  { %v4497_v5 = vrot.slane %v4490_v63, %v10332_v49  ;;  %v4240_v6 = vpop.f32.mrb[24].mxu1 }
 0x64c   :  { %v4241_v43 = vadd.f32 %v4240_v6, %v3899_v62  ;;  %v4242_v45 = vpop.f32.mrb[25].mxu1 }
 0x64d   :  { %v4504_v51 = vrot.slane %v4497_v5, %v10332_v49  ;;  %v4647_v18 = vcombine.high %v4497_v5, %v4497_v5  ;;  %v4243_v7 = vadd.f32 %v4242_v45, %v3903_v3  ;;  %v4244_v8 = vpop.f32.mrb[26].mxu1 }
 0x64e   :  { %v4456_v9 = vmax.f32 %v4241_v43, 0.0  ;;  %v4245_v11 = vpop.f32.mrb[27].mxu1  ;;  %v3935_v8 = vrot.slane %v10962_v24, %v3902_v1  ;;  %v3939_v1 = vrot.slane %v10962_v24, %v3906_v46 }
 0x64f   :  { %4507 = vst.msk [vmem:[#allocation5 + $0x1] ss:$8 sm:$0x3] %vm10337_vm11, %v4504_v51  ;;  %v4654_v13 = vrot.slane %v4647_v18, %v10332_v49  ;;  %v4457_v14 = vmax.f32 %v4243_v7, 0.0 }
 0x651   :  { %4657 = vst.msk [vmem:[#allocation5 + $0x11] ss:$8 sm:$0x3] %vm10337_vm11, %v4654_v13  ;;  %v4511_v38 = vcombine.low %v4456_v9, %v4457_v14 }
 0x653   :  { %v4518_v19 = vrot.slane %v4511_v38, %v10332_v49  ;;  %v4281_v20 = vpop.f32.mrb[28].mxu1 }
 0x654   :  { %v4282_v21 = vadd.f32 %v4281_v20, %v3907_v15  ;;  %v4283_v22 = vpop.f32.mrb[29].mxu1 }
 0x655   :  { %v4525_v25 = vrot.slane %v4518_v19, %v10332_v49  ;;  %v4659_v26 = vcombine.high %v4518_v19, %v4518_v19  ;;  %v4284_v28 = vadd.f32 %v4283_v22, %v3911_v0  ;;  %v4285_v27 = vpop.f32.mrb[30].mxu1  ;;  %v3943_v22 = vrot.slane %v10962_v24, %v3910_v23 }
 0x656   :  { %v4458_v29 = vmax.f32 %v4282_v21, 0.0  ;;  %v4286_v30 = vpop.f32.mrb[31].mxu1 }
 0x657   :  { %4528 = vst.msk [vmem:[#allocation5 + $0x2] ss:$8 sm:$0x3] %vm10337_vm11, %v4525_v25  ;;  %v4666_v31 = vrot.slane %v4659_v26, %v10332_v49  ;;  %v4459_v32 = vmax.f32 %v4284_v28, 0.0 }
 0x659   :  { %4669 = vst.msk [vmem:[#allocation5 + $0x12] ss:$8 sm:$0x3] %vm10337_vm11, %v4666_v31  ;;  %v4532_v2 = vcombine.low %v4458_v29, %v4459_v32 }
 0x65b   :  { %v4539_v35 = vrot.slane %v4532_v2, %v10332_v49  ;;  %v4322_v36 = vpop.f32.mrb[32].mxu1 }
 0x65c   :  { %v4323_v37 = vadd.f32 %v4322_v36, %v3915_v40  ;;  %v4324_v41 = vpop.f32.mrb[33].mxu1 }
 0x65d   :  { %v4546_v42 = vrot.slane %v4539_v35, %v10332_v49  ;;  %v4671_v44 = vcombine.high %v4539_v35, %v4539_v35  ;;  %v4325_v47 = vadd.f32 %v4324_v41, %v3919_v34  ;;  %v4326_v48 = vpop.f32.mrb[34].mxu1 }
 0x65e   :  { %v4460_v50 = vmax.f32 %v4323_v37, 0.0  ;;  %v4327_v53 = vpop.f32.mrb[35].mxu1 }
 0x65f   :  { %4549 = vst.msk [vmem:[#allocation5 + $0x3] ss:$8 sm:$0x3] %vm10337_vm11, %v4546_v42  ;;  %v4678_v55 = vrot.slane %v4671_v44, %v10332_v49  ;;  %v4461_v56 = vmax.f32 %v4325_v47, 0.0 }
 0x661   :  { %4681 = vst.msk [vmem:[#allocation5 + $0x13] ss:$8 sm:$0x3] %vm10337_vm11, %v4678_v55  ;;  %v4553_v16 = vcombine.low %v4460_v50, %v4461_v56 }
 0x663   :  { %v4560_v57 = vrot.slane %v4553_v16, %v10332_v49  ;;  %v4363_v61 = vpop.f32.mrb[36].mxu1 }
 0x664   :  { %v4364_v62 = vadd.f32 %v4363_v61, %v3923_v39  ;;  %v4365_v63 = vpop.f32.mrb[37].mxu1 }
 0x665   :  { %v4567_v3 = vrot.slane %v4560_v57, %v10332_v49  ;;  %v4683_v5 = vcombine.high %v4560_v57, %v4560_v57  ;;  %v4366_v6 = vadd.f32 %v4365_v63, %v3927_v4  ;;  %v4367_v43 = vpop.f32.mrb[38].mxu1 }
 0x666   :  { %v4462_v45 = vmax.f32 %v4364_v62, 0.0  ;;  %v4368_v33 = vpop.f32.mrb[39].mxu1 }
 0x667   :  { %4570 = vst.msk [vmem:[#allocation5 + $0x4] ss:$8 sm:$0x3] %vm10337_vm11, %v4567_v3  ;;  %v4690_v51 = vrot.slane %v4683_v5, %v10332_v49  ;;  %v4463_v18 = vmax.f32 %v4366_v6, 0.0 }
 0x669   :  { %4693 = vst.msk [vmem:[#allocation5 + $0x14] ss:$8 sm:$0x3] %vm10337_vm11, %v4690_v51  ;;  %v4574_v7 = vcombine.low %v4462_v45, %v4463_v18  ;;  %v8844_v18 = vld [vmem:[%s11794_s7 + $0x100] ss:$8 sps:$4 sm:$0xff]  }
 0x66b   :  { %v4581_v9 = vrot.slane %v4574_v7, %v10332_v49  ;;  %v4404_v11 = vpop.f32.mrb[40].mxu1 }
 0x66c   :  { %v4405_v13 = vadd.f32 %v4404_v11, %v3931_v17  ;;  %v4406_v14 = vpop.f32.mrb[41].mxu1  ;;  %v8849_v17 = vld [vmem:[%s11794_s7 + $0x114] ss:$8 sps:$4 sm:$0xff]  }
 0x66d   :  { %v4588_v15 = vrot.slane %v4581_v9, %v10332_v49  ;;  %v4695_v38 = vcombine.high %v4581_v9, %v4581_v9  ;;  %v4407_v0 = vadd.f32 %v4406_v14, %v3935_v8  ;;  %v4408_v12 = vpop.f32.mrb[42].mxu1  ;;  %v8847_v8 = vld [vmem:[%s11794_s7 + $0x110] ss:$8 sps:$4 sm:$0xff]   ;;  %v8852_v9 = vld [vmem:[%s11794_s7 + $0x124] ss:$8 sps:$4 sm:$0xff]  }
 0x66e   :  { %v4464_v10 = vmax.f32 %v4405_v13, 0.0  ;;  %v4409_v52 = vpop.f32.mrb[43].mxu1  ;;  %v8850_v13 = vld [vmem:[%s11794_s7 + $0x120] ss:$8 sps:$4 sm:$0xff]   ;;  %v8853_v12 = vld [vmem:[%s11794_s7 + $0x130] ss:$8 sps:$4 sm:$0xff]  }
 0x66f   :  { %4591 = vst.msk [vmem:[#allocation5 + $0x5] ss:$8 sm:$0x3] %vm10337_vm11, %v4588_v15  ;;  %v4702_v19 = vrot.slane %v4695_v38, %v10332_v49  ;;  %v4465_v20 = vmax.f32 %v4407_v0, 0.0  ;;  %v8855_v38 = vld [vmem:[%s11794_s7 + $0x134] ss:$8 sps:$4 sm:$0xff]  }
 0x670   :  { %v8856_v52 = vld [vmem:[%s11794_s7 + $0x140] ss:$8 sps:$4 sm:$0xff]  }
 0x671   :  { %4705 = vst.msk [vmem:[#allocation5 + $0x15] ss:$8 sm:$0x3] %vm10337_vm11, %v4702_v19  ;;  %v4595_v21 = vcombine.low %v4464_v10, %v4465_v20  ;;  %v8858_v10 = vld [vmem:[%s11794_s7 + $0x144] ss:$8 sps:$4 sm:$0xff]  }
 0x672   :  { %v8861_v19 = vld [vmem:[%s11794_s7 + $0x154] ss:$8 sps:$4 sm:$0xff]   ;;  %v8859_v20 = vld [vmem:[%s11794_s7 + $0x150] ss:$8 sps:$4 sm:$0xff]  }
 0x673   :  { %v4602_v25 = vrot.slane %v4595_v21, %v10332_v49  ;;  %v4445_v26 = vpop.f32.mrb[44].mxu1  ;;  %v8862_v21 = vld [vmem:[%s11794_s7 + $0x160] ss:$8 sps:$4 sm:$0xff]  }
 0x674   :  { %v4446_v28 = vadd.f32 %v4445_v26, %v3939_v1  ;;  %v4447_v27 = vpop.f32.mrb[45].mxu1  ;;  %v8864_v1 = vld [vmem:[%s11794_s7 + $0x164] ss:$8 sps:$4 sm:$0xff]  }
 0x675   :  { %v4609_v29 = vrot.slane %v4602_v25, %v10332_v49  ;;  %v4707_v30 = vcombine.high %v4602_v25, %v4602_v25  ;;  %v4448_v31 = vadd.f32 %v4447_v27, %v3943_v22  ;;  %v4449_v32 = vpop.f32.mrb[46].mxu1  ;;  %v8867_v22 = vld [vmem:[%s11794_s7 + $0x174] ss:$8 sps:$4 sm:$0xff]   ;;  %v8865_v25 = vld [vmem:[%s11794_s7 + $0x170] ss:$8 sps:$4 sm:$0xff]  }
 0x676   :  { %v4466_v40 = vmax.f32 %v4446_v28, 0.0  ;;  %v4450_v46 = vpop.f32.mrb[47].mxu1  ;;  %v8870_v26 = vld [vmem:[%s11794_s7 + $0x184] ss:$8 sps:$4 sm:$0xff]   ;;  %v8868_v28 = vld [vmem:[%s11794_s7 + $0x180] ss:$8 sps:$4 sm:$0xff]  }
 0x677   :  { %4612 = vst.msk [vmem:[#allocation5 + $0x6] ss:$8 sm:$0x3] %vm10337_vm11, %v4609_v29  ;;  %v4714_v2 = vrot.slane %v4707_v30, %v10332_v49  ;;  %v4467_v54 = vmax.f32 %v4448_v31, 0.0  ;;  %v8873_v27 = vld [vmem:[%s11794_s7 + $0x194] ss:$8 sps:$4 sm:$0xff]  }
 0x678   :  { %v8871_v29 = vld [vmem:[%s11794_s7 + $0x190] ss:$8 sps:$4 sm:$0xff]   ;;  %v8876_v30 = vld [vmem:[%s11794_s7 + $0x1a4] ss:$8 sps:$4 sm:$0xff]   ;;  %v8874_v31 = vld [vmem:[%s11794_s7 + $0x1a0] ss:$8 sps:$4 sm:$0xff]  }
 0x679   :  { %4717 = vst.msk [vmem:[#allocation5 + $0x16] ss:$8 sm:$0x3] %vm10337_vm11, %v4714_v2  ;;  %v4616_v23 = vcombine.low %v4466_v40, %v4467_v54  ;;  %v8879_v32 = vld [vmem:[%s11794_s7 + $0x1b4] ss:$8 sps:$4 sm:$0xff]  }
 0x67a   :  { %v8877_v40 = vld [vmem:[%s11794_s7 + $0x1b0] ss:$8 sps:$4 sm:$0xff]   ;;  %v8882_v46 = vld [vmem:[%s11794_s7 + $0x1c4] ss:$8 sps:$4 sm:$0xff]   ;;  %v8880_v2 = vld [vmem:[%s11794_s7 + $0x1c0] ss:$8 sps:$4 sm:$0xff]  }
 0x67b   :  { %v4623_v24 = vrot.slane %v4616_v23, %v10332_v49  ;;  %v8885_v54 = vld [vmem:[%s11794_s7 + $0x1d4] ss:$8 sps:$4 sm:$0xff]   ;;  %v8883_v23 = vld [vmem:[%s11794_s7 + $0x1d0] ss:$8 sps:$4 sm:$0xff]  }
 0x67d   :  { %v4630_v34 = vrot.slane %v4623_v24, %v10332_v49  ;;  %v4719_v35 = vcombine.high %v4623_v24, %v4623_v24  ;;  %v8888_v24 = vld [vmem:[%s11794_s7 + $0x1e4] ss:$8 sps:$4 sm:$0xff]  }
 0x67f   :  { %4633 = vst.msk [vmem:[#allocation5 + $0x7] ss:$8 sm:$0x3] %vm10337_vm11, %v4630_v34  ;;  %v4726_v36 = vrot.slane %v4719_v35, %v10332_v49  ;;  %v8886_v34 = vld [vmem:[%s11794_s7 + $0x1e0] ss:$8 sps:$4 sm:$0xff]  }
 0x680   :  { %v8891_v35 = vld [vmem:[%s11794_s7 + $0x1f4] ss:$8 sps:$4 sm:$0xff]  }
 0x681   :  { %4729 = vst.msk [vmem:[#allocation5 + $0x17] ss:$8 sm:$0x3] %vm10337_vm11, %v4726_v36  ;;  %v8889_v36 = vld [vmem:[%s11794_s7 + $0x1f0] ss:$8 sps:$4 sm:$0xff]   ;;  %vm6189_vm11 = vcmask 519168  }
 0x686   :  { %v4731_v37 = vld [vmem:[#allocation5] sm:$0xff]  ;;  %v11027_v41 = vld [vmem:[#allocation5 + $0x8] sm:$0xff] }
 0x687   :  { %v4735_v42 = vrot.slane %v4731_v37, 4  ;;  %v4747_v44 = vrot.slane %v4731_v37, 5  ;;  %v4759_v47 = vrot.slane %v4731_v37, 6  ;;  %v4771_v48 = vrot.slane %v4731_v37, 7  ;;  %4781 = vst [vmem:[#allocation6 + $0x40] sm:$0xff] %v4731_v37 }
 0x688   :  { %v11029_v50 = vld [vmem:[#allocation5 + $0x10] sm:$0xff]  ;;  %v4736_v53 = vrot.slane %v11027_v41, 4  ;;  %v4784_v55 = vld [vmem:[#allocation5 + $0x18] sm:$0xff]  ;;  %v4748_v56 = vrot.slane %v11027_v41, 5  ;;  %v4760_v49 = vrot.slane %v11027_v41, 6  ;;  %v4772_v59 = vrot.slane %v11027_v41, 7 }
 0x689   :  { %4751 = vst [vmem:[#allocation6 + $0x10] sm:$0xf8] %v4747_v44  ;;  %4753 = vst [vmem:[#allocation6 + $0x60] sm:$0x7] %v4747_v44  ;;  %v4791_v39 = vrot.slane %v11029_v50, 1  ;;  %v4803_v16 = vrot.slane %v11029_v50, 2  ;;  %v4876_v7 = vpack.c.bf16 %v4784_v55, %v4784_v55  ;;  %v4875_v14 = vpack.c.bf16 %v11029_v50, %v11029_v50 }
 0x68a   :  { %4763 = vst [vmem:[#allocation6 + $0x20] sm:$0xfc] %v4759_v47  ;;  %4765 = vst [vmem:[#allocation6 + $0x70] sm:$0x3] %v4759_v47  ;;  %v4815_v4 = vrot.slane %v11029_v50, 3  ;;  %v4827_v57 = vrot.slane %v11029_v50, 4 }
 0x68b   :  { %4775 = vst [vmem:[#allocation6 + $0x30] sm:$0xfe] %v4771_v48  ;;  %4777 = vst [vmem:[#allocation6 + $0x80] sm:$0x1] %v4771_v48  ;;  %v4792_v61 = vrot.slane %v4784_v55, 1  ;;  %v4804_v62 = vrot.slane %v4784_v55, 2 }
 0x68c   :  { %4739 = vst [vmem:[#allocation6 + $0x50] ss:$-76 sps:$4 sm:$0xff] %v4735_v42   ;;  %4740 = vst [vmem:[#allocation6 + $0x58] ss:$-76 sps:$4 sm:$0xff] %v4736_v53   ;;  %v4816_v63 = vrot.slane %v4784_v55, 3  ;;  %v4828_v3 = vrot.slane %v4784_v55, 4 }
 0x68d   :  { %4752 = vst [vmem:[#allocation6 + $0x18] sm:$0xf8] %v4748_v56  ;;  %4754 = vst [vmem:[#allocation6 + $0x68] sm:$0x7] %v4748_v56  ;;  %v8894_v37 = vld [vmem:[%s11794_s7 + $0x204] ss:$8 sps:$4 sm:$0xff]  }
 0x68e   :  { %4764 = vst [vmem:[#allocation6 + $0x28] sm:$0xfc] %v4760_v49  ;;  %4766 = vst [vmem:[#allocation6 + $0x78] sm:$0x3] %v4760_v49  ;;  %v8892_v48 = vld [vmem:[%s11794_s7 + $0x200] ss:$8 sps:$4 sm:$0xff]  }
 0x68f   :  { %4776 = vst [vmem:[#allocation6 + $0x38] sm:$0xfe] %v4772_v59  ;;  %4778 = vst [vmem:[#allocation6 + $0x88] sm:$0x1] %v4772_v59  ;;  %v8897_v53 = vld [vmem:[%s11794_s7 + $0x214] ss:$8 sps:$4 sm:$0xff]  }
 0x690   :  { %4795 = vst [vmem:[#allocation6 + $0x60] sm:$0x80] %v4791_v39  ;;  %4797 = vst [vmem:[#allocation6 + $0xb0] sm:$0x7f] %v4791_v39  ;;  %v4837_v47 = vld [vmem:[#allocation6 + $0x10] sm:$0xff] }
 0x691   :  { %4807 = vst [vmem:[#allocation6 + $0x70] sm:$0xc0] %v4803_v16  ;;  %4809 = vst [vmem:[#allocation6 + $0xc0] sm:$0x3f] %v4803_v16  ;;  %v8895_v56 = vld [vmem:[%s11794_s7 + $0x210] ss:$8 sps:$4 sm:$0xff]  }
 0x692   :  { %4819 = vst [vmem:[#allocation6 + $0x80] sm:$0xe0] %v4815_v4  ;;  %4821 = vst [vmem:[#allocation6 + $0xd0] sm:$0x1f] %v4815_v4  ;;  %v8900_v49 = vld [vmem:[%s11794_s7 + $0x224] ss:$8 sps:$4 sm:$0xff]  }
 0x693   :  { %4831 = vst [vmem:[#allocation6 + $0xe0] ss:$-76 sps:$4 sm:$0xff] %v4827_v57   ;;  %4796 = vst [vmem:[#allocation6 + $0x68] sm:$0x80] %v4792_v61  ;;  %v4835_v5 = vld [vmem:[#allocation6] sm:$0xff]  ;;  %v4845_v6 = vld [vmem:[#allocation6 + $0x50] sm:$0xff] }
 0x694   :  { %4798 = vst [vmem:[#allocation6 + $0xb8] sm:$0x7f] %v4792_v61  ;;  %4808 = vst [vmem:[#allocation6 + $0x78] sm:$0xc0] %v4804_v62  ;;  %v4836_v43 = vld [vmem:[#allocation6 + $0x8] sm:$0xff]  ;;  %v4846_v45 = vld [vmem:[#allocation6 + $0x58] sm:$0xff]  ;;  %v4865_v33 = vpack.c.bf16 %v4845_v6, %v4835_v5 }
 0x695   :  { %4810 = vst [vmem:[#allocation6 + $0xc8] sm:$0x3f] %v4804_v62  ;;  %4820 = vst [vmem:[#allocation6 + $0x88] sm:$0xe0] %v4816_v63  ;;  %v4866_v51 = vpack.c.bf16 %v4846_v45, %v4836_v43  ;;  %v4838_v15 = vld [vmem:[#allocation6 + $0x18] sm:$0xff]  ;;  %v4840_v57 = vld [vmem:[#allocation6 + $0x28] sm:$0xff] }
 0x696   :  { %4822 = vst [vmem:[#allocation6 + $0xd8] sm:$0x1f] %v4816_v63  ;;  %4832 = vst [vmem:[#allocation6 + $0xe8] ss:$-76 sps:$4 sm:$0xff] %v4828_v3   ;;  %v8898_v16 = vld [vmem:[%s11794_s7 + $0x220] ss:$8 sps:$4 sm:$0xff]  }
 0x697   :  { %5890 = vmatprep.mubr.bf16.mxu0 %v4866_v51  ;;  %v4847_v42 = vld [vmem:[#allocation6 + $0x60] sm:$0xff]  ;;  %v4857_v59 = vld [vmem:[#allocation6 + $0xb0] sm:$0xff] }
 0x698   :  { %5891 = vmatmul.mubr.bf16.vlgmr.msra.gmra.mrb[36].mxu0 %v4865_v33  ;;  %v4867_v50 = vpack.c.bf16 %v4847_v42, %v4837_v47  ;;  %v4877_v4 = vpack.c.bf16 %v4857_v59, %v4857_v59  ;;  %v8903_v61 = vld [vmem:[%s11794_s7 + $0x234] ss:$8 sps:$4 sm:$0xff]   ;;  %v8901_v63 = vld [vmem:[%s11794_s7 + $0x230] ss:$8 sps:$4 sm:$0xff]   ;;  %v8906_v3 = vld [vmem:[%s11794_s7 + $0x244] ss:$8 sps:$4 sm:$0xff]  }
 0x699   :  { %5910 = vmatpush1.bf16.msra.mxu0 %v8844_v18  ;;  %5900 = vmatprep.mubr.bf16.mxu0 %v4876_v7  ;;  %v8904_v5 = vld [vmem:[%s11794_s7 + $0x240] ss:$8 sps:$4 sm:$0xff]   ;;  %v8909_v6 = vld [vmem:[%s11794_s7 + $0x254] ss:$8 sps:$4 sm:$0xff]   ;;  %v8907_v43 = vld [vmem:[%s11794_s7 + $0x250] ss:$8 sps:$4 sm:$0xff]  }
 0x69a   :  { %5911 = vmatprep.subr.bf16.mxu0 %v8849_v17  ;;  %v4848_v11 = vld [vmem:[#allocation6 + $0x68] sm:$0xff]  ;;  %v8915_v51 = vld [vmem:[%s11794_s7 + $0x274] ss:$8 sps:$4 sm:$0xff]   ;;  %v8913_v18 = vld [vmem:[%s11794_s7 + $0x270] ss:$8 sps:$4 sm:$0xff]  }
 0x69b   :  { %v4868_v0 = vpack.c.bf16 %v4848_v11, %v4838_v15  ;;  %v4858_v44 = vld [vmem:[#allocation6 + $0xb8] sm:$0xff]  ;;  %v8912_v45 = vld [vmem:[%s11794_s7 + $0x264] ss:$8 sps:$4 sm:$0xff]   ;;  %v8910_v33 = vld [vmem:[%s11794_s7 + $0x260] ss:$8 sps:$4 sm:$0xff]  }
 0x69c   :  { %v4878_v55 = vpack.c.bf16 %v4858_v44, %v4858_v44  ;;  %v4850_v39 = vld [vmem:[#allocation6 + $0x78] sm:$0xff]  ;;  %v8918_v17 = vld [vmem:[%s11794_s7 + $0x284] ss:$8 sps:$4 sm:$0xff]   ;;  %v8916_v7 = vld [vmem:[%s11794_s7 + $0x280] ss:$8 sps:$4 sm:$0xff]  }
 0x69d   :  { %5912 = vmatpush1.bf16.msra.mxu0 %v8847_v8  ;;  %v4870_v62 = vpack.c.bf16 %v4850_v39, %v4840_v57  ;;  %v8921_v8 = vld [vmem:[%s11794_s7 + $0x294] ss:$8 sps:$4 sm:$0xff]   ;;  %v8924_v11 = vld [vmem:[%s11794_s7 + $0x2a4] ss:$8 sps:$4 sm:$0xff]   ;;  %v8925_v15 = vld [vmem:[%s11794_s7 + $0x2b0] ss:$8 sps:$4 sm:$0xff]  }
 0x69e   :  { %5913 = vmatprep.subr.bf16.mxu0 %v8852_v9  ;;  %v8919_v9 = vld [vmem:[%s11794_s7 + $0x290] ss:$8 sps:$4 sm:$0xff]   ;;  %v8954_v44 = vld [vmem:[%s11794_s7 + $0x344] ss:$8 sps:$4 sm:$0xff]   ;;  %v8958_v59 = vld [vmem:[%s11794_s7 + $0x360] ss:$8 sps:$4 sm:$0xff]  }
 0x69f   :  { %v8949_v42 = vld [vmem:[%s11794_s7 + $0x330] ss:$8 sps:$4 sm:$0xff]   ;;  %v9039_v47 = vld [vmem:[%s11795_s8 + $0x8] sm:$0xff]   ;;  %v8963_v39 = vld [vmem:[%s11794_s7 + $0x374] ss:$8 sps:$4 sm:$0xff]  }
 0x6a0   :  { %5901 = vmatmul.mubr.bf16.gmra.mrb[40].mxu0 %v4875_v14  ;;  %v8927_v14 = vld [vmem:[%s11794_s7 + $0x2b4] ss:$8 sps:$4 sm:$0xff]   ;;  %v8964_v57 = vld [vmem:[%s11794_s7 + $0x380] ss:$8 sps:$4 sm:$0xff]  }
 0x6a1   :  { %5914 = vmatpush1.bf16.msra.mxu0 %v8850_v13  ;;  %5941 = vmatprep.mubr.bf16.mxu0 %v4868_v0  ;;  %v8922_v13 = vld [vmem:[%s11794_s7 + $0x2a0] ss:$8 sps:$4 sm:$0xff]  }
 0x6a2   :  { %5915 = vmatprep.subr.bf16.mxu0 %v8855_v38  ;;  %v8930_v38 = vld [vmem:[%s11794_s7 + $0x2c4] ss:$8 sps:$4 sm:$0xff]   ;;  %v8928_v0 = vld [vmem:[%s11794_s7 + $0x2c0] ss:$8 sps:$4 sm:$0xff]  }
 0x6a5   :  { %5916 = vmatpush1.bf16.msra.mxu0 %v8853_v12  ;;  %v8933_v12 = vld [vmem:[%s11794_s7 + $0x2d4] ss:$8 sps:$4 sm:$0xff]  }
 0x6a6   :  { %5917 = vmatprep.subr.bf16.mxu0 %v8858_v10  ;;  %v8931_v10 = vld [vmem:[%s11794_s7 + $0x2d0] ss:$8 sps:$4 sm:$0xff]  }
 0x6a9   :  { %5918 = vmatpush1.bf16.msra.mxu0 %v8856_v52  ;;  %v8936_v52 = vld [vmem:[%s11794_s7 + $0x2e4] ss:$8 sps:$4 sm:$0xff]  }
 0x6aa   :  { %5919 = vmatprep.subr.bf16.mxu0 %v8861_v19  ;;  %v8934_v19 = vld [vmem:[%s11794_s7 + $0x2e0] ss:$8 sps:$4 sm:$0xff]  }
 0x6ad   :  { %5920 = vmatpush1.bf16.msra.mxu0 %v8859_v20  ;;  %v8939_v20 = vld [vmem:[%s11794_s7 + $0x2f4] ss:$8 sps:$4 sm:$0xff]  }
 0x6ae   :  { %5921 = vmatprep.subr.bf16.mxu0 %v8864_v1  ;;  %v8937_v1 = vld [vmem:[%s11794_s7 + $0x2f0] ss:$8 sps:$4 sm:$0xff]  }
 0x6b1   :  { %5922 = vmatpush1.bf16.msra.mxu0 %v8862_v21  ;;  %v8942_v21 = vld [vmem:[%s11794_s7 + $0x304] ss:$8 sps:$4 sm:$0xff]  }
 0x6b2   :  { %5923 = vmatprep.subr.bf16.mxu0 %v8867_v22  ;;  %v4849_v22 = vld [vmem:[#allocation6 + $0x70] sm:$0xff] }
 0x6b5   :  { %5924 = vmatpush1.bf16.msra.mxu0 %v8865_v25  ;;  %v4860_v25 = vld [vmem:[#allocation6 + $0xc8] sm:$0xff] }
 0x6b6   :  { %5925 = vmatprep.subr.bf16.mxu0 %v8870_v26  ;;  %v4839_v26 = vld [vmem:[#allocation6 + $0x20] sm:$0xff] }
 0x6b9   :  { %5926 = vmatpush1.bf16.msra.mxu0 %v8868_v28  ;;  %v8940_v28 = vld [vmem:[%s11794_s7 + $0x300] ss:$8 sps:$4 sm:$0xff]  }
 0x6ba   :  { %5927 = vmatprep.subr.bf16.mxu0 %v8873_v27  ;;  %v4869_v27 = vpack.c.bf16 %v4849_v22, %v4839_v26  ;;  %v8999_v22 = vld [vmem:[%s11794_s7 + $0x434] ss:$8 sps:$4 sm:$0xff]   ;;  %v8997_v26 = vld [vmem:[%s11794_s7 + $0x430] ss:$8 sps:$4 sm:$0xff]  }
 0x6bd   :  { %5928 = vmatpush1.bf16.msra.mxu0 %v8871_v29  ;;  %v8945_v29 = vld [vmem:[%s11794_s7 + $0x314] ss:$8 sps:$4 sm:$0xff]  }
 0x6be   :  { %5929 = vmatprep.subr.bf16.mxu0 %v8876_v30  ;;  %v4880_v30 = vpack.c.bf16 %v4860_v25, %v4860_v25 }
 0x6c1   :  { %5930 = vmatpush1.bf16.msra.mxu0 %v8874_v31  ;;  %v8943_v31 = vld [vmem:[%s11794_s7 + $0x310] ss:$8 sps:$4 sm:$0xff]  }
 0x6c2   :  { %5931 = vmatprep.subr.bf16.mxu0 %v8879_v32  ;;  %v8948_v32 = vld [vmem:[%s11794_s7 + $0x324] ss:$8 sps:$4 sm:$0xff]  }
 0x6c5   :  { %5932 = vmatpush1.bf16.msra.mxu0 %v8877_v40  ;;  %v4859_v40 = vld [vmem:[#allocation6 + $0xc0] sm:$0xff] }
 0x6c6   :  { %5933 = vmatprep.subr.bf16.mxu0 %v8882_v46  ;;  %v4852_v46 = vld [vmem:[#allocation6 + $0x88] sm:$0xff] }
 0x6c9   :  { %5934 = vmatpush1.bf16.msra.mxu0 %v8880_v2  ;;  %v8946_v2 = vld [vmem:[%s11794_s7 + $0x320] ss:$8 sps:$4 sm:$0xff]  }
 0x6ca   :  { %5935 = vmatprep.subr.bf16.mxu0 %v8885_v54  ;;  %v4879_v54 = vpack.c.bf16 %v4859_v40, %v4859_v40  ;;  %v9009_v40 = vld [vmem:[%s11794_s7 + $0x470] ss:$8 sps:$4 sm:$0xff]  }
 0x6cd   :  { %5936 = vmatpush1.bf16.msra.mxu0 %v8883_v23  ;;  %v4842_v23 = vld [vmem:[#allocation6 + $0x38] sm:$0xff] }
 0x6ce   :  { %5937 = vmatprep.subr.bf16.mxu0 %v8888_v24  ;;  %v8951_v24 = vld [vmem:[%s11794_s7 + $0x334] ss:$8 sps:$4 sm:$0xff]  }
 0x6d1   :  { %5938 = vmatpush1.bf16.msra.mxu0 %v8886_v34  ;;  %v4872_v34 = vpack.c.bf16 %v4852_v46, %v4842_v23  ;;  %v9014_v46 = vld [vmem:[%s11794_s7 + $0x484] ss:$8 sps:$4 sm:$0xff]   ;;  %v9015_v23 = vld [vmem:[%s11794_s7 + $0x490] ss:$8 sps:$4 sm:$0xff]  }
 0x6d2   :  { %5939 = vmatprep.subr.bf16.mxu0 %v8891_v35  ;;  %v9036_v35 = vld [vmem:[%s11795_s8 + $0x40] sm:$0xff]  }
 0x6d3   :  { %8078 = vmatprep.subr.bf16.mxu1 %v9036_v35  ;;  %v9023_v35 = vld [vmem:[%s11794_s7 + $0x4b4] ss:$8 sps:$4 sm:$0xff]  }
 0x6d5   :  { %5940 = vmatpush1.bf16.msra.mxu0 %v8889_v36  ;;  %v9037_v36 = vld [vmem:[%s11795_s8] sm:$0xff]  }
 0x6d6   :  { %5960 = vmatprep.subr.bf16.mxu0 %v8894_v37  ;;  %v9038_v37 = vld [vmem:[%s11795_s8 + $0x48] sm:$0xff]   ;;  %8079 = vmatpush3.bf16.msra.mxu1 %v9037_v36  ;;  %v9021_v36 = vld [vmem:[%s11794_s7 + $0x4b0] ss:$8 sps:$4 sm:$0xff]  }
 0x6d7   :  { %8080 = vmatprep.subr.bf16.mxu1 %v9038_v37  ;;  %v9026_v37 = vld [vmem:[%s11794_s7 + $0x4c4] ss:$8 sps:$4 sm:$0xff]  }
 0x6d8   :  { %5942 = vmatmul.mubr.bf16.vlgmr.msra.gmra.mrb[36].mxu0 %v4867_v50  ;;  %v8952_v50 = vld [vmem:[%s11794_s7 + $0x340] ss:$8 sps:$4 sm:$0xff]  }
 0x6d9   :  { %5951 = vmatprep.mubr.bf16.mxu0 %v4878_v55  ;;  %5961 = vmatpush1.bf16.msra.mxu0 %v8892_v48  ;;  %v9040_v48 = vld [vmem:[%s11795_s8 + $0x50] sm:$0xff]  }
 0x6da   :  { %5962 = vmatprep.subr.bf16.mxu0 %v8897_v53  ;;  %v8957_v53 = vld [vmem:[%s11794_s7 + $0x354] ss:$8 sps:$4 sm:$0xff]   ;;  %8081 = vmatpush3.bf16.msra.mxu1 %v9039_v47  ;;  %v9027_v47 = vld [vmem:[%s11794_s7 + $0x4d0] ss:$8 sps:$4 sm:$0xff]  }
 0x6db   :  { %v9041_v55 = vld [vmem:[%s11795_s8 + $0x10] sm:$0xff]   ;;  %8082 = vmatprep.subr.bf16.mxu1 %v9040_v48  ;;  %v9032_v48 = vld [vmem:[%s11794_s7 + $0x4e4] ss:$8 sps:$4 sm:$0xff]  }
 0x6dd   :  { %5963 = vmatpush1.bf16.msra.mxu0 %v8895_v56  ;;  %v8955_v56 = vld [vmem:[%s11794_s7 + $0x350] ss:$8 sps:$4 sm:$0xff]  }
 0x6de   :  { %5964 = vmatprep.subr.bf16.mxu0 %v8900_v49  ;;  %v8960_v49 = vld [vmem:[%s11794_s7 + $0x364] ss:$8 sps:$4 sm:$0xff]   ;;  %8083 = vmatpush3.bf16.msra.mxu1 %v9041_v55  ;;  %v9033_v55 = vld [vmem:[%s11794_s7 + $0x4f0] ss:$8 sps:$4 sm:$0xff]  }
 0x6e0   :  { %5952 = vmatmul.mubr.bf16.gmra.mrb[40].mxu0 %v4877_v4  ;;  %v8966_v4 = vld [vmem:[%s11794_s7 + $0x384] ss:$8 sps:$4 sm:$0xff]  }
 0x6e1   :  { %5965 = vmatpush1.bf16.msra.mxu0 %v8898_v16  ;;  %5992 = vmatprep.mubr.bf16.mxu0 %v4870_v62  ;;  %v8961_v16 = vld [vmem:[%s11794_s7 + $0x370] ss:$8 sps:$4 sm:$0xff]  }
 0x6e2   :  { %5966 = vmatprep.subr.bf16.mxu0 %v8903_v61  ;;  %v8969_v61 = vld [vmem:[%s11794_s7 + $0x394] ss:$8 sps:$4 sm:$0xff]   ;;  %v8967_v62 = vld [vmem:[%s11794_s7 + $0x390] ss:$8 sps:$4 sm:$0xff]  }
 0x6e5   :  { %5967 = vmatpush1.bf16.msra.mxu0 %v8901_v63  ;;  %v8972_v63 = vld [vmem:[%s11794_s7 + $0x3a4] ss:$8 sps:$4 sm:$0xff]  }
 0x6e6   :  { %5968 = vmatprep.subr.bf16.mxu0 %v8906_v3  ;;  %v8970_v3 = vld [vmem:[%s11794_s7 + $0x3a0] ss:$8 sps:$4 sm:$0xff]  }
 0x6e9   :  { %5969 = vmatpush1.bf16.msra.mxu0 %v8904_v5  ;;  %v8975_v5 = vld [vmem:[%s11794_s7 + $0x3b4] ss:$8 sps:$4 sm:$0xff]  }
 0x6ea   :  { %5970 = vmatprep.subr.bf16.mxu0 %v8909_v6  ;;  %v8973_v6 = vld [vmem:[%s11794_s7 + $0x3b0] ss:$8 sps:$4 sm:$0xff]  }
 0x6ed   :  { %5971 = vmatpush1.bf16.msra.mxu0 %v8907_v43  ;;  %v8978_v43 = vld [vmem:[%s11794_s7 + $0x3c4] ss:$8 sps:$4 sm:$0xff]  }
 0x6ee   :  { %5972 = vmatprep.subr.bf16.mxu0 %v8912_v45  ;;  %v8976_v45 = vld [vmem:[%s11794_s7 + $0x3c0] ss:$8 sps:$4 sm:$0xff]  }
 0x6f1   :  { %5973 = vmatpush1.bf16.msra.mxu0 %v8910_v33  ;;  %v8981_v33 = vld [vmem:[%s11794_s7 + $0x3d4] ss:$8 sps:$4 sm:$0xff]  }
 0x6f2   :  { %5974 = vmatprep.subr.bf16.mxu0 %v8915_v51  ;;  %v8979_v51 = vld [vmem:[%s11794_s7 + $0x3d0] ss:$8 sps:$4 sm:$0xff]  }
 0x6f5   :  { %5975 = vmatpush1.bf16.msra.mxu0 %v8913_v18  ;;  %v8984_v18 = vld [vmem:[%s11794_s7 + $0x3e4] ss:$8 sps:$4 sm:$0xff]  }
 0x6f6   :  { %5976 = vmatprep.subr.bf16.mxu0 %v8918_v17  ;;  %v8982_v17 = vld [vmem:[%s11794_s7 + $0x3e0] ss:$8 sps:$4 sm:$0xff]  }
 0x6f9   :  { %5977 = vmatpush1.bf16.msra.mxu0 %v8916_v7  ;;  %v8987_v7 = vld [vmem:[%s11794_s7 + $0x3f4] ss:$8 sps:$4 sm:$0xff]  }
 0x6fa   :  { %5978 = vmatprep.subr.bf16.mxu0 %v8921_v8  ;;  %v8985_v8 = vld [vmem:[%s11794_s7 + $0x3f0] ss:$8 sps:$4 sm:$0xff]  }
 0x6fd   :  { %5979 = vmatpush1.bf16.msra.mxu0 %v8919_v9  ;;  %v8990_v9 = vld [vmem:[%s11794_s7 + $0x404] ss:$8 sps:$4 sm:$0xff]  }
 0x6fe   :  { %5980 = vmatprep.subr.bf16.mxu0 %v8924_v11  ;;  %v4851_v11 = vld [vmem:[#allocation6 + $0x80] sm:$0xff] }
 0x701   :  { %5981 = vmatpush1.bf16.msra.mxu0 %v8922_v13  ;;  %v4862_v13 = vld [vmem:[#allocation6 + $0xd8] sm:$0xff] }
 0x702   :  { %5982 = vmatprep.subr.bf16.mxu0 %v8927_v14  ;;  %v4841_v14 = vld [vmem:[#allocation6 + $0x30] sm:$0xff] }
 0x705   :  { %5983 = vmatpush1.bf16.msra.mxu0 %v8925_v15  ;;  %v8988_v15 = vld [vmem:[%s11794_s7 + $0x400] ss:$8 sps:$4 sm:$0xff]  }
 0x706   :  { %5984 = vmatprep.subr.bf16.mxu0 %v8930_v38  ;;  %v4871_v38 = vpack.c.bf16 %v4851_v11, %v4841_v14 }
 0x709   :  { %5985 = vmatpush1.bf16.msra.mxu0 %v8928_v0  ;;  %v8993_v0 = vld [vmem:[%s11794_s7 + $0x414] ss:$8 sps:$4 sm:$0xff]  }
 0x70a   :  { %5986 = vmatprep.subr.bf16.mxu0 %v8933_v12  ;;  %v4882_v12 = vpack.c.bf16 %v4862_v13, %v4862_v13 }
 0x70d   :  { %5987 = vmatpush1.bf16.msra.mxu0 %v8931_v10  ;;  %v8991_v10 = vld [vmem:[%s11794_s7 + $0x410] ss:$8 sps:$4 sm:$0xff]  }
 0x70e   :  { %5988 = vmatprep.subr.bf16.mxu0 %v8936_v52  ;;  %v8996_v52 = vld [vmem:[%s11794_s7 + $0x424] ss:$8 sps:$4 sm:$0xff]  }
 0x711   :  { %5989 = vmatpush1.bf16.msra.mxu0 %v8934_v19  ;;  %v4861_v19 = vld [vmem:[#allocation6 + $0xd0] sm:$0xff] }
 0x712   :  { %5990 = vmatprep.subr.bf16.mxu0 %v8939_v20  ;;  %v4854_v20 = vld [vmem:[#allocation6 + $0x98] sm:$0xff] }
 0x713   :  { %v4874_v25 = vpack.c.bf16 %v4854_v20, %v11027_v41  ;;  %v9005_v41 = vld [vmem:[%s11794_s7 + $0x454] ss:$8 sps:$4 sm:$0xff]  }
 0x715   :  { %5991 = vmatpush1.bf16.msra.mxu0 %v8937_v1  ;;  %v8994_v1 = vld [vmem:[%s11794_s7 + $0x420] ss:$8 sps:$4 sm:$0xff]  }
 0x716   :  { %6011 = vmatprep.subr.bf16.mxu0 %v8942_v21  ;;  %v4881_v21 = vpack.c.bf16 %v4861_v19, %v4861_v19 }
 0x718   :  { %5993 = vmatmul.mubr.bf16.vlgmr.msra.gmra.mrb[36].mxu0 %v4869_v27  ;;  %v9000_v27 = vld [vmem:[%s11794_s7 + $0x440] ss:$8 sps:$4 sm:$0xff]  }
 0x719   :  { %6002 = vmatprep.mubr.bf16.mxu0 %v4880_v30  ;;  %6012 = vmatpush1.bf16.msra.mxu0 %v8940_v28  ;;  %v9002_v28 = vld [vmem:[%s11794_s7 + $0x444] ss:$8 sps:$4 sm:$0xff]  }
 0x71a   :  { %6013 = vmatprep.subr.bf16.mxu0 %v8945_v29  ;;  %v9003_v29 = vld [vmem:[%s11794_s7 + $0x450] ss:$8 sps:$4 sm:$0xff]   ;;  %v9008_v30 = vld [vmem:[%s11794_s7 + $0x464] ss:$8 sps:$4 sm:$0xff]  }
 0x71d   :  { %6014 = vmatpush1.bf16.msra.mxu0 %v8943_v31  ;;  %v9006_v31 = vld [vmem:[%s11794_s7 + $0x460] ss:$8 sps:$4 sm:$0xff]  }
 0x71e   :  { %6015 = vmatprep.subr.bf16.mxu0 %v8948_v32  ;;  %v9011_v32 = vld [vmem:[%s11794_s7 + $0x474] ss:$8 sps:$4 sm:$0xff]  }
 0x720   :  { %6003 = vmatmul.mubr.bf16.gmra.mrb[40].mxu0 %v4879_v54  ;;  %v9017_v54 = vld [vmem:[%s11794_s7 + $0x494] ss:$8 sps:$4 sm:$0xff]  }
 0x721   :  { %6016 = vmatpush1.bf16.msra.mxu0 %v8946_v2  ;;  %6043 = vmatprep.mubr.bf16.mxu0 %v4872_v34  ;;  %v9012_v2 = vld [vmem:[%s11794_s7 + $0x480] ss:$8 sps:$4 sm:$0xff]  }
 0x722   :  { %6017 = vmatprep.subr.bf16.mxu0 %v8951_v24  ;;  %v9020_v24 = vld [vmem:[%s11794_s7 + $0x4a4] ss:$8 sps:$4 sm:$0xff]   ;;  %v9018_v34 = vld [vmem:[%s11794_s7 + $0x4a0] ss:$8 sps:$4 sm:$0xff]  }
 0x725   :  { %6018 = vmatpush1.bf16.msra.mxu0 %v8949_v42  ;;  %v9024_v42 = vld [vmem:[%s11794_s7 + $0x4c0] ss:$8 sps:$4 sm:$0xff]  }
 0x726   :  { %6019 = vmatprep.subr.bf16.mxu0 %v8954_v44  ;;  %v9029_v44 = vld [vmem:[%s11794_s7 + $0x4d4] ss:$8 sps:$4 sm:$0xff]  }
 0x729   :  { %6020 = vmatpush1.bf16.msra.mxu0 %v8952_v50  ;;  %v9030_v50 = vld [vmem:[%s11794_s7 + $0x4e0] ss:$8 sps:$4 sm:$0xff]  }
 0x72a   :  { %6021 = vmatprep.subr.bf16.mxu0 %v8957_v53  ;;  %v9035_v53 = vld [vmem:[%s11794_s7 + $0x4f4] ss:$8 sps:$4 sm:$0xff]  }
 0x72d   :  { %6022 = vmatpush1.bf16.msra.mxu0 %v8955_v56  ;;  %v4853_v56 = vld [vmem:[#allocation6 + $0x90] sm:$0xff] }
 0x72e   :  { %6023 = vmatprep.subr.bf16.mxu0 %v8960_v49  ;;  %v4864_v49 = vld [vmem:[#allocation6 + $0xe8] sm:$0xff] }
 0x731   :  { %6024 = vmatpush1.bf16.msra.mxu0 %v8958_v59  ;;  %v4843_v59 = vld [vmem:[#allocation6 + $0x40] sm:$0xff] }
 0x732   :  { %6025 = vmatprep.subr.bf16.mxu0 %v8963_v39  ;;  %v4873_v39 = vpack.c.bf16 %v4853_v56, %v4843_v59 }
 0x735   :  { %6026 = vmatpush1.bf16.msra.mxu0 %v8961_v16  ;;  %v4884_v16 = vpack.c.bf16 %v4864_v49, %v4864_v49 }
 0x736   :  { %6027 = vmatprep.subr.bf16.mxu0 %v8966_v4  ;;  %v4863_v4 = vld [vmem:[#allocation6 + $0xe0] sm:$0xff] }
 0x739   :  { %6028 = vmatpush1.bf16.msra.mxu0 %v8964_v57  ;;  %v4883_v57 = vpack.c.bf16 %v4863_v4, %v4863_v4 }
 0x73a   :  { %6029 = vmatprep.subr.bf16.mxu0 %v8969_v61  ;;  %v9042_v61 = vld [vmem:[%s11795_s8 + $0x58] sm:$0xff]  }
 0x73b   :  { %8084 = vmatprep.subr.bf16.mxu1 %v9042_v61 }
 0x73d   :  { %6030 = vmatpush1.bf16.msra.mxu0 %v8967_v62  ;;  %v9043_v62 = vld [vmem:[%s11795_s8 + $0x18] sm:$0xff]  }
 0x73e   :  { %6031 = vmatprep.subr.bf16.mxu0 %v8972_v63  ;;  %8085 = vmatpush3.bf16.msra.mxu1 %v9043_v62  ;;  %v9044_v63 = vld [vmem:[%s11795_s8 + $0x60] sm:$0xff]  }
 0x73f   :  { %8086 = vmatprep.subr.bf16.mxu1 %v9044_v63 }
 0x741   :  { %6032 = vmatpush1.bf16.msra.mxu0 %v8970_v3  ;;  %v9045_v3 = vld [vmem:[%s11795_s8 + $0x20] sm:$0xff]  }
 0x742   :  { %6033 = vmatprep.subr.bf16.mxu0 %v8975_v5  ;;  %8087 = vmatpush3.bf16.msra.mxu1 %v9045_v3  ;;  %v9046_v5 = vld [vmem:[%s11795_s8 + $0x68] sm:$0xff]  }
 0x743   :  { %8088 = vmatprep.subr.bf16.mxu1 %v9046_v5 }
 0x745   :  { %6034 = vmatpush1.bf16.msra.mxu0 %v8973_v6  ;;  %v9047_v6 = vld [vmem:[%s11795_s8 + $0x28] sm:$0xff]  }
 0x746   :  { %6035 = vmatprep.subr.bf16.mxu0 %v8978_v43  ;;  %8089 = vmatpush3.bf16.msra.mxu1 %v9047_v6  ;;  %v9048_v43 = vld [vmem:[%s11795_s8 + $0x70] sm:$0xff]  }
 0x747   :  { %8090 = vmatprep.subr.bf16.mxu1 %v9048_v43 }
 0x749   :  { %6036 = vmatpush1.bf16.msra.mxu0 %v8976_v45  ;;  %v9049_v45 = vld [vmem:[%s11795_s8 + $0x30] sm:$0xff]  }
 0x74a   :  { %6037 = vmatprep.subr.bf16.mxu0 %v8981_v33  ;;  %v9050_v33 = vld [vmem:[%s11795_s8 + $0x78] sm:$0xff]   ;;  %8091 = vmatpush3.bf16.msra.mxu1 %v9049_v45 }
 0x74b   :  { %8092 = vmatprep.subr.bf16.mxu1 %v9050_v33 }
 0x74d   :  { %6038 = vmatpush1.bf16.msra.mxu0 %v8979_v51  ;;  %v9051_v51 = vld [vmem:[%s11795_s8 + $0x38] sm:$0xff]  }
 0x74e   :  { %6039 = vmatprep.subr.bf16.mxu0 %v8984_v18  ;;  %v9052_v18 = vld [vmem:[%s11795_s8 + $0xc0] sm:$0xff]   ;;  %8093 = vmatpush3.bf16.msra.mxu1 %v9051_v51 }
 0x74f   :  { %8106 = vmatprep.subr.bf16.mxu1 %v9052_v18 }
 0x751   :  { %6040 = vmatpush1.bf16.msra.mxu0 %v8982_v17  ;;  %v7657_v17 = vld [vmem:[%s11789_s2 + $0x3] ss:$8 sm:$0x3] }
 0x752   :  { %6041 = vmatprep.subr.bf16.mxu0 %v8987_v7  ;;  %v5051_v7 = vrot.slane %v7657_v17, %v9757_v58 }
 0x755   :  { %6042 = vmatpush1.bf16.msra.mxu0 %v8985_v8  ;;  %v5055_v8 = vrot.slane %v7657_v17, %v9760_v60 }
 0x756   :  { %6062 = vmatprep.subr.bf16.mxu0 %v8990_v9 }
 0x758   :  { %6044 = vmatmul.mubr.bf16.vlgmr.msra.gmra.mrb[36].mxu0 %v4871_v38 }
 0x759   :  { %6053 = vmatprep.mubr.bf16.mxu0 %v4882_v12  ;;  %6063 = vmatpush1.bf16.msra.mxu0 %v8988_v15 }
 0x75a   :  { %6064 = vmatprep.subr.bf16.mxu0 %v8993_v0 }
 0x75d   :  { %6065 = vmatpush1.bf16.msra.mxu0 %v8991_v10 }
 0x75e   :  { %6066 = vmatprep.subr.bf16.mxu0 %v8996_v52 }
 0x760   :  { %6054 = vmatmul.mubr.bf16.gmra.mrb[40].mxu0 %v4881_v21 }
 0x761   :  { %6067 = vmatpush1.bf16.msra.mxu0 %v8994_v1  ;;  %6094 = vmatprep.mubr.bf16.mxu0 %v4874_v25 }
 0x762   :  { %6068 = vmatprep.subr.bf16.mxu0 %v8999_v22 }
 0x765   :  { %6069 = vmatpush1.bf16.msra.mxu0 %v8997_v26 }
 0x766   :  { %6070 = vmatprep.subr.bf16.mxu0 %v9002_v28 }
 0x769   :  { %6071 = vmatpush1.bf16.msra.mxu0 %v9000_v27 }
 0x76a   :  { %6072 = vmatprep.subr.bf16.mxu0 %v9005_v41 }
 0x76d   :  { %6073 = vmatpush1.bf16.msra.mxu0 %v9003_v29 }
 0x76e   :  { %6074 = vmatprep.subr.bf16.mxu0 %v9008_v30 }
 0x771   :  { %6075 = vmatpush1.bf16.msra.mxu0 %v9006_v31 }
 0x772   :  { %6076 = vmatprep.subr.bf16.mxu0 %v9011_v32 }
 0x775   :  { %6077 = vmatpush1.bf16.msra.mxu0 %v9009_v40 }
 0x776   :  { %6078 = vmatprep.subr.bf16.mxu0 %v9014_v46 }
 0x779   :  { %6079 = vmatpush1.bf16.msra.mxu0 %v9012_v2 }
 0x77a   :  { %6080 = vmatprep.subr.bf16.mxu0 %v9017_v54 }
 0x77d   :  { %6081 = vmatpush1.bf16.msra.mxu0 %v9015_v23 }
 0x77e   :  { %6082 = vmatprep.subr.bf16.mxu0 %v9020_v24 }
 0x781   :  { %6083 = vmatpush1.bf16.msra.mxu0 %v9018_v34 }
 0x782   :  { %6084 = vmatprep.subr.bf16.mxu0 %v9023_v35 }
 0x785   :  { %6085 = vmatpush1.bf16.msra.mxu0 %v9021_v36 }
 0x786   :  { %6086 = vmatprep.subr.bf16.mxu0 %v9026_v37 }
 0x789   :  { %6087 = vmatpush1.bf16.msra.mxu0 %v9024_v42 }
 0x78a   :  { %6088 = vmatprep.subr.bf16.mxu0 %v9029_v44 }
 0x78d   :  { %6089 = vmatpush1.bf16.msra.mxu0 %v9027_v47 }
 0x78e   :  { %6090 = vmatprep.subr.bf16.mxu0 %v9032_v48 }
 0x791   :  { %6091 = vmatpush1.bf16.msra.mxu0 %v9030_v50 }
 0x792   :  { %6092 = vmatprep.subr.bf16.mxu0 %v9035_v53 }
 0x795   :  { %6093 = vmatpush1.bf16.msra.mxu0 %v9033_v55 }
 0x798   :  { %6095 = vmatmul.mubr.bf16.vlgmr.msra.gmra.mrb[36].mxu0 %v4873_v39 }
 0x799   :  { %6104 = vmatprep.mubr.bf16.mxu0 %v4884_v16 }
 0x7a0   :  { %6105 = vmatmul.mubr.bf16.gmra.mrb[40].mxu0 %v4883_v57 }
 0x86b   :  { %v6096_v9 = vpop.f32.mrb[36].mxu0 }
 0x86c   :  { %v8234_v11 = vadd.f32 %v6096_v9, %v5051_v7  ;;  %v6098_v13 = vpop.f32.mrb[37].mxu0 }
 0x86d   :  { %v8235_v14 = vadd.f32 %v6098_v13, %v5055_v8  ;;  %v6100_v15 = vpop.f32.mrb[38].mxu0 }
 0x86e   :  { %v11479_v38 = vmax.f32 %v8234_v11, 0.0  ;;  %v8236_v0 = vadd.f32 %v6100_v15, %v5051_v7  ;;  %v6102_v12 = vpop.f32.mrb[39].mxu0 }
 0x86f   :  { %v11481_v10 = vmax.f32 %v8235_v14, 0.0  ;;  %v8237_v52 = vadd.f32 %v6102_v12, %v5055_v8  ;;  %v9053_v12 = vld [vmem:[%s11795_s8 + $0x80] sm:$0xff]  }
 0x870   :  { %v6123_v58 = vrot.slane %v11479_v38, 4  ;;  %v6138_v60 = vrot.slane %v11479_v38, 5  ;;  %v6154_v19 = vrot.slane %v11479_v38, 6  ;;  %v6170_v20 = vrot.slane %v11479_v38, 7 }
 0x871   :  { %v6124_v1 = vrot.slane %v11481_v10, 4  ;;  %v6139_v21 = vrot.slane %v11481_v10, 5  ;;  %v6155_v22 = vrot.slane %v11481_v10, 6  ;;  %v6171_v25 = vrot.slane %v11481_v10, 7  ;;  %6187 = vst.msk [vmem:[#allocation7 + $0x48] sm:$0xff] %vm898_vm4, %v11481_v10 }
 0x872   :  { %6133 = vst [vmem:[#allocation7] sm:$0xf0] %v6123_v58  ;;  %6148 = vst [vmem:[#allocation7 + $0x10] sm:$0xf8] %v6138_v60  ;;  %v11499_v26 = vmax.f32 %v8236_v0, 0.0  ;;  %v11501_v28 = vmax.f32 %v8237_v52, 0.0 }
 0x873   :  { %6164 = vst [vmem:[#allocation7 + $0x20] sm:$0xfc] %v6154_v19  ;;  %6180 = vst [vmem:[#allocation7 + $0x30] sm:$0xfe] %v6170_v20  ;;  %v6106_v27 = vpop.f32.mrb[40].mxu0 }
 0x874   :  { %6135 = vst.msk [vmem:[#allocation7 + $0x8] sm:$0xf0] %vm6134_vm14, %v6124_v1  ;;  %v6140_v41 = vrot.slane %v11499_v26, 5  ;;  %v6156_v29 = vrot.slane %v11499_v26, 6  ;;  %v6172_v30 = vrot.slane %v11499_v26, 7  ;;  %v8238_v31 = vadd.f32 %v6106_v27, %v5051_v7  ;;  %v6108_v32 = vpop.f32.mrb[41].mxu0 }
 0x875   :  { %6150 = vst.msk [vmem:[#allocation7 + $0x18] sm:$0xf8] %vm6149_vm15, %v6139_v21  ;;  %6188 = vst [vmem:[#allocation7 + $0x90] ss:$20 sps:$4 sm:$0xff] %v11499_v26   ;;  %v6125_v40 = vrot.slane %v11499_v26, 4  ;;  %v6197_v46 = vrot.slane %v11499_v26, 1  ;;  %v8239_v34 = vadd.f32 %v6108_v32, %v5055_v8 }
 0x876   :  { %6166 = vst.msk [vmem:[#allocation7 + $0x28] sm:$0xfc] %vm6165_vm1, %v6155_v22  ;;  %v6211_v2 = vrot.slane %v11499_v26, 2  ;;  %v6225_v54 = vrot.slane %v11499_v26, 3  ;;  %v6110_v23 = vpop.f32.mrb[42].mxu0  ;;  %v11519_v24 = vmax.f32 %v8238_v31, 0.0  ;;  %v6141_v17 = vsel %vm957_vm8, %v6138_v60, %v6140_v41 }
 0x877   :  { %6182 = vst.msk [vmem:[#allocation7 + $0x38] sm:$0xfe] %vm6181_vm2, %v6171_v25  ;;  %v6127_v35 = vrot.slane %v11501_v28, 4  ;;  %v6142_v36 = vrot.slane %v11501_v28, 5  ;;  %v6111_v37 = vpop.f32.mrb[43].mxu0  ;;  %v11524_v42 = vsel %vm167_vm3, %v6123_v58, %v6125_v40  ;;  %v6158_v44 = vrot.slane %v11501_v28, 6 }
 0x878   :  { %6192 = vst.msk [vmem:[#allocation7 + $0xa8] sm:$0xf0] %vm6134_vm14, %v11501_v28  ;;  %v6174_v47 = vrot.slane %v11501_v28, 7  ;;  %v6200_v48 = vrot.slane %v11501_v28, 1  ;;  %v6198_v50 = vrot.slane %v11519_v24, 1  ;;  %v6212_v53 = vrot.slane %v11519_v24, 2 }
 0x879   :  { %6190 = vst.msk [vmem:[#allocation7 + $0x98] sm:$0xf] %vm6189_vm11, %v11501_v28  ;;  %v6226_v55 = vrot.slane %v11519_v24, 3  ;;  %v6239_v56 = vrot.slane %v11519_v24, 4  ;;  %v6118_v49 = vmax.f32 %v8239_v34, 0.0  ;;  %v6128_v59 = vsel %vm167_vm3, %v6124_v1, %v6127_v35  ;;  %v6251_v13 = vld [vmem:[#allocation7] sm:$0xff] }
 0x87a   :  { %v6143_v39 = vsel %vm957_vm8, %v6139_v21, %v6142_v36  ;;  %v6159_v16 = vsel %vm968_vm9, %v6155_v22, %v6158_v44  ;;  %v6199_v4 = vsel %vm904_vm5, %v6197_v46, %v6198_v50  ;;  %6209 = vst [vmem:[#allocation7 + $0x100] sm:$0x7f] %v6198_v50  ;;  %v6213_v57 = vsel %vm915_vm6, %v6211_v2, %v6212_v53  ;;  %v9056_v1 = vld [vmem:[%s11795_s8 + $0xd0] sm:$0xff]   ;;  %v9058_v27 = vld [vmem:[%s11795_s8 + $0xd8] sm:$0xff]   ;;  %v9061_v31 = vld [vmem:[%s11795_s8 + $0xa0] sm:$0xff]  }
 0x87b   :  { %6223 = vst [vmem:[#allocation7 + $0x110] sm:$0x3f] %v6212_v53  ;;  %v6227_v61 = vsel %vm926_vm7, %v6225_v54, %v6226_v55  ;;  %6237 = vst [vmem:[#allocation7 + $0x120] sm:$0x1f] %v6226_v55  ;;  %v11540_v62 = vsel %vm167_vm3, %v6125_v40, %v6239_v56  ;;  %v6175_v63 = vsel %vm979_vm10, %v6171_v25, %v6174_v47  ;;  %v6201_v3 = vrot.slane %v6118_v49, 1  ;;  %v6252_v14 = vld [vmem:[#allocation7 + $0x8] sm:$0xff] }
 0x87c   :  { %6249 = vst [vmem:[#allocation7 + $0x130] sm:$0xf] %v6239_v56  ;;  %6137 = vst.msk [vmem:[#allocation7 + $0x58] sm:$0xff] %vm898_vm4, %v6128_v59  ;;  %v6214_v5 = vrot.slane %v11501_v28, 2  ;;  %v6215_v6 = vrot.slane %v6118_v49, 2  ;;  %v6228_v43 = vrot.slane %v11501_v28, 3  ;;  %v6157_v9 = vsel %vm968_vm9, %v6154_v19, %v6156_v29 }
 0x87d   :  { %6153 = vst.msk [vmem:[#allocation7 + $0x68] sm:$0x7f] %vm6152_vm12, %v6143_v39  ;;  %6207 = vst [vmem:[#allocation7 + $0xb0] sm:$0xf8] %v6199_v4  ;;  %v6229_v45 = vrot.slane %v6118_v49, 3  ;;  %v6241_v33 = vrot.slane %v6118_v49, 4  ;;  %v6202_v51 = vsel %vm904_vm5, %v6200_v48, %v6201_v3  ;;  %v6173_v11 = vsel %vm979_vm10, %v6170_v20, %v6172_v30 }
 0x87e   :  { %6169 = vst.msk [vmem:[#allocation7 + $0x78] sm:$0x3f] %vm6168_vm13, %v6159_v16  ;;  %6221 = vst [vmem:[#allocation7 + $0xc0] sm:$0xfc] %v6213_v57  ;;  %v6216_v18 = vsel %vm915_vm6, %v6214_v5, %v6215_v6  ;;  %v6291_v58 = vpack.c.bf16 %v11524_v42, %v6251_v13  ;;  %v9054_v19 = vld [vmem:[%s11795_s8 + $0xc8] sm:$0xff]   ;;  %v9057_v25 = vld [vmem:[%s11795_s8 + $0x90] sm:$0xff]  }
 0x87f   :  { %6235 = vst [vmem:[#allocation7 + $0xd0] sm:$0xfe] %v6227_v61  ;;  %6194 = vst.msk [vmem:[#allocation7 + $0xf8] sm:$0xff] %vm898_vm4, %v6118_v49  ;;  %v6230_v7 = vsel %vm926_vm7, %v6228_v43, %v6229_v45  ;;  %v6242_v8 = vsel %vm167_vm3, %v6127_v35, %v6241_v33  ;;  %v6272_v10 = vld [vmem:[#allocation7 + $0xa8] sm:$0xff]  ;;  %v9055_v20 = vld [vmem:[%s11795_s8 + $0x88] sm:$0xff]  }
 0x880   :  { %6185 = vst.msk [vmem:[#allocation7 + $0x88] sm:$0x1f] %vm6184_vm0, %v6175_v63  ;;  %6238 = vst.msk [vmem:[#allocation7 + $0x128] sm:$0x1f] %vm6184_vm0, %v6229_v45  ;;  %v6271_v21 = vld [vmem:[#allocation7 + $0xa0] sm:$0xff]  ;;  %v6254_v28 = vld [vmem:[#allocation7 + $0x18] sm:$0xff] }
 0x881   :  { %6210 = vst.msk [vmem:[#allocation7 + $0x108] sm:$0x7f] %vm6152_vm12, %v6201_v3  ;;  %6151 = vst [vmem:[#allocation7 + $0x60] sm:$0x7f] %v6141_v17  ;;  %v6301_v26 = vpack.c.bf16 %v11519_v24, %v6271_v21  ;;  %v9059_v29 = vld [vmem:[%s11795_s8 + $0x98] sm:$0xff]   ;;  %v9060_v30 = vld [vmem:[%s11795_s8 + $0xe0] sm:$0xff]  }
 0x882   :  { %6224 = vst.msk [vmem:[#allocation7 + $0x118] sm:$0x3f] %vm6168_vm13, %v6215_v6  ;;  %6167 = vst [vmem:[#allocation7 + $0x70] sm:$0x3f] %v6157_v9  ;;  %v9062_v32 = vld [vmem:[%s11795_s8 + $0xe8] sm:$0xff]   ;;  %v9064_v46 = vld [vmem:[%s11795_s8 + $0xf0] sm:$0xff]  }
 0x883   :  { %6208 = vst.msk [vmem:[#allocation7 + $0xb8] sm:$0xf8] %vm6149_vm15, %v6202_v51  ;;  %6183 = vst [vmem:[#allocation7 + $0x80] sm:$0x1f] %v6173_v11  ;;  %v6262_v15 = vld [vmem:[#allocation7 + $0x58] sm:$0xff]  ;;  %v9063_v40 = vld [vmem:[%s11795_s8 + $0xa8] sm:$0xff]  }
 0x884   :  { %6222 = vst.msk [vmem:[#allocation7 + $0xc8] sm:$0xfc] %vm6165_vm1, %v6216_v18  ;;  %v6292_v0 = vpack.c.bf16 %v6262_v15, %v6252_v14  ;;  %v6264_v22 = vld [vmem:[#allocation7 + $0x68] sm:$0xff]  ;;  %v9066_v54 = vld [vmem:[%s11795_s8 + $0xf8] sm:$0xff]   ;;  %v9068_v24 = vld [vmem:[%s11795_s8 + $0x140] sm:$0xff]   ;;  %vm11801_vm0 = vcmask 130048  }
 0x885   :  { %6250 = vst.msk [vmem:[#allocation7 + $0x138] sm:$0xf] %vm6189_vm11, %v6241_v33  ;;  %v6294_v41 = vpack.c.bf16 %v6264_v22, %v6254_v28  ;;  %v9065_v2 = vld [vmem:[%s11795_s8 + $0xb0] sm:$0xff]   ;;  %v9067_v23 = vld [vmem:[%s11795_s8 + $0xb8] sm:$0xff]   ;;  %v9069_v42 = vld [vmem:[%s11795_s8 + $0x100] sm:$0xff]  }
 0x886   :  { %6236 = vst.msk [vmem:[#allocation7 + $0xd8] sm:$0xfe] %vm6181_vm2, %v6230_v7  ;;  %v6282_v52 = vld [vmem:[#allocation7 + $0xf8] sm:$0xff]  ;;  %6984 = vmatprep.mubr.bf16.mxu1 %v6292_v0  ;;  %v6253_v37 = vld [vmem:[#allocation7 + $0x10] sm:$0xff]  ;;  %v9070_v47 = vld [vmem:[%s11795_s8 + $0x148] sm:$0xff]  }
 0x887   :  { %6248 = vst.msk [vmem:[#allocation7 + $0xe8] sm:$0xff] %vm898_vm4, %v6242_v8  ;;  %v6302_v60 = vpack.c.bf16 %v6282_v52, %v6272_v10  ;;  %6985 = vmatmul.mubr.bf16.vlgmr.msra.gmra.mrb[48].mxu1 %v6291_v58  ;;  %v9071_v50 = vld [vmem:[%s11795_s8 + $0x108] sm:$0xff]   ;;  %v9072_v53 = vld [vmem:[%s11795_s8 + $0x150] sm:$0xff]   ;;  %v6273_v55 = vld [vmem:[#allocation7 + $0xb0] sm:$0xff] }
 0x888   :  { %8107 = vmatpush3.bf16.msra.mxu1 %v9053_v12  ;;  %v6263_v34 = vld [vmem:[#allocation7 + $0x60] sm:$0xff]  ;;  %v6284_v36 = vld [vmem:[#allocation7 + $0x108] sm:$0xff]  ;;  %v6266_v49 = vld [vmem:[#allocation7 + $0x78] sm:$0xff] }
 0x889   :  { %6992 = vmatprep.mubr.bf16.mxu1 %v6302_v60  ;;  %8108 = vmatprep.subr.bf16.mxu1 %v9054_v19  ;;  %v6293_v44 = vpack.c.bf16 %v6263_v34, %v6253_v37  ;;  %v6283_v56 = vld [vmem:[#allocation7 + $0x100] sm:$0xff]  ;;  %v9073_v59 = vld [vmem:[%s11795_s8 + $0x110] sm:$0xff]   ;;  %v9074_v4 = vld [vmem:[%s11795_s8 + $0x158] sm:$0xff]  }
 0x88a   :  { %v6274_v35 = vld [vmem:[#allocation7 + $0xb8] sm:$0xff]  ;;  %v6303_v39 = vpack.c.bf16 %v6283_v56, %v6273_v55  ;;  %v6256_v16 = vld [vmem:[#allocation7 + $0x28] sm:$0xff]  ;;  %v9075_v61 = vld [vmem:[%s11795_s8 + $0x118] sm:$0xff]  }
 0x88b   :  { %v6304_v48 = vpack.c.bf16 %v6284_v36, %v6274_v35  ;;  %v6296_v57 = vpack.c.bf16 %v6266_v49, %v6256_v16  ;;  %v9076_v63 = vld [vmem:[%s11795_s8 + $0x160] sm:$0xff]   ;;  %v9078_v5 = vld [vmem:[%s11795_s8 + $0x168] sm:$0xff]   ;;  %v9080_v43 = vld [vmem:[%s11795_s8 + $0x170] sm:$0xff]  }
 0x88c   :  { %8109 = vmatpush3.bf16.msra.mxu1 %v9055_v20  ;;  %v9077_v3 = vld [vmem:[%s11795_s8 + $0x120] sm:$0xff]   ;;  %v9079_v6 = vld [vmem:[%s11795_s8 + $0x128] sm:$0xff]   ;;  %v9081_v45 = vld [vmem:[%s11795_s8 + $0x130] sm:$0xff]  }
 0x88d   :  { %8110 = vmatprep.subr.bf16.mxu1 %v9056_v1  ;;  %v9082_v33 = vld [vmem:[%s11795_s8 + $0x178] sm:$0xff]   ;;  %v9084_v18 = vld [vmem:[%s11795_s8 + $0x1c0] sm:$0xff]   ;;  %v6276_v7 = vld [vmem:[#allocation7 + $0xc8] sm:$0xff] }
 0x88e   :  { %v9083_v51 = vld [vmem:[%s11795_s8 + $0x138] sm:$0xff]   ;;  %v6286_v8 = vld [vmem:[#allocation7 + $0x118] sm:$0xff]  ;;  %v6255_v9 = vld [vmem:[#allocation7 + $0x20] sm:$0xff] }
 0x88f   :  { %6993 = vmatmul.mubr.bf16.gmra.mrb[52].mxu1 %v6301_v26  ;;  %v6265_v17 = vld [vmem:[#allocation7 + $0x70] sm:$0xff]  ;;  %v9085_v11 = vld [vmem:[%s11795_s8 + $0x180] sm:$0xff]   ;;  %v9086_v14 = vld [vmem:[%s11795_s8 + $0x1c8] sm:$0xff]   ;;  %v6306_v15 = vpack.c.bf16 %v6286_v8, %v6276_v7 }
 0x890   :  { %8111 = vmatpush3.bf16.msra.mxu1 %v9057_v25  ;;  %7033 = vmatprep.mubr.bf16.mxu1 %v6294_v41  ;;  %v6295_v13 = vpack.c.bf16 %v6265_v17, %v6255_v9  ;;  %v9087_v0 = vld [vmem:[%s11795_s8 + $0x188] sm:$0xff]   ;;  %v9088_v12 = vld [vmem:[%s11795_s8 + $0x1d0] sm:$0xff]   ;;  %v6285_v52 = vld [vmem:[#allocation7 + $0x110] sm:$0xff] }
 0x891   :  { %8112 = vmatprep.subr.bf16.mxu1 %v9058_v27  ;;  %v6275_v10 = vld [vmem:[#allocation7 + $0xc0] sm:$0xff]  ;;  %v6268_v58 = vld [vmem:[#allocation7 + $0x88] sm:$0xff]  ;;  %v6258_v20 = vld [vmem:[#allocation7 + $0x38] sm:$0xff] }
 0x892   :  { %v9089_v60 = vld [vmem:[%s11795_s8 + $0x190] sm:$0xff]   ;;  %v6305_v19 = vpack.c.bf16 %v6285_v52, %v6275_v10  ;;  %v9090_v1 = vld [vmem:[%s11795_s8 + $0x1d8] sm:$0xff]   ;;  %v6298_v21 = vpack.c.bf16 %v6268_v58, %v6258_v20  ;;  %v9092_v25 = vld [vmem:[%s11795_s8 + $0x1e0] sm:$0xff]  }
 0x893   :  { %v9091_v22 = vld [vmem:[%s11795_s8 + $0x198] sm:$0xff]   ;;  %v9093_v26 = vld [vmem:[%s11795_s8 + $0x1a0] sm:$0xff]   ;;  %v9094_v28 = vld [vmem:[%s11795_s8 + $0x1e8] sm:$0xff]  }
 0x894   :  { %8113 = vmatpush3.bf16.msra.mxu1 %v9059_v29  ;;  %v9095_v27 = vld [vmem:[%s11795_s8 + $0x1a8] sm:$0xff]   ;;  %v9096_v41 = vld [vmem:[%s11795_s8 + $0x1f0] sm:$0xff]   ;;  %v9106_v55 = vld [vmem:[%s11795_s8 + $0x258] sm:$0xff]  }
 0x895   :  { %8114 = vmatprep.subr.bf16.mxu1 %v9060_v30  ;;  %v9097_v29 = vld [vmem:[%s11795_s8 + $0x1b0] sm:$0xff]   ;;  %v9098_v30 = vld [vmem:[%s11795_s8 + $0x1f8] sm:$0xff]   ;;  %v9102_v34 = vld [vmem:[%s11795_s8 + $0x248] sm:$0xff]  }
 0x896   :  { %v9103_v36 = vld [vmem:[%s11795_s8 + $0x208] sm:$0xff]   ;;  %v9104_v37 = vld [vmem:[%s11795_s8 + $0x250] sm:$0xff]   ;;  %v9107_v49 = vld [vmem:[%s11795_s8 + $0x218] sm:$0xff]  }
 0x897   :  { %v9110_v16 = vld [vmem:[%s11795_s8 + $0x268] sm:$0xff]   ;;  %vm11802_vm3 = vmmov %vm11801_vm0 }
 0x898   :  { %8115 = vmatpush3.bf16.msra.mxu1 %v9061_v31  ;;  %v9099_v31 = vld [vmem:[%s11795_s8 + $0x1b8] sm:$0xff]   ;;  %vm11803_vm4 = vmmov %vm11801_vm0 }
 0x899   :  { %8116 = vmatprep.subr.bf16.mxu1 %v9062_v32  ;;  %v9100_v32 = vld [vmem:[%s11795_s8 + $0x240] sm:$0xff]   ;;  %vm11804_vm5 = vmmov %vm11801_vm0 }
 0x89c   :  { %8117 = vmatpush3.bf16.msra.mxu1 %v9063_v40  ;;  %v6267_v40 = vld [vmem:[#allocation7 + $0x80] sm:$0xff] }
 0x89d   :  { %8118 = vmatprep.subr.bf16.mxu1 %v9064_v46  ;;  %v6278_v46 = vld [vmem:[#allocation7 + $0xd8] sm:$0xff] }
 0x8a0   :  { %8119 = vmatpush3.bf16.msra.mxu1 %v9065_v2  ;;  %v6288_v2 = vld [vmem:[#allocation7 + $0x128] sm:$0xff] }
 0x8a1   :  { %8120 = vmatprep.subr.bf16.mxu1 %v9066_v54  ;;  %v6257_v54 = vld [vmem:[#allocation7 + $0x30] sm:$0xff]  ;;  %v6308_v35 = vpack.c.bf16 %v6288_v2, %v6278_v46 }
 0x8a4   :  { %8121 = vmatpush3.bf16.msra.mxu1 %v9067_v23  ;;  %v9101_v23 = vld [vmem:[%s11795_s8 + $0x200] sm:$0xff]  }
 0x8a5   :  { %8134 = vmatprep.subr.bf16.mxu1 %v9068_v24  ;;  %v6297_v24 = vpack.c.bf16 %v6267_v40, %v6257_v54 }
 0x8a7   :  { %7034 = vmatmul.mubr.bf16.vlgmr.msra.gmra.mrb[56].mxu1 %v6293_v44  ;;  %v6287_v44 = vld [vmem:[#allocation7 + $0x120] sm:$0xff] }
 0x8a8   :  { %7041 = vmatprep.mubr.bf16.mxu1 %v6304_v48  ;;  %8135 = vmatpush3.bf16.msra.mxu1 %v9069_v42  ;;  %v6277_v42 = vld [vmem:[#allocation7 + $0xd0] sm:$0xff]  ;;  %v9105_v48 = vld [vmem:[%s11795_s8 + $0x210] sm:$0xff]  }
 0x8a9   :  { %8136 = vmatprep.subr.bf16.mxu1 %v9070_v47  ;;  %v6270_v47 = vld [vmem:[#allocation7 + $0x98] sm:$0xff] }
 0x8ac   :  { %8137 = vmatpush3.bf16.msra.mxu1 %v9071_v50  ;;  %v6307_v50 = vpack.c.bf16 %v6287_v44, %v6277_v42 }
 0x8ad   :  { %8138 = vmatprep.subr.bf16.mxu1 %v9072_v53  ;;  %v6260_v53 = vld [vmem:[#allocation7 + $0x48] sm:$0xff] }
 0x8ae   :  { %v6300_v56 = vpack.c.bf16 %v6270_v47, %v6260_v53 }
 0x8af   :  { %7042 = vmatmul.mubr.bf16.gmra.mrb[60].mxu1 %v6303_v39  ;;  %v9109_v39 = vld [vmem:[%s11795_s8 + $0x220] sm:$0xff]  }
 0x8b0   :  { %8139 = vmatpush3.bf16.msra.mxu1 %v9073_v59  ;;  %7082 = vmatprep.mubr.bf16.mxu1 %v6296_v57  ;;  %v9108_v59 = vld [vmem:[%s11795_s8 + $0x260] sm:$0xff]   ;;  %v9112_v57 = vld [vmem:[%s11795_s8 + $0x270] sm:$0xff]  }
 0x8b1   :  { %8140 = vmatprep.subr.bf16.mxu1 %v9074_v4  ;;  %v9111_v4 = vld [vmem:[%s11795_s8 + $0x228] sm:$0xff]  }
 0x8b4   :  { %8141 = vmatpush3.bf16.msra.mxu1 %v9075_v61  ;;  %v9113_v61 = vld [vmem:[%s11795_s8 + $0x230] sm:$0xff]  }
 0x8b5   :  { %8142 = vmatprep.subr.bf16.mxu1 %v9076_v63  ;;  %v9114_v63 = vld [vmem:[%s11795_s8 + $0x278] sm:$0xff]  }
 0x8b8   :  { %8143 = vmatpush3.bf16.msra.mxu1 %v9077_v3  ;;  %v9115_v3 = vld [vmem:[%s11795_s8 + $0x238] sm:$0xff]  }
 0x8b9   :  { %8144 = vmatprep.subr.bf16.mxu1 %v9078_v5  ;;  %v6269_v5 = vld [vmem:[#allocation7 + $0x90] sm:$0xff] }
 0x8bc   :  { %8145 = vmatpush3.bf16.msra.mxu1 %v9079_v6  ;;  %v6280_v6 = vld [vmem:[#allocation7 + $0xe8] sm:$0xff] }
 0x8bd   :  { %8146 = vmatprep.subr.bf16.mxu1 %v9080_v43  ;;  %v6290_v43 = vld [vmem:[#allocation7 + $0x138] sm:$0xff] }
 0x8c0   :  { %8147 = vmatpush3.bf16.msra.mxu1 %v9081_v45  ;;  %v6299_v45 = vpack.c.bf16 %v6269_v5, %v11479_v38  ;;  %v6471_v38 = vld [vmem:[%s11789_s2 + $0x5] ss:$0 sm:$0xff]  ;;  %s9164_s2 = smov [#allocation8]  }
 0x8c1   :  { %8148 = vmatprep.subr.bf16.mxu1 %v9082_v33  ;;  %v6310_v33 = vpack.c.bf16 %v6290_v43, %v6280_v6  ;;  %s7230_s25 = sshll.u32 %s9164_s2, 4  ;;  %s7231_s25 = int_to_ptr.vmem [resolvable:$true] %s7230_s25 }
 0x8c2   :  { %s9134_s10 = scalar_lea.vmem %s7231_s25, 512  ;;  %p9139_p1 = scmp.lt.s32.totalorder %s7231_s25, %s7231_s25 }
 0x8c3   :  { %p9135_p0 = scmp.ne.s32.totalorder %s7231_s25, %s9134_s10  ;;  %p9140_p2 = scmp.lt.s32.totalorder %s9134_s10, %s9134_s10 }
 0x8c4   :  { %8149 = vmatpush3.bf16.msra.mxu1 %v9083_v51  ;;  %v6289_v51 = vld [vmem:[#allocation7 + $0x130] sm:$0xff] }
 0x8c5   :  { %8162 = vmatprep.subr.bf16.mxu1 %v9084_v18  ;;  %v6309_v18 = vpack.c.bf16 %v6289_v51, %v11540_v62  ;;  %p9141_p3 = por %p9140_p2, %p9139_p1 }
 0x8c7   :  { %7083 = vmatmul.mubr.bf16.vlgmr.msra.gmra.mrb[64].mxu1 %v6295_v13  ;;  %p9142_p4 = pnand %p9141_p3, %p9135_p0 }
 0x8c8   :  { %7090 = vmatprep.mubr.bf16.mxu1 %v6306_v15  ;;  %8163 = vmatpush3.bf16.msra.mxu1 %v9085_v11 }
 0x8c9   :  { %8164 = vmatprep.subr.bf16.mxu1 %v9086_v14 }
 0x8cc   :  { %8165 = vmatpush3.bf16.msra.mxu1 %v9087_v0 }
 0x8cd   :  { %8166 = vmatprep.subr.bf16.mxu1 %v9088_v12 }
 0x8cf   :  { %7091 = vmatmul.mubr.bf16.gmra.mrb[68].mxu1 %v6305_v19 }
 0x8d0   :  { %8167 = vmatpush3.bf16.msra.mxu1 %v9089_v60  ;;  %7131 = vmatprep.mubr.bf16.mxu1 %v6298_v21 }
 0x8d1   :  { %8168 = vmatprep.subr.bf16.mxu1 %v9090_v1 }
 0x8d4   :  { %8169 = vmatpush3.bf16.msra.mxu1 %v9091_v22 }
 0x8d5   :  { %8170 = vmatprep.subr.bf16.mxu1 %v9092_v25 }
 0x8d8   :  { %8171 = vmatpush3.bf16.msra.mxu1 %v9093_v26 }
 0x8d9   :  { %8172 = vmatprep.subr.bf16.mxu1 %v9094_v28 }
 0x8dc   :  { %8173 = vmatpush3.bf16.msra.mxu1 %v9095_v27 }
 0x8dd   :  { %8174 = vmatprep.subr.bf16.mxu1 %v9096_v41 }
 0x8e0   :  { %8175 = vmatpush3.bf16.msra.mxu1 %v9097_v29 }
 0x8e1   :  { %8176 = vmatprep.subr.bf16.mxu1 %v9098_v30 }
 0x8e4   :  { %8177 = vmatpush3.bf16.msra.mxu1 %v9099_v31 }
 0x8e5   :  { %8190 = vmatprep.subr.bf16.mxu1 %v9100_v32 }
 0x8e7   :  { %7132 = vmatmul.mubr.bf16.vlgmr.msra.gmra.mrb[72].mxu1 %v6297_v24 }
 0x8e8   :  { %7139 = vmatprep.mubr.bf16.mxu1 %v6308_v35  ;;  %8191 = vmatpush3.bf16.msra.mxu1 %v9101_v23 }
 0x8e9   :  { %8192 = vmatprep.subr.bf16.mxu1 %v9102_v34 }
 0x8ec   :  { %8193 = vmatpush3.bf16.msra.mxu1 %v9103_v36 }
 0x8ed   :  { %8194 = vmatprep.subr.bf16.mxu1 %v9104_v37 }
 0x8ef   :  { %7140 = vmatmul.mubr.bf16.gmra.mrb[76].mxu1 %v6307_v50 }
 0x8f0   :  { %8195 = vmatpush3.bf16.msra.mxu1 %v9105_v48  ;;  %7180 = vmatprep.mubr.bf16.mxu1 %v6300_v56 }
 0x8f1   :  { %8196 = vmatprep.subr.bf16.mxu1 %v9106_v55 }
 0x8f4   :  { %8197 = vmatpush3.bf16.msra.mxu1 %v9107_v49 }
 0x8f5   :  { %8198 = vmatprep.subr.bf16.mxu1 %v9108_v59 }
 0x8f8   :  { %8199 = vmatpush3.bf16.msra.mxu1 %v9109_v39 }
 0x8f9   :  { %8200 = vmatprep.subr.bf16.mxu1 %v9110_v16 }
 0x8fc   :  { %8201 = vmatpush3.bf16.msra.mxu1 %v9111_v4 }
 0x8fd   :  { %8202 = vmatprep.subr.bf16.mxu1 %v9112_v57 }
 0x900   :  { %8203 = vmatpush3.bf16.msra.mxu1 %v9113_v61 }
 0x901   :  { %8204 = vmatprep.subr.bf16.mxu1 %v9114_v63 }
 0x904   :  { %8205 = vmatpush3.bf16.msra.mxu1 %v9115_v3 }
 0x907   :  { %7181 = vmatmul.mubr.bf16.vlgmr.msra.gmra.mrb[80].mxu1 %v6299_v45 }
 0x908   :  { %7188 = vmatprep.mubr.bf16.mxu1 %v6310_v33 }
 0x90f   :  { %7189 = vmatmul.mubr.bf16.gmra.mrb[84].mxu1 %v6309_v18 }
 0x95a   :  { %v8094_v17 = vpop.f32.mrb[48].mxu1 }
 0x95b   :  { %v8095_v7 = vpop.f32.mrb[49].mxu1 }
 0x95c   :  { %v8096_v8 = vadd.f32 %v8095_v7, %v8094_v17  ;;  %v8097_v9 = vpop.f32.mrb[50].mxu1 }
 0x95d   :  { %v8098_v11 = vpop.f32.mrb[51].mxu1 }
 0x95e   :  { %v8099_v13 = vadd.f32 %v8098_v11, %v8097_v9  ;;  %v6987_v62 = vadd.f32 %v8096_v8, %v6471_v38 }
 0x960   :  { %v6990_v21 = vadd.f32 %v8099_v13, %v6471_v38 }
 0x962   :  { %v8100_v14 = vpop.f32.mrb[52].mxu1 }
 0x963   :  { %v8101_v15 = vpop.f32.mrb[53].mxu1 }
 0x964   :  { %v8102_v0 = vadd.f32 %v8101_v15, %v8100_v14  ;;  %v8103_v12 = vpop.f32.mrb[54].mxu1 }
 0x965   :  { %v8104_v10 = vpop.f32.mrb[55].mxu1 }
 0x966   :  { %v8105_v52 = vadd.f32 %v8104_v10, %v8103_v12  ;;  %v6995_v41 = vadd.f32 %v8102_v0, %v6471_v38 }
 0x968   :  { %v6998_v32 = vadd.f32 %v8105_v52, %v6471_v38 }
 0x97a   :  { %v8122_v58 = vpop.f32.mrb[56].mxu1 }
 0x97b   :  { %v8123_v60 = vpop.f32.mrb[57].mxu1 }
 0x97c   :  { %v8124_v19 = vadd.f32 %v8123_v60, %v8122_v58  ;;  %v8125_v20 = vpop.f32.mrb[58].mxu1 }
 0x97d   :  { %v8126_v1 = vpop.f32.mrb[59].mxu1 }
 0x97e   :  { %v7036_v22 = vadd.f32 %v8124_v19, %v6987_v62  ;;  %v8127_v25 = vadd.f32 %v8126_v1, %v8125_v20 }
 0x980   :  { %v7039_v26 = vadd.f32 %v8127_v25, %v6990_v21 }
 0x982   :  { %v8128_v28 = vpop.f32.mrb[60].mxu1 }
 0x983   :  { %v8129_v27 = vpop.f32.mrb[61].mxu1 }
 0x984   :  { %v8130_v29 = vadd.f32 %v8129_v27, %v8128_v28  ;;  %v8131_v30 = vpop.f32.mrb[62].mxu1 }
 0x985   :  { %v8132_v31 = vpop.f32.mrb[63].mxu1 }
 0x986   :  { %v7044_v40 = vadd.f32 %v8130_v29, %v6995_v41  ;;  %v8133_v46 = vadd.f32 %v8132_v31, %v8131_v30 }
 0x988   :  { %v7047_v2 = vadd.f32 %v8133_v46, %v6998_v32 }
 0x99a   :  { %v8150_v54 = vpop.f32.mrb[64].mxu1 }
 0x99b   :  { %v8151_v23 = vpop.f32.mrb[65].mxu1 }
 0x99c   :  { %v8152_v24 = vadd.f32 %v8151_v23, %v8150_v54  ;;  %v8153_v34 = vpop.f32.mrb[66].mxu1 }
 0x99d   :  { %v8154_v35 = vpop.f32.mrb[67].mxu1 }
 0x99e   :  { %v7085_v36 = vadd.f32 %v8152_v24, %v7036_v22  ;;  %v8155_v37 = vadd.f32 %v8154_v35, %v8153_v34 }
 0x9a0   :  { %v7088_v42 = vadd.f32 %v8155_v37, %v7039_v26 }
 0x9a2   :  { %v8156_v44 = vpop.f32.mrb[68].mxu1 }
 0x9a3   :  { %v8157_v47 = vpop.f32.mrb[69].mxu1 }
 0x9a4   :  { %v8158_v48 = vadd.f32 %v8157_v47, %v8156_v44  ;;  %v8159_v50 = vpop.f32.mrb[70].mxu1 }
 0x9a5   :  { %v8160_v53 = vpop.f32.mrb[71].mxu1 }
 0x9a6   :  { %v7093_v55 = vadd.f32 %v8158_v48, %v7044_v40  ;;  %v8161_v56 = vadd.f32 %v8160_v53, %v8159_v50 }
 0x9a8   :  { %v7096_v49 = vadd.f32 %v8161_v56, %v7047_v2 }
 0x9ba   :  { %v8178_v59 = vpop.f32.mrb[72].mxu1 }
 0x9bb   :  { %v8179_v39 = vpop.f32.mrb[73].mxu1 }
 0x9bc   :  { %v8180_v16 = vadd.f32 %v8179_v39, %v8178_v59  ;;  %v8181_v4 = vpop.f32.mrb[74].mxu1 }
 0x9bd   :  { %v8182_v57 = vpop.f32.mrb[75].mxu1 }
 0x9be   :  { %v7134_v61 = vadd.f32 %v8180_v16, %v7085_v36  ;;  %v8183_v63 = vadd.f32 %v8182_v57, %v8181_v4 }
 0x9c0   :  { %v7137_v3 = vadd.f32 %v8183_v63, %v7088_v42 }
 0x9c2   :  { %v8184_v5 = vpop.f32.mrb[76].mxu1 }
 0x9c3   :  { %v8185_v6 = vpop.f32.mrb[77].mxu1 }
 0x9c4   :  { %v8186_v43 = vadd.f32 %v8185_v6, %v8184_v5  ;;  %v8187_v45 = vpop.f32.mrb[78].mxu1 }
 0x9c5   :  { %v8188_v33 = vpop.f32.mrb[79].mxu1 }
 0x9c6   :  { %v7142_v51 = vadd.f32 %v8186_v43, %v7093_v55  ;;  %v8189_v18 = vadd.f32 %v8188_v33, %v8187_v45 }
 0x9c8   :  { %v7145_v17 = vadd.f32 %v8189_v18, %v7096_v49 }
 0x9da   :  { %v8206_v7 = vpop.f32.mrb[80].mxu1 }
 0x9db   :  { %v8207_v8 = vpop.f32.mrb[81].mxu1 }
 0x9dc   :  { %v8208_v9 = vadd.f32 %v8207_v8, %v8206_v7  ;;  %v8209_v11 = vpop.f32.mrb[82].mxu1 }
 0x9dd   :  { %v8210_v13 = vpop.f32.mrb[83].mxu1 }
 0x9de   :  { %v7183_v14 = vadd.f32 %v8208_v9, %v7134_v61  ;;  %v8211_v15 = vadd.f32 %v8210_v13, %v8209_v11 }
 0x9e0   :  { %v7898_v0 = vmul.f32 -1.442695, %v7183_v14  ;;  %v7186_v12 = vadd.f32 %v8211_v15, %v7137_v3 }
 0x9e2   :  { %9118 = vpow2.f32 %v7898_v0  ;;  %v7899_v10 = vmul.f32 -1.442695, %v7186_v12  ;;  %v8212_v52 = vpop.f32.mrb[84].mxu1 }
 0x9e3   :  { %v8213_v38 = vpop.f32.mrb[85].mxu1 }
 0x9e4   :  { %9120 = vpow2.f32 %v7899_v10  ;;  %v8214_v58 = vadd.f32 %v8213_v38, %v8212_v52  ;;  %v8215_v60 = vpop.f32.mrb[86].mxu1 }
 0x9e5   :  { %v8216_v62 = vpop.f32.mrb[87].mxu1 }
 0x9e6   :  { %v7191_v19 = vadd.f32 %v8214_v58, %v7142_v51  ;;  %v8217_v20 = vadd.f32 %v8216_v62, %v8215_v60 }
 0x9e8   :  { %v7900_v1 = vmul.f32 -1.442695, %v7191_v19  ;;  %v7194_v21 = vadd.f32 %v8217_v20, %v7145_v17 }
 0x9ea   :  { %9122 = vpow2.f32 %v7900_v1  ;;  %v7901_v22 = vmul.f32 -1.442695, %v7194_v21 }
 0x9ec   :  { %v9119_v25 = vpop.eup %9118  ;;  %9124 = vpow2.f32 %v7901_v22 }
 0x9ed   :  { %v7209_v26 = vadd.f32 1.0, %v9119_v25 }
 0x9ee   :  { %v9121_v28 = vpop.eup %9120 }
 0x9ef   :  { %9126 = vrcp.f32 %v7209_v26  ;;  %v7210_v27 = vadd.f32 1.0, %v9121_v28 }
 0x9f1   :  { %9128 = vrcp.f32 %v7210_v27 }
 0x9f4   :  { %v9123_v41 = vpop.eup %9122 }
 0x9f5   :  { %v7211_v29 = vadd.f32 1.0, %v9123_v41 }
 0x9f6   :  { %v9125_v30 = vpop.eup %9124 }
 0x9f7   :  { %9130 = vrcp.f32 %v7211_v29  ;;  %v7212_v31 = vadd.f32 1.0, %v9125_v30 }
 0x9f9   :  { %v9127_v32 = vpop.eup %9126  ;;  %9132 = vrcp.f32 %v7212_v31 }
 0x9fa   :  { %7221 = vst.msk [vmem:[#allocation8] sm:$0xff] %vm11801_vm0, %v9127_v32 }
 0x9fb   :  { %v9129_v40 = vpop.eup %9128 }
 0x9fc   :  { %7222 = vst.msk [vmem:[#allocation8 + $0x8] sm:$0xff] %vm11802_vm3, %v9129_v40 }
 0xa01   :  { %v9131_v46 = vpop.eup %9130 }
 0xa02   :  { %7223 = vst.msk [vmem:[#allocation8 + $0x10] sm:$0xff] %vm11803_vm4, %v9131_v46 }
 0xa03   :  { %v9133_v2 = vpop.eup %9132 }
 0xa04   :  { %7224 = vst.msk [vmem:[#allocation8 + $0x18] sm:$0xff] %vm11804_vm5, %v9133_v2 }
 0xa05   :  { %9145 = shalt.err (!%p9142_p4)
}
 0xa06   :  { %s9146_s27 = scalar_lea.hbm %s11796_s9, 512 }
 0xa07   :  { %p9147_p5 = scmp.ne.s32.totalorder %s11796_s9, %s9146_s27  ;;  %p9150_p6 = scmp.lt.u32.totalorder %s9146_s27, %s11796_s9 }
 0xa09   :  { %p9152_p7 = pnand %p9150_p6, %p9147_p5 }
 0xa0b   :  { %9155 = shalt.err (!%p9152_p7)
}
 0xa0c   :  { %s9165_s12 = smov 128   ;;  %s9166_s13 = smov 8  }
 0xa0d   :  { %7236 = dma.vmem_to_hbm [thread:$0]  %s7231_s25, 512, %s11796_s9, [#allocation9], %s9165_s12, %s9165_s12, %s9166_s13  }
 0xa0e   :  { %9156 = dma.done.wait [#allocation9], 512  }
 0xa0f   :  { %9157 = vsyncadd [#allocation9], 4294966784 }
 0xa10   :  { %7244 = vsyncpa [#allocation9], 1 }

</bundles_post_ra>
